<compile_context>
chip_gen: v5e
topology: v5e:2x2
jax: 0.10.0
libtpu: 0.0.40
codegen_flags: <defaults>
</compile_context>

<pallas_src>
import functools

import jax
import jax.numpy as jnp
import numpy as np
from jax.experimental import pallas as pl
from jax.experimental.pallas import tpu as pltpu

_MXU_ROWS = 256          # lcm of v5e (128) and v6e/v7x (256) MXU heights
_TILE_N_CAP = 1024       # keeps per-step VMEM use small on all generations


def _linear_network_kernel(x_ref, w1_ref, b1_ref, w2_ref, b2_ref,
                           w3_ref, b3_ref, o_ref):
    # Fused (conv -> relu -> conv -> relu -> conv) over one row tile.
    # Matmul inputs bf16 (native MXU rate), accumulation + epilogues f32.
    x = x_ref[...].astype(jnp.bfloat16)
    h = jnp.dot(x, w1_ref[...], preferred_element_type=jnp.float32)
    h = jnp.maximum(h + b1_ref[...], 0.0)
    # TODO(synk): dropout is identity (eval-mode); training-mode RNG masking omitted.
    h = jnp.dot(h.astype(jnp.bfloat16), w2_ref[...],
                preferred_element_type=jnp.float32)
    h = jnp.maximum(h + b2_ref[...], 0.0)
    y = jnp.dot(h.astype(jnp.bfloat16), w3_ref[...],
                preferred_element_type=jnp.float32)
    y = y + b3_ref[...]
    o_ref[...] = y.astype(o_ref.dtype)


def _banded_conv_weight(w, L):
    """torch Conv1d weight (Cout, Cin, 3) -> banded matrix (Cin*L, Cout*L).

    y_flat[n, co*L + lo] = sum_{ci, li} x_flat[n, ci*L + li] * W[ci*L + li, co*L + lo]
    reproduces Conv1d(kernel_size=3, stride=1, padding=1) exactly.
    """
    w = w.astype(jnp.float32)
    Cout, Cin, K = w.shape
    li = jnp.arange(L)[:, None]                     # input position
    lo = jnp.arange(L)[None, :]                     # output position
    d = li - lo + 1                                 # tap index, valid in [0, K)
    valid = ((d >= 0) & (d < K)).astype(jnp.float32)
    dk = jnp.clip(d, 0, K - 1)
    wt = jnp.transpose(w, (1, 0, 2))                # (Cin, Cout, K)
    band = wt[:, :, dk] * valid[None, None, :, :]   # (Cin, Cout, L_in, L_out)
    band = jnp.transpose(band, (0, 2, 1, 3))        # (Cin, L_in, Cout, L_out)
    return band.reshape(Cin * L, Cout * L)


def prepare_params(params, length):
    """Build banded layer weights once (hoisted out of the per-call path)."""
    w1, b1, w2, b2, w3, b3 = params
    L = length
    W1 = _banded_conv_weight(w1, L).astype(jnp.bfloat16)
    W2 = _banded_conv_weight(w2, L).astype(jnp.bfloat16)
    W3 = _banded_conv_weight(w3, L).astype(jnp.bfloat16)
    B1 = jnp.repeat(b1.astype(jnp.float32), L).reshape(1, -1)
    B2 = jnp.repeat(b2.astype(jnp.float32), L).reshape(1, -1)
    B3 = jnp.repeat(b3.astype(jnp.float32), L).reshape(1, -1)
    return (W1, B1, W2, B2, W3, B3)


def _round_up(n, m):
    return ((n + m - 1) // m) * m


def _pick_tile_n(n_pad, base=_MXU_ROWS, cap=_TILE_N_CAP):
    """Largest multiple of `base` dividing n_pad, <= cap, and leaving >= 2 grid
    steps (v7x megacore) whenever n_pad allows it.  No tile_n = N fallback."""
    cap = min(cap, n_pad)
    if n_pad >= 2 * base:
        cap = min(cap, n_pad // 2)
    tile = base
    t = base
    while t <= cap:
        if n_pad % t == 0:
            tile = t
        t += base
    return tile


@functools.partial(jax.jit, static_argnames=("length",))
def linear_network_forward(X, banded, length):
    """X: (batch, seq, features) with features = input_features * length."""
    W1, B1, W2, B2, W3, B3 = banded
    B, S, F = X.shape
    L = length
    assert F % L == 0
    CoutL = W3.shape[1]
    Cout = CoutL // L
    N = B * S

    # Matches torch: X.view(B*S, Cin, L) row-major == X.reshape(N, F).
    x = X.reshape(N, F)
    n_pad = _round_up(N, _MXU_ROWS)
    if n_pad != N:
        x = jnp.pad(x, ((0, n_pad - N), (0, 0)))
    tile_n = _pick_tile_n(n_pad)

    def const_spec(shape):
        # Whole-array block whose block index never changes across the grid.
        return pl.BlockSpec(shape, lambda i, _n=len(shape): (0,) * _n)

    out = pl.pallas_call(
        _linear_network_kernel,
        out_shape=jax.ShapeDtypeStruct((n_pad, CoutL), X.dtype),
        grid_spec=pltpu.PrefetchScalarGridSpec(
            num_scalar_prefetch=0,
            grid=(n_pad // tile_n,),
            in_specs=[
                pl.BlockSpec((tile_n, F), lambda i: (i, 0)),
                const_spec(W1.shape), const_spec(B1.shape),
                const_spec(W2.shape), const_spec(B2.shape),
                const_spec(W3.shape), const_spec(B3.shape),
            ],
            out_specs=pl.BlockSpec((tile_n, CoutL), lambda i: (i, 0)),
        ),
        compiler_params=pltpu.CompilerParams(
            dimension_semantics=("parallel",),
            vmem_limit_bytes=32 * 1024 * 1024),
    )(x, W1, B1, W2, B2, W3, B3)

    # (N, Cout*L) reshapes directly into the torch output layout.
    return out[:N].reshape(B, S, Cout, L)


def reference_forward(X, params, length):
    """Pure-JAX f32 reference mirroring the PyTorch module (eval mode)."""
    w1, b1, w2, b2, w3, b3 = params
    B, S, F = X.shape
    Cin = F // length
    x = X.reshape(B * S, Cin, length).astype(jnp.float32)

    def conv(h, w, b):
        y = jax.lax.conv_general_dilated(
            h, w.astype(jnp.float32), window_strides=(1,), padding=((1, 1),),
            dimension_numbers=("NCH", "OIH", "NCH"))
        return y + b.reshape(1, -1, 1)

    h = jax.nn.relu(conv(x, w1, b1))
    h = jax.nn.relu(conv(h, w2, b2))
    y = conv(h, w3, b3)
    return y.reshape(B, S, w3.shape[0], length)


if __name__ == "__main__":
    key = jax.random.PRNGKey(0)
    B, S = 2, 8
    input_features, length, hiddens, output_features = 4, 16, 32, 8
    F = input_features * length

    ks = jax.random.split(key, 4)
    X = jax.random.normal(ks[0], (B, S, F), dtype=jnp.float32)

    def init_conv(k, cout, cin, ksz=3):
        kw, kb = jax.random.split(k)
        bound = 1.0 / float(np.sqrt(cin * ksz))
        w = jax.random.uniform(kw, (cout, cin, ksz), minval=-bound,
                               maxval=bound, dtype=jnp.float32)
        b = jax.random.uniform(kb, (cout,), minval=-bound,
                               maxval=bound, dtype=jnp.float32)
        return w, b

    w1, b1 = init_conv(ks[1], hiddens, input_features)
    w2, b2 = init_conv(ks[2], hiddens, hiddens)
    w3, b3 = init_conv(ks[3], output_features, hiddens)
    params = (w1, b1, w2, b2, w3, b3)

    banded = prepare_params(params, length)        # built once, reused per call
    out = linear_network_forward(X, banded, length)
    out = jax.block_until_ready(out)

    assert out.shape == (B, S, output_features, length)
    ref = reference_forward(X, params, length)
    # bf16 matmul inputs with f32 accumulation -> relaxed tolerance.
    np.testing.assert_allclose(np.asarray(out), np.asarray(ref),
                               rtol=2e-2, atol=2e-2)
    print("KERNEL_OK")
</pallas_src>

<mosaic_0001>
module attributes {stable_mosaic.version = 11 : i64} {
  func.func @_linear_network_kernel(%arg0: i32, %arg1: memref<256x64xf32, #tpu.memory_space<vmem>>, %arg2: memref<64x512xbf16, #tpu.memory_space<vmem>>, %arg3: memref<1x512xf32, #tpu.memory_space<vmem>>, %arg4: memref<512x512xbf16, #tpu.memory_space<vmem>>, %arg5: memref<1x512xf32, #tpu.memory_space<vmem>>, %arg6: memref<512x128xbf16, #tpu.memory_space<vmem>>, %arg7: memref<1x128xf32, #tpu.memory_space<vmem>>, %arg8: memref<256x128xf32, #tpu.memory_space<vmem>>) attributes {dimension_semantics = [#tpu.dimension_semantics<parallel>], iteration_bounds = array<i64: 1>, scalar_prefetch = 0 : i64, scratch_operands = 0 : i64, tpu.core_type = #tpu.core_type<tc>, window_params = [{transform_indices = @transform_0, window_bounds = array<i64: 256, 64>}, {pipeline_mode = #tpu.pipeline_mode<synchronous>, transform_indices = @transform_1, window_bounds = array<i64: 64, 512>}, {pipeline_mode = #tpu.pipeline_mode<synchronous>, transform_indices = @transform_2, window_bounds = array<i64: 1, 512>}, {pipeline_mode = #tpu.pipeline_mode<synchronous>, transform_indices = @transform_3, window_bounds = array<i64: 512, 512>}, {pipeline_mode = #tpu.pipeline_mode<synchronous>, transform_indices = @transform_4, window_bounds = array<i64: 1, 512>}, {pipeline_mode = #tpu.pipeline_mode<synchronous>, transform_indices = @transform_5, window_bounds = array<i64: 512, 128>}, {pipeline_mode = #tpu.pipeline_mode<synchronous>, transform_indices = @transform_6, window_bounds = array<i64: 1, 128>}, {transform_indices = @transform_7, window_bounds = array<i64: 256, 128>}]} {
    %c0 = arith.constant 0 : index
    %c0_0 = arith.constant 0 : index
    %0 = vector.load %arg1[%c0, %c0_0] : memref<256x64xf32, #tpu.memory_space<vmem>>, vector<256x64xf32>
    %1 = arith.truncf %0 : vector<256x64xf32> to vector<256x64xbf16>
    %c0_1 = arith.constant 0 : index
    %c0_2 = arith.constant 0 : index
    %2 = vector.load %arg2[%c0_1, %c0_2] : memref<64x512xbf16, #tpu.memory_space<vmem>>, vector<64x512xbf16>
    %cst = arith.constant dense<0.000000e+00> : vector<256x512xf32>
    %3 = tpu.matmul %1, %2, %cst {dimension_numbers = #tpu.dot_dimension_numbers<[1], [0], [0], [1], [0, 0, 1, 1], [], []>} : vector<256x64xbf16>, vector<64x512xbf16>, vector<256x512xf32> -> vector<256x512xf32>
    %c0_3 = arith.constant 0 : index
    %c0_4 = arith.constant 0 : index
    %4 = vector.load %arg3[%c0_3, %c0_4] : memref<1x512xf32, #tpu.memory_space<vmem>>, vector<1x512xf32>
    %5 = vector.broadcast %4 : vector<1x512xf32> to vector<256x512xf32>
    %6 = arith.addf %3, %5 : vector<256x512xf32>
    %cst_5 = arith.constant 0.000000e+00 : f32
    %7 = vector.broadcast %cst_5 : f32 to vector<256x512xf32>
    %8 = arith.maximumf %6, %7 : vector<256x512xf32>
    %9 = arith.truncf %8 : vector<256x512xf32> to vector<256x512xbf16>
    %c0_6 = arith.constant 0 : index
    %c0_7 = arith.constant 0 : index
    %10 = vector.load %arg4[%c0_6, %c0_7] : memref<512x512xbf16, #tpu.memory_space<vmem>>, vector<512x512xbf16>
    %cst_8 = arith.constant dense<0.000000e+00> : vector<256x512xf32>
    %11 = tpu.matmul %9, %10, %cst_8 {dimension_numbers = #tpu.dot_dimension_numbers<[1], [0], [0], [1], [0, 0, 1, 1], [], []>} : vector<256x512xbf16>, vector<512x512xbf16>, vector<256x512xf32> -> vector<256x512xf32>
    %c0_9 = arith.constant 0 : index
    %c0_10 = arith.constant 0 : index
    %12 = vector.load %arg5[%c0_9, %c0_10] : memref<1x512xf32, #tpu.memory_space<vmem>>, vector<1x512xf32>
    %13 = vector.broadcast %12 : vector<1x512xf32> to vector<256x512xf32>
    %14 = arith.addf %11, %13 : vector<256x512xf32>
    %cst_11 = arith.constant 0.000000e+00 : f32
    %15 = vector.broadcast %cst_11 : f32 to vector<256x512xf32>
    %16 = arith.maximumf %14, %15 : vector<256x512xf32>
    %17 = arith.truncf %16 : vector<256x512xf32> to vector<256x512xbf16>
    %c0_12 = arith.constant 0 : index
    %c0_13 = arith.constant 0 : index
    %18 = vector.load %arg6[%c0_12, %c0_13] : memref<512x128xbf16, #tpu.memory_space<vmem>>, vector<512x128xbf16>
    %cst_14 = arith.constant dense<0.000000e+00> : vector<256x128xf32>
    %19 = tpu.matmul %17, %18, %cst_14 {dimension_numbers = #tpu.dot_dimension_numbers<[1], [0], [0], [1], [0, 0, 1, 1], [], []>} : vector<256x512xbf16>, vector<512x128xbf16>, vector<256x128xf32> -> vector<256x128xf32>
    %c0_15 = arith.constant 0 : index
    %c0_16 = arith.constant 0 : index
    %20 = vector.load %arg7[%c0_15, %c0_16] : memref<1x128xf32, #tpu.memory_space<vmem>>, vector<1x128xf32>
    %21 = vector.broadcast %20 : vector<1x128xf32> to vector<256x128xf32>
    %22 = arith.addf %19, %21 : vector<256x128xf32>
    %c0_17 = arith.constant 0 : index
    %c0_18 = arith.constant 0 : index
    %23 = vector.load %arg8[%c0_17, %c0_18] : memref<256x128xf32, #tpu.memory_space<vmem>>, vector<256x128xf32>
    tpu.vector_store %arg8[%c0_17, %c0_18], %22 {strides = array<i32>} : memref<256x128xf32, #tpu.memory_space<vmem>>, vector<256x128xf32>,
    return
  }
  func.func @transform_0(%arg0: i32) -> (i32, i32) {
    %c0_i32 = arith.constant 0 : i32
    %c0_i32_0 = arith.constant 0 : i32
    return %arg0, %c0_i32 : i32, i32
  }
  func.func @transform_1(%arg0: i32) -> (i32, i32) {
    %c0_i32 = arith.constant 0 : i32
    %c0_i32_0 = arith.constant 0 : i32
    %c0_i32_1 = arith.constant 0 : i32
    return %c0_i32, %c0_i32_0 : i32, i32
  }
  func.func @transform_2(%arg0: i32) -> (i32, i32) {
    %c0_i32 = arith.constant 0 : i32
    %c0_i32_0 = arith.constant 0 : i32
    %c0_i32_1 = arith.constant 0 : i32
    return %c0_i32, %c0_i32_0 : i32, i32
  }
  func.func @transform_3(%arg0: i32) -> (i32, i32) {
    %c0_i32 = arith.constant 0 : i32
    %c0_i32_0 = arith.constant 0 : i32
    %c0_i32_1 = arith.constant 0 : i32
    return %c0_i32, %c0_i32_0 : i32, i32
  }
  func.func @transform_4(%arg0: i32) -> (i32, i32) {
    %c0_i32 = arith.constant 0 : i32
    %c0_i32_0 = arith.constant 0 : i32
    %c0_i32_1 = arith.constant 0 : i32
    return %c0_i32, %c0_i32_0 : i32, i32
  }
  func.func @transform_5(%arg0: i32) -> (i32, i32) {
    %c0_i32 = arith.constant 0 : i32
    %c0_i32_0 = arith.constant 0 : i32
    %c0_i32_1 = arith.constant 0 : i32
    return %c0_i32, %c0_i32_0 : i32, i32
  }
  func.func @transform_6(%arg0: i32) -> (i32, i32) {
    %c0_i32 = arith.constant 0 : i32
    %c0_i32_0 = arith.constant 0 : i32
    %c0_i32_1 = arith.constant 0 : i32
    return %c0_i32, %c0_i32_0 : i32, i32
  }
  func.func @transform_7(%arg0: i32) -> (i32, i32) {
    %c0_i32 = arith.constant 0 : i32
    %c0_i32_0 = arith.constant 0 : i32
    return %arg0, %c0_i32 : i32, i32
  }
}

</mosaic_0001>

<bundles_post_ra>
// kernel: linear_network_forward.1
= control target key start
LH: loop header
LB: loop body
LE: loop exit
PB: predicated region body
PF: predicated region fallthrough
CT: control target
= control target key end

     0   :  { %12 = vsyncpa [#allocation3], 0  ;;  %s6164_s0 = inlined_call_operand.vmem [shape: f32[256,64], index: 0, kind: input, shape index: {}]   ;;  %s6165_s1 = inlined_call_operand.hbm [shape: bf16[64,512], index: 1, kind: input, shape index: {}]   ;;  %s6166_s2 = inlined_call_operand.vmem [shape: f32[1,512], index: 2, kind: input, shape index: {}]   ;;  %s6167_s3 = inlined_call_operand.hbm [shape: bf16[512,512], index: 3, kind: input, shape index: {}]   ;;  %s6168_s4 = inlined_call_operand.vmem [shape: f32[1,512], index: 4, kind: input, shape index: {}]   ;;  %s6169_s5 = inlined_call_operand.vmem [shape: bf16[512,128], index: 5, kind: input, shape index: {}]   ;;  %s6170_s6 = inlined_call_operand.vmem [shape: f32[1,128], index: 6, kind: input, shape index: {}]   ;;  %s6171_s7 = inlined_call_operand.vmem [shape: f32[256,128], index: 7, kind: output, shape index: {}]  }
   0x1   :  { %s20_s26 = sshll.u32 %s6165_s1, 4  ;;  %s21_s26 = int_to_ptr.hbm [resolvable:$true] %s20_s26 }
   0x2   :  { %13 = vsyncpa [#allocation5], 0  ;;  %s4860_s27 = smov [#allocation2]   ;;  %s35_s8 = sshll.u32 %s6167_s3, 4  ;;  %s36_s8 = int_to_ptr.hbm [resolvable:$true] %s35_s8 }
   0x3   :  { %s22_s28 = sshll.u32 %s4860_s27, 4  ;;  %s4861_s9 = smov 256   ;;  %s23_s28 = int_to_ptr.vmem [resolvable:$true] %s22_s28 }
   0x4   :  { %s4862_s10 = smov 16   ;;  %s4863_s11 = smov [#allocation4]  }
   0x5   :  { %28 = dma.hbm_to_vmem [thread:$0]  %s21_s26, 2048, %s23_s28, [#allocation3], %s4861_s9, %s4861_s9, %s4862_s10  }
   0x6   :  { %s37_s12 = sshll.u32 %s4863_s11, 4  ;;  %s38_s12 = int_to_ptr.vmem [resolvable:$true] %s37_s12 }
   0x7   :  { %43 = dma.hbm_to_vmem [thread:$0]  %s36_s8, 16384, %s38_s12, [#allocation5], %s4861_s9, %s4861_s9, %s4862_s10  }
   0x8   :  { %4856 = dma.done.wait [#allocation3], 2048  }
   0x9   :  { %4857 = vsyncadd [#allocation3], 4294965248 }
   0xa   :  { %4858 = dma.done.wait [#allocation5], 16384  }
   0xb   :  { %4859 = vsyncadd [#allocation5], 4294950912  ;;  %v3908_v0 = vld [vmem:[#allocation2 + $0x60] sm:$0xf]  ;;  %v4640_v1 = vld [vmem:[#allocation2 + $0x6c] sm:$0xf0] }
   0xc   :  { %v4638_v2 = vld [vmem:[#allocation2 + $0x64] sm:$0xf]  ;;  %v3909_v3 = vor.u32 %v4640_v1, %v3908_v0  ;;  %v3910_v4 = vld [vmem:[#allocation2 + $0x70] sm:$0xf0]  ;;  %v3916_v5 = vld [vmem:[#allocation2 + $0x68] sm:$0xf] }
   0xd   :  { %v4641_v6 = vld [vmem:[#allocation2 + $0x74] sm:$0xf0]  ;;  %v3913_v7 = vor.u32 %v4638_v2, %v3910_v4  ;;  %v4639_v9 = vld [vmem:[#allocation2 + $0x6c] sm:$0xf]  ;;  %v3918_v10 = vld [vmem:[#allocation2 + $0x78] sm:$0xf0] }
   0xe   :  { %v3917_v8 = vor.u32 %v4641_v6, %v3916_v5  ;;  %v3892_v11 = vld [vmem:[#allocation2 + $0x40] sm:$0xf]  ;;  %266 = vmatpush.bf16.msra.mxu0 %v3909_v3  ;;  %v3921_v12 = vor.u32 %v4639_v9, %v3918_v10  ;;  %v4636_v13 = vld [vmem:[#allocation2 + $0x4c] sm:$0xf0]  ;;  %v4634_v14 = vld [vmem:[#allocation2 + $0x44] sm:$0xf] }
   0xf   :  { %v3894_v15 = vld [vmem:[#allocation2 + $0x50] sm:$0xf0]  ;;  %355 = vmatpush.bf16.msra.mxu1 %v3913_v7  ;;  %v3893_v16 = vor.u32 %v4636_v13, %v3892_v11  ;;  %v3900_v18 = vld [vmem:[#allocation2 + $0x48] sm:$0xf]  ;;  %v4637_v19 = vld [vmem:[#allocation2 + $0x54] sm:$0xf0] }
  0x10   :  { %444 = vmatpush.bf16.msra.mxu2 %v3917_v8  ;;  %v3897_v17 = vor.u32 %v4634_v14, %v3894_v15  ;;  %v4635_v20 = vld [vmem:[#allocation2 + $0x4c] sm:$0xf]  ;;  %533 = vmatpush.bf16.msra.mxu3 %v3921_v12  ;;  %v3901_v21 = vor.u32 %v4637_v19, %v3900_v18  ;;  %v3902_v22 = vld [vmem:[#allocation2 + $0x58] sm:$0xf0]  ;;  %v3876_v23 = vld [vmem:[#allocation2 + $0x20] sm:$0xf] }
  0x11   :  { %v4632_v24 = vld [vmem:[#allocation2 + $0x2c] sm:$0xf0]  ;;  %v3905_v25 = vor.u32 %v4635_v20, %v3902_v22  ;;  %v4630_v26 = vld [vmem:[#allocation2 + $0x24] sm:$0xf]  ;;  %v3878_v27 = vld [vmem:[#allocation2 + $0x30] sm:$0xf0] }
  0x12   :  { %v3884_v28 = vld [vmem:[#allocation2 + $0x28] sm:$0xf]  ;;  %267 = vmatpush.bf16.msra.mxu0 %v3893_v16  ;;  %v3877_v29 = vor.u32 %v4632_v24, %v3876_v23  ;;  %v4633_v30 = vld [vmem:[#allocation2 + $0x34] sm:$0xf0]  ;;  %v4631_v31 = vld [vmem:[#allocation2 + $0x2c] sm:$0xf]  ;;  %v3881_v33 = vor.u32 %v4630_v26, %v3878_v27 }
  0x13   :  { %v3886_v32 = vld [vmem:[#allocation2 + $0x38] sm:$0xf0]  ;;  %356 = vmatpush.bf16.msra.mxu1 %v3897_v17  ;;  %v3885_v34 = vor.u32 %v4633_v30, %v3884_v28  ;;  %v3860_v35 = vld [vmem:[#allocation2] sm:$0xf]  ;;  %v4628_v36 = vld [vmem:[#allocation2 + $0xc] sm:$0xf0] }
  0x14   :  { %445 = vmatpush.bf16.msra.mxu2 %v3901_v21  ;;  %v4626_v37 = vld [vmem:[#allocation2 + $0x4] sm:$0xf]  ;;  %534 = vmatpush.bf16.msra.mxu3 %v3905_v25  ;;  %v3889_v38 = vor.u32 %v4631_v31, %v3886_v32  ;;  %v3862_v39 = vld [vmem:[#allocation2 + $0x10] sm:$0xf0]  ;;  %v3868_v40 = vld [vmem:[#allocation2 + $0x8] sm:$0xf]  ;;  %v3861_v45 = vor.u32 %v4628_v36, %v3860_v35 }
  0x15   :  { %v4629_v41 = vld [vmem:[#allocation2 + $0x14] sm:$0xf0]  ;;  %v4627_v42 = vld [vmem:[#allocation2 + $0xc] sm:$0xf]  ;;  %v3870_v43 = vld [vmem:[#allocation2 + $0x18] sm:$0xf0]  ;;  %v3865_v49 = vor.u32 %v4626_v37, %v3862_v39 }
  0x16   :  { %v59_v44 = vld [vmem:[%s6164_s0] sm:$0xff]  ;;  %268 = vmatpush.bf16.msra.mxu0 %v3877_v29  ;;  %v60_v46 = vld [vmem:[%s6164_s0 + $0x8] sm:$0xff]  ;;  %v4736_v48 = vld [vmem:[#allocation4 + $0x2ec] sm:$0xf0]  ;;  %v3869_v50 = vor.u32 %v4629_v41, %v3868_v40  ;;  %v3873_v52 = vor.u32 %v4627_v42, %v3870_v43  ;;  %vm213_vm0 = vcmask 523264  }
  0x17   :  { %v4356_v47 = vld [vmem:[#allocation4 + $0x2e0] sm:$0xf]  ;;  %357 = vmatpush.bf16.msra.mxu1 %v3881_v33  ;;  %v4672_v55 = vld [vmem:[#allocation4 + $0xec] sm:$0xf0]  ;;  %v91_v57 = vpack.c.bf16 %v60_v46, %v59_v44  ;;  %v62_v12 = vld [vmem:[%s6164_s0 + $0x18] sm:$0xff] }
  0x18   :  { %446 = vmatpush.bf16.msra.mxu2 %v3885_v34  ;;  %v4484_v51 = vld [vmem:[#allocation4 + $0x3e0] sm:$0xf]  ;;  %535 = vmatpush.bf16.msra.mxu3 %v3889_v38  ;;  %v4357_v53 = vor.u32 %v4736_v48, %v4356_v47  ;;  %v4768_v56 = vld [vmem:[#allocation4 + $0x3ec] sm:$0xf0]  ;;  %v64_v15 = vld [vmem:[%s6164_s0 + $0x28] sm:$0xff] }
  0x19   :  { %v4100_v54 = vld [vmem:[#allocation4 + $0xe0] sm:$0xf]  ;;  %v4485_v58 = vor.u32 %v4768_v56, %v4484_v51  ;;  %v4704_v60 = vld [vmem:[#allocation4 + $0x1ec] sm:$0xf0]  ;;  %v66_v30 = vld [vmem:[%s6164_s0 + $0x38] sm:$0xff] }
  0x1a   :  { %v4228_v59 = vld [vmem:[#allocation4 + $0x1e0] sm:$0xf]  ;;  %269 = vmatpush.bf16.msra.mxu0 %v3861_v45  ;;  %v4101_v61 = vor.u32 %v4672_v55, %v4100_v54  ;;  %v4732_v0 = vld [vmem:[#allocation4 + $0x2cc] sm:$0xf0]  ;;  %v68_v33 = vld [vmem:[%s6164_s0 + $0x48] sm:$0xff] }
  0x1b   :  { %358 = vmatpush.bf16.msra.mxu1 %v3865_v49  ;;  %v4229_v62 = vor.u32 %v4704_v60, %v4228_v59  ;;  %v4340_v63 = vld [vmem:[#allocation4 + $0x2c0] sm:$0xf]  ;;  %v4668_v3 = vld [vmem:[#allocation4 + $0xcc] sm:$0xf0]  ;;  %v70_v48 = vld [vmem:[%s6164_s0 + $0x58] sm:$0xff] }
  0x1c   :  { %447 = vmatpush.bf16.msra.mxu2 %v3869_v50  ;;  %536 = vmatpush.bf16.msra.mxu3 %v3873_v52  ;;  %v4084_v1 = vld [vmem:[#allocation4 + $0xc0] sm:$0xf]  ;;  %v4341_v2 = vor.u32 %v4732_v0, %v4340_v63  ;;  %v4764_v5 = vld [vmem:[#allocation4 + $0x3cc] sm:$0xf0]  ;;  %v72_v51 = vld [vmem:[%s6164_s0 + $0x68] sm:$0xff] }
  0x1d   :  { %3922 = vmatmul.msk.bf16.vlgmr.msra.gmra.mxu0 %vm213_vm0, %v91_v57  ;;  %v4468_v4 = vld [vmem:[#allocation4 + $0x3c0] sm:$0xf]  ;;  %v4085_v6 = vor.u32 %v4668_v3, %v4084_v1  ;;  %v4700_v9 = vld [vmem:[#allocation4 + $0x1cc] sm:$0xf0]  ;;  %v74_v1 = vld [vmem:[%s6164_s0 + $0x78] sm:$0xff] }
  0x1e   :  { %3938 = vmatmul.msk.bf16.vlgmr.msra.gmra.mxu1 %vm213_vm0, %v91_v57  ;;  %1588 = vmatpush.bf16.msrb.mxu0 %v4101_v61  ;;  %v4469_v7 = vor.u32 %v4764_v5, %v4468_v4  ;;  %v4212_v8 = vld [vmem:[#allocation4 + $0x1c0] sm:$0xf]  ;;  %v61_v11 = vld [vmem:[%s6164_s0 + $0x10] sm:$0xff]  ;;  %v76_v5 = vld [vmem:[%s6164_s0 + $0x88] sm:$0xff] }
  0x1f   :  { %3954 = vmatmul.msk.bf16.vlgmr.msra.gmra.mxu2 %vm213_vm0, %v91_v57  ;;  %3970 = vmatmul.msk.bf16.vlgmr.msra.gmra.mxu3 %vm213_vm0, %v91_v57  ;;  %v4213_v10 = vor.u32 %v4700_v9, %v4212_v8  ;;  %v92_v13 = vpack.c.bf16 %v62_v12, %v61_v11  ;;  %v63_v14 = vld [vmem:[%s6164_s0 + $0x20] sm:$0xff]  ;;  %v4728_v18 = vld [vmem:[#allocation4 + $0x2ac] sm:$0xf0] }
  0x20   :  { %1766 = vmatpush.bf16.msrb.mxu2 %v4357_v53  ;;  %1855 = vmatpush.bf16.msrb.mxu3 %v4485_v58  ;;  %v93_v16 = vpack.c.bf16 %v64_v15, %v63_v14  ;;  %v4324_v17 = vld [vmem:[#allocation4 + $0x2a0] sm:$0xf]  ;;  %v4664_v21 = vld [vmem:[#allocation4 + $0xac] sm:$0xf0] }
  0x21   :  { %1677 = vmatpush.bf16.msrb.mxu1 %v4229_v62  ;;  %v4068_v19 = vld [vmem:[#allocation4 + $0xa0] sm:$0xf]  ;;  %v4325_v20 = vor.u32 %v4728_v18, %v4324_v17  ;;  %v4760_v23 = vld [vmem:[#allocation4 + $0x3ac] sm:$0xf0] }
  0x22   :  { %1589 = vmatpush.bf16.msrb.mxu0 %v4085_v6  ;;  %v4452_v22 = vld [vmem:[#allocation4 + $0x3a0] sm:$0xf]  ;;  %v4069_v24 = vor.u32 %v4664_v21, %v4068_v19  ;;  %v4696_v27 = vld [vmem:[#allocation4 + $0x1ac] sm:$0xf0] }
  0x23   :  { %v4453_v25 = vor.u32 %v4760_v23, %v4452_v22  ;;  %v4196_v26 = vld [vmem:[#allocation4 + $0x1a0] sm:$0xf]  ;;  %v65_v29 = vld [vmem:[%s6164_s0 + $0x30] sm:$0xff] }
  0x24   :  { %1767 = vmatpush.bf16.msrb.mxu2 %v4341_v2  ;;  %1856 = vmatpush.bf16.msrb.mxu3 %v4469_v7  ;;  %v4197_v28 = vor.u32 %v4696_v27, %v4196_v26  ;;  %v94_v31 = vpack.c.bf16 %v66_v30, %v65_v29  ;;  %v67_v32 = vld [vmem:[%s6164_s0 + $0x40] sm:$0xff]  ;;  %v4724_v36 = vld [vmem:[#allocation4 + $0x28c] sm:$0xf0] }
  0x25   :  { %1678 = vmatpush.bf16.msrb.mxu1 %v4213_v10  ;;  %v95_v34 = vpack.c.bf16 %v68_v33, %v67_v32  ;;  %v4308_v35 = vld [vmem:[#allocation4 + $0x280] sm:$0xf]  ;;  %v4660_v39 = vld [vmem:[#allocation4 + $0x8c] sm:$0xf0] }
  0x26   :  { %1590 = vmatpush.bf16.msrb.mxu0 %v4069_v24  ;;  %v4052_v37 = vld [vmem:[#allocation4 + $0x80] sm:$0xf]  ;;  %v4309_v38 = vor.u32 %v4724_v36, %v4308_v35  ;;  %v4756_v41 = vld [vmem:[#allocation4 + $0x38c] sm:$0xf0] }
  0x27   :  { %v4436_v40 = vld [vmem:[#allocation4 + $0x380] sm:$0xf]  ;;  %v4053_v42 = vor.u32 %v4660_v39, %v4052_v37  ;;  %v4692_v45 = vld [vmem:[#allocation4 + $0x18c] sm:$0xf0] }
  0x28   :  { %1768 = vmatpush.bf16.msrb.mxu2 %v4325_v20  ;;  %1857 = vmatpush.bf16.msrb.mxu3 %v4453_v25  ;;  %v4437_v43 = vor.u32 %v4756_v41, %v4436_v40  ;;  %v4180_v44 = vld [vmem:[#allocation4 + $0x180] sm:$0xf]  ;;  %v69_v47 = vld [vmem:[%s6164_s0 + $0x50] sm:$0xff] }
  0x29   :  { %1679 = vmatpush.bf16.msrb.mxu1 %v4197_v28  ;;  %v4181_v46 = vor.u32 %v4692_v45, %v4180_v44  ;;  %v96_v49 = vpack.c.bf16 %v70_v48, %v69_v47  ;;  %v71_v50 = vld [vmem:[%s6164_s0 + $0x60] sm:$0xff]  ;;  %v4720_v54 = vld [vmem:[#allocation4 + $0x26c] sm:$0xf0] }
  0x2a   :  { %1591 = vmatpush.bf16.msrb.mxu0 %v4053_v42  ;;  %v97_v52 = vpack.c.bf16 %v72_v51, %v71_v50  ;;  %v4292_v53 = vld [vmem:[#allocation4 + $0x260] sm:$0xf]  ;;  %v4656_v57 = vld [vmem:[#allocation4 + $0x6c] sm:$0xf0] }
  0x2b   :  { %v4036_v55 = vld [vmem:[#allocation4 + $0x60] sm:$0xf]  ;;  %v4293_v56 = vor.u32 %v4720_v54, %v4292_v53  ;;  %v4752_v59 = vld [vmem:[#allocation4 + $0x36c] sm:$0xf0] }
  0x2c   :  { %1769 = vmatpush.bf16.msrb.mxu2 %v4309_v38  ;;  %1858 = vmatpush.bf16.msrb.mxu3 %v4437_v43  ;;  %v4420_v58 = vld [vmem:[#allocation4 + $0x360] sm:$0xf]  ;;  %v4037_v60 = vor.u32 %v4656_v57, %v4036_v55  ;;  %v4688_v63 = vld [vmem:[#allocation4 + $0x16c] sm:$0xf0]  ;;  %v78_v38 = vld [vmem:[%s6164_s0 + $0x98] sm:$0xff] }
  0x2d   :  { %3923 = vmatmul.msk.bf16.gmra.mxu0 %vm213_vm0, %v92_v13  ;;  %1680 = vmatpush.bf16.msrb.mxu1 %v4181_v46  ;;  %v4421_v61 = vor.u32 %v4752_v59, %v4420_v58  ;;  %v4164_v62 = vld [vmem:[#allocation4 + $0x160] sm:$0xf]  ;;  %v73_v0 = vld [vmem:[%s6164_s0 + $0x70] sm:$0xff] }
  0x2e   :  { %3939 = vmatmul.msk.bf16.gmra.mxu1 %vm213_vm0, %v92_v13  ;;  %1592 = vmatpush.bf16.msrb.mxu0 %v4037_v60  ;;  %v4165_v2 = vor.u32 %v4688_v63, %v4164_v62  ;;  %v98_v3 = vpack.c.bf16 %v74_v1, %v73_v0  ;;  %v75_v4 = vld [vmem:[%s6164_s0 + $0x80] sm:$0xff]  ;;  %v4748_v18 = vld [vmem:[#allocation4 + $0x34c] sm:$0xf0] }
  0x2f   :  { %3955 = vmatmul.msk.bf16.gmra.mxu2 %vm213_vm0, %v92_v13  ;;  %3971 = vmatmul.msk.bf16.gmra.mxu3 %vm213_vm0, %v92_v13  ;;  %v99_v6 = vpack.c.bf16 %v76_v5, %v75_v4  ;;  %v123_v7 = vld [vmem:[%s6166_s2] sm:$0xf]  ;;  %v4716_v13 = vld [vmem:[#allocation4 + $0x24c] sm:$0xf0] }
  0x30   :  { %1770 = vmatpush.bf16.msrb.mxu2 %v4293_v56  ;;  %1859 = vmatpush.bf16.msrb.mxu3 %v4421_v61  ;;  %v4999_v10 = vperm.slane %v123_v7, 0  ;;  %v5002_v11 = vperm.slane %v123_v7, 1  ;;  %v4276_v12 = vld [vmem:[#allocation4 + $0x240] sm:$0xf]  ;;  %v5010_v28 = vperm.slane %v123_v7, 2  ;;  %v5012_v29 = vperm.slane %v123_v7, 3 }
  0x31   :  { %1681 = vmatpush.bf16.msrb.mxu1 %v4165_v2  ;;  %v4020_v14 = vld [vmem:[#allocation4 + $0x40] sm:$0xf]  ;;  %v4277_v15 = vor.u32 %v4716_v13, %v4276_v12  ;;  %v77_v37 = vld [vmem:[%s6164_s0 + $0x90] sm:$0xff] }
  0x32   :  { %v4404_v17 = vld [vmem:[#allocation4 + $0x340] sm:$0xf]  ;;  %v100_v45 = vpack.c.bf16 %v78_v38, %v77_v37 }
  0x33   :  { %v4405_v22 = vor.u32 %v4748_v18, %v4404_v17  ;;  %v4148_v33 = vld [vmem:[#allocation4 + $0x140] sm:$0xf] }
  0x34   :  { %1771 = vmatpush.bf16.msrb.mxu2 %v4277_v15  ;;  %v79_v5 = vld [vmem:[%s6164_s0 + $0xa0] sm:$0xff] }
  0x35   :  { %1860 = vmatpush.bf16.msrb.mxu3 %v4405_v22 }
  0x3d   :  { %3924 = vmatmul.msk.bf16.gmra.mxu0 %vm213_vm0, %v93_v16 }
  0x3e   :  { %3940 = vmatmul.msk.bf16.gmra.mxu1 %vm213_vm0, %v93_v16 }
  0x3f   :  { %3956 = vmatmul.msk.bf16.gmra.mxu2 %vm213_vm0, %v93_v16  ;;  %3972 = vmatmul.msk.bf16.gmra.mxu3 %vm213_vm0, %v93_v16  ;;  %v4652_v16 = vld [vmem:[#allocation4 + $0x4c] sm:$0xf0] }
  0x40   :  { %v4021_v21 = vor.u32 %v4652_v16, %v4020_v14 }
  0x42   :  { %1593 = vmatpush.bf16.msrb.mxu0 %v4021_v21 }
  0x4d   :  { %3925 = vmatmul.msk.bf16.gmra.mxu0 %vm213_vm0, %v94_v31 }
  0x4e   :  { %3941 = vmatmul.msk.bf16.gmra.mxu1 %vm213_vm0, %v94_v31 }
  0x4f   :  { %3957 = vmatmul.msk.bf16.gmra.mxu2 %vm213_vm0, %v94_v31  ;;  %3973 = vmatmul.msk.bf16.gmra.mxu3 %vm213_vm0, %v94_v31 }
  0x5d   :  { %3926 = vmatmul.msk.bf16.gmra.mxu0 %vm213_vm0, %v95_v34 }
  0x5e   :  { %3942 = vmatmul.msk.bf16.gmra.mxu1 %vm213_vm0, %v95_v34 }
  0x5f   :  { %3958 = vmatmul.msk.bf16.gmra.mxu2 %vm213_vm0, %v95_v34  ;;  %3974 = vmatmul.msk.bf16.gmra.mxu3 %vm213_vm0, %v95_v34  ;;  %v4684_v34 = vld [vmem:[#allocation4 + $0x14c] sm:$0xf0] }
  0x60   :  { %v4149_v39 = vor.u32 %v4684_v34, %v4148_v33  ;;  %v4388_v33 = vld [vmem:[#allocation4 + $0x320] sm:$0xf]  ;;  %v4744_v34 = vld [vmem:[#allocation4 + $0x32c] sm:$0xf0] }
  0x61   :  { %v4389_v38 = vor.u32 %v4744_v34, %v4388_v33 }
  0x62   :  { %1682 = vmatpush.bf16.msrb.mxu1 %v4149_v39 }
  0x63   :  { %1861 = vmatpush.bf16.msrb.mxu3 %v4389_v38 }
  0x6d   :  { %3927 = vmatmul.msk.bf16.gmra.mxu0 %vm213_vm0, %v96_v49 }
  0x6e   :  { %3943 = vmatmul.msk.bf16.gmra.mxu1 %vm213_vm0, %v96_v49 }
  0x6f   :  { %3959 = vmatmul.msk.bf16.gmra.mxu2 %vm213_vm0, %v96_v49  ;;  %3975 = vmatmul.msk.bf16.gmra.mxu3 %vm213_vm0, %v96_v49 }
  0x7d   :  { %3928 = vmatmul.msk.bf16.gmra.mxu0 %vm213_vm0, %v97_v52 }
  0x7e   :  { %3944 = vmatmul.msk.bf16.gmra.mxu1 %vm213_vm0, %v97_v52 }
  0x7f   :  { %3960 = vmatmul.msk.bf16.gmra.mxu2 %vm213_vm0, %v97_v52  ;;  %3976 = vmatmul.msk.bf16.gmra.mxu3 %vm213_vm0, %v97_v52 }
  0x8d   :  { %3929 = vmatmul.msk.bf16.gmra.mxu0 %vm213_vm0, %v98_v3 }
  0x8e   :  { %3945 = vmatmul.msk.bf16.gmra.mxu1 %vm213_vm0, %v98_v3 }
  0x8f   :  { %3961 = vmatmul.msk.bf16.gmra.mxu2 %vm213_vm0, %v98_v3  ;;  %3977 = vmatmul.msk.bf16.gmra.mxu3 %vm213_vm0, %v98_v3 }
  0x9a   :  { %v271_v8 = vpop.f32.mrf.mxu0 }
  0x9b   :  { %v360_v9 = vpop.f32.mrf.mxu1  ;;  %v272_v19 = vadd.f32 %v271_v8, %v4999_v10 }
  0x9c   :  { %v361_v23 = vadd.f32 %v360_v9, %v5002_v11 }
  0x9d   :  { %3930 = vmatmul.msk.bf16.gmra.mxu0 %vm213_vm0, %v99_v6  ;;  %v618_v31 = vmax.f32 %v272_v19, 0.0 }
  0x9e   :  { %3946 = vmatmul.msk.bf16.gmra.mxu1 %vm213_vm0, %v99_v6  ;;  %v619_v35 = vmax.f32 %v361_v23, 0.0 }
  0x9f   :  { %3962 = vmatmul.msk.bf16.gmra.mxu2 %vm213_vm0, %v99_v6  ;;  %3978 = vmatmul.msk.bf16.gmra.mxu3 %vm213_vm0, %v99_v6  ;;  %v80_v6 = vld [vmem:[%s6164_s0 + $0xa8] sm:$0xff] }
  0xa0   :  { %v101_v14 = vpack.c.bf16 %v80_v6, %v79_v5 }
  0xa2   :  { %v449_v20 = vpop.f32.mrf.mxu2  ;;  %v538_v24 = vpop.f32.mrf.mxu3 }
  0xa3   :  { %v273_v25 = vpop.f32.mrf.mxu0  ;;  %v362_v27 = vpop.f32.mrf.mxu1  ;;  %v450_v41 = vadd.f32 %v449_v20, %v5010_v28  ;;  %v539_v43 = vadd.f32 %v538_v24, %v5012_v29 }
  0xa4   :  { %v274_v26 = vadd.f32 %v273_v25, %v4999_v10  ;;  %v363_v30 = vadd.f32 %v362_v27, %v5002_v11  ;;  %v4712_v27 = vld [vmem:[#allocation4 + $0x22c] sm:$0xf0] }
  0xa5   :  { %v620_v51 = vmax.f32 %v450_v41, 0.0  ;;  %v621_v53 = vmax.f32 %v539_v43, 0.0 }
  0xa6   :  { %v622_v32 = vmax.f32 %v274_v26, 0.0  ;;  %v623_v36 = vmax.f32 %v363_v30, 0.0  ;;  %v4260_v26 = vld [vmem:[#allocation4 + $0x220] sm:$0xf] }
  0xa7   :  { %v4004_v30 = vld [vmem:[#allocation4 + $0x20] sm:$0xf] }
  0xa8   :  { %v5021_v40 = vpack.c.bf16 %v622_v32, %v618_v31  ;;  %v5024_v42 = vpack.c.bf16 %v623_v36, %v619_v35  ;;  %v4261_v31 = vor.u32 %v4712_v27, %v4260_v26  ;;  %v4648_v32 = vld [vmem:[#allocation4 + $0x2c] sm:$0xf0] }
  0xa9   :  { %v4005_v37 = vor.u32 %v4648_v32, %v4004_v30  ;;  %v84_v32 = vld [vmem:[%s6164_s0 + $0xc8] sm:$0xff] }
  0xaa   :  { %v451_v44 = vpop.f32.mrf.mxu2  ;;  %v540_v47 = vpop.f32.mrf.mxu3  ;;  %1772 = vmatpush.bf16.msrb.mxu2 %v4261_v31  ;;  %v83_v31 = vld [vmem:[%s6164_s0 + $0xc0] sm:$0xff] }
  0xab   :  { %v452_v46 = vadd.f32 %v451_v44, %v5010_v28  ;;  %v276_v48 = vpop.f32.mrf.mxu0  ;;  %v541_v49 = vadd.f32 %v540_v47, %v5012_v29  ;;  %v365_v50 = vpop.f32.mrf.mxu1  ;;  %1594 = vmatpush.bf16.msrb.mxu0 %v4005_v37  ;;  %v103_v38 = vpack.c.bf16 %v84_v32, %v83_v31 }
  0xac   :  { %v277_v57 = vadd.f32 %v276_v48, %v4999_v10  ;;  %v366_v59 = vadd.f32 %v365_v50, %v5002_v11  ;;  %v4680_v50 = vld [vmem:[#allocation4 + $0x12c] sm:$0xf0] }
  0xad   :  { %v624_v52 = vmax.f32 %v452_v46, 0.0  ;;  %v625_v54 = vmax.f32 %v541_v49, 0.0  ;;  %3931 = vmatmul.msk.bf16.gmra.mxu0 %vm213_vm0, %v100_v45  ;;  %v4132_v49 = vld [vmem:[#allocation4 + $0x120] sm:$0xf] }
  0xae   :  { %3947 = vmatmul.msk.bf16.gmra.mxu1 %vm213_vm0, %v100_v45  ;;  %v626_v1 = vmax.f32 %v277_v57, 0.0  ;;  %v627_v3 = vmax.f32 %v366_v59, 0.0  ;;  %v4133_v57 = vor.u32 %v4680_v50, %v4132_v49 }
  0xaf   :  { %v5030_v55 = vpack.c.bf16 %v624_v52, %v620_v51  ;;  %3963 = vmatmul.msk.bf16.gmra.mxu2 %vm213_vm0, %v100_v45  ;;  %v5034_v56 = vpack.c.bf16 %v625_v54, %v621_v53  ;;  %3979 = vmatmul.msk.bf16.gmra.mxu3 %vm213_vm0, %v100_v45  ;;  %v81_v53 = vld [vmem:[%s6164_s0 + $0xb0] sm:$0xff]  ;;  %v82_v54 = vld [vmem:[%s6164_s0 + $0xb8] sm:$0xff] }
  0xb0   :  { %1683 = vmatpush.bf16.msrb.mxu1 %v4133_v57 }
  0xb2   :  { %v454_v58 = vpop.f32.mrf.mxu2  ;;  %v543_v60 = vpop.f32.mrf.mxu3 }
  0xb3   :  { %v278_v61 = vpop.f32.mrf.mxu0  ;;  %v367_v63 = vpop.f32.mrf.mxu1  ;;  %v455_v8 = vadd.f32 %v454_v58, %v5010_v28  ;;  %v544_v12 = vadd.f32 %v543_v60, %v5012_v29 }
  0xb4   :  { %v279_v62 = vadd.f32 %v278_v61, %v4999_v10  ;;  %v368_v0 = vadd.f32 %v367_v63, %v5002_v11  ;;  %v102_v63 = vpack.c.bf16 %v82_v54, %v81_v53  ;;  %v4708_v53 = vld [vmem:[#allocation4 + $0x20c] sm:$0xf0]  ;;  %v3988_v54 = vld [vmem:[#allocation4] sm:$0xf] }
  0xb5   :  { %v628_v20 = vmax.f32 %v455_v8, 0.0  ;;  %v629_v22 = vmax.f32 %v544_v12, 0.0 }
  0xb6   :  { %v630_v2 = vmax.f32 %v279_v62, 0.0  ;;  %v631_v4 = vmax.f32 %v368_v0, 0.0 }
  0xb8   :  { %v5047_v7 = vpack.c.bf16 %v630_v2, %v626_v1  ;;  %v5050_v9 = vpack.c.bf16 %v631_v4, %v627_v3 }
  0xba   :  { %v456_v13 = vpop.f32.mrf.mxu2  ;;  %v545_v16 = vpop.f32.mrf.mxu3 }
  0xbb   :  { %v457_v15 = vadd.f32 %v456_v13, %v5010_v28  ;;  %v281_v17 = vpop.f32.mrf.mxu0  ;;  %v546_v18 = vadd.f32 %v545_v16, %v5012_v29  ;;  %v370_v19 = vpop.f32.mrf.mxu1 }
  0xbc   :  { %v282_v35 = vadd.f32 %v281_v17, %v4999_v10  ;;  %v371_v39 = vadd.f32 %v370_v19, %v5002_v11 }
  0xbd   :  { %v632_v21 = vmax.f32 %v457_v15, 0.0  ;;  %v633_v23 = vmax.f32 %v546_v18, 0.0  ;;  %3932 = vmatmul.msk.bf16.gmra.mxu0 %vm213_vm0, %v101_v14 }
  0xbe   :  { %3948 = vmatmul.msk.bf16.gmra.mxu1 %vm213_vm0, %v101_v14  ;;  %v634_v47 = vmax.f32 %v282_v35, 0.0  ;;  %v635_v51 = vmax.f32 %v371_v39, 0.0 }
  0xbf   :  { %v5056_v24 = vpack.c.bf16 %v632_v21, %v628_v20  ;;  %3964 = vmatmul.msk.bf16.gmra.mxu2 %vm213_vm0, %v101_v14  ;;  %v5060_v25 = vpack.c.bf16 %v633_v23, %v629_v22  ;;  %3980 = vmatmul.msk.bf16.gmra.mxu3 %vm213_vm0, %v101_v14 }
  0xc2   :  { %v459_v36 = vpop.f32.mrf.mxu2  ;;  %v548_v41 = vpop.f32.mrf.mxu3 }
  0xc3   :  { %v283_v43 = vpop.f32.mrf.mxu0  ;;  %v372_v45 = vpop.f32.mrf.mxu1  ;;  %v460_v59 = vadd.f32 %v459_v36, %v5010_v28  ;;  %v549_v61 = vadd.f32 %v548_v41, %v5012_v29 }
  0xc4   :  { %v284_v44 = vadd.f32 %v283_v43, %v4999_v10  ;;  %v373_v46 = vadd.f32 %v372_v45, %v5002_v11 }
  0xc5   :  { %v636_v5 = vmax.f32 %v460_v59, 0.0  ;;  %v637_v8 = vmax.f32 %v549_v61, 0.0  ;;  %v4644_v59 = vld [vmem:[#allocation4 + $0xc] sm:$0xf0]  ;;  %v4372_v61 = vld [vmem:[#allocation4 + $0x300] sm:$0xf] }
  0xc6   :  { %v638_v48 = vmax.f32 %v284_v44, 0.0  ;;  %v639_v52 = vmax.f32 %v373_v46, 0.0 }
  0xc8   :  { %v5073_v58 = vpack.c.bf16 %v638_v48, %v634_v47  ;;  %v5076_v60 = vpack.c.bf16 %v639_v52, %v635_v51  ;;  %v4244_v52 = vld [vmem:[#allocation4 + $0x200] sm:$0xf] }
  0xc9   :  { %v4245_v57 = vor.u32 %v4708_v53, %v4244_v52 }
  0xca   :  { %v461_v62 = vpop.f32.mrf.mxu2  ;;  %v550_v1 = vpop.f32.mrf.mxu3 }
  0xcb   :  { %v462_v0 = vadd.f32 %v461_v62, %v5010_v28  ;;  %v286_v2 = vpop.f32.mrf.mxu0  ;;  %v551_v3 = vadd.f32 %v550_v1, %v5012_v29  ;;  %v375_v4 = vpop.f32.mrf.mxu1  ;;  %v4740_v62 = vld [vmem:[#allocation4 + $0x30c] sm:$0xf0]  ;;  %v3989_v1 = vor.u32 %v4644_v59, %v3988_v54  ;;  %1773 = vmatpush.bf16.msrb.mxu2 %v4245_v57 }
  0xcc   :  { %v287_v15 = vadd.f32 %v286_v2, %v4999_v10  ;;  %v376_v17 = vadd.f32 %v375_v4, %v5002_v11  ;;  %v4373_v2 = vor.u32 %v4740_v62, %v4372_v61 }
  0xcd   :  { %v640_v6 = vmax.f32 %v462_v0, 0.0  ;;  %v641_v12 = vmax.f32 %v551_v3, 0.0  ;;  %3933 = vmatmul.msk.bf16.gmra.mxu0 %vm213_vm0, %v102_v63 }
  0xce   :  { %3949 = vmatmul.msk.bf16.gmra.mxu1 %vm213_vm0, %v102_v63  ;;  %v642_v23 = vmax.f32 %v287_v15, 0.0  ;;  %v643_v27 = vmax.f32 %v376_v17, 0.0  ;;  %1595 = vmatpush.bf16.msrb.mxu0 %v3989_v1  ;;  %v4116_v17 = vld [vmem:[#allocation4 + $0x100] sm:$0xf] }
  0xcf   :  { %v5082_v13 = vpack.c.bf16 %v640_v6, %v636_v5  ;;  %3965 = vmatmul.msk.bf16.gmra.mxu2 %vm213_vm0, %v102_v63  ;;  %v5086_v14 = vpack.c.bf16 %v641_v12, %v637_v8  ;;  %3981 = vmatmul.msk.bf16.gmra.mxu3 %vm213_vm0, %v102_v63 }
  0xd0   :  { %1862 = vmatpush.bf16.msrb.mxu3 %v4373_v2 }
  0xd1   :  { %6222 = vst [vmem:[#allocation8_spill] sm:$0xff] %v5082_v13 }
  0xd2   :  { %6223 = vst [vmem:[#allocation9_spill] sm:$0xff] %v5086_v14  ;;  %v464_v16 = vpop.f32.mrf.mxu2  ;;  %v553_v18 = vpop.f32.mrf.mxu3 }
  0xd3   :  { %v288_v19 = vpop.f32.mrf.mxu0  ;;  %v377_v21 = vpop.f32.mrf.mxu1  ;;  %v465_v34 = vadd.f32 %v464_v16, %v5010_v28  ;;  %v554_v36 = vadd.f32 %v553_v18, %v5012_v29  ;;  %v4676_v18 = vld [vmem:[#allocation4 + $0x10c] sm:$0xf0] }
  0xd4   :  { %v289_v20 = vadd.f32 %v288_v19, %v4999_v10  ;;  %v378_v22 = vadd.f32 %v377_v21, %v5002_v11  ;;  %v85_v21 = vld [vmem:[%s6164_s0 + $0xd0] sm:$0xff] }
  0xd5   :  { %v644_v46 = vmax.f32 %v465_v34, 0.0  ;;  %v645_v48 = vmax.f32 %v554_v36, 0.0 }
  0xd6   :  { %v646_v26 = vmax.f32 %v289_v20, 0.0  ;;  %v647_v30 = vmax.f32 %v378_v22, 0.0  ;;  %v86_v22 = vld [vmem:[%s6164_s0 + $0xd8] sm:$0xff] }
  0xd7   :  { %v104_v34 = vpack.c.bf16 %v86_v22, %v85_v21 }
  0xd8   :  { %v5099_v33 = vpack.c.bf16 %v646_v26, %v642_v23  ;;  %v5102_v35 = vpack.c.bf16 %v647_v30, %v643_v27  ;;  %v4117_v23 = vor.u32 %v4676_v18, %v4116_v17 }
  0xda   :  { %6224 = vst [vmem:[#allocation10_spill] sm:$0xff] %v5099_v33  ;;  %v466_v37 = vpop.f32.mrf.mxu2  ;;  %v555_v41 = vpop.f32.mrf.mxu3  ;;  %1684 = vmatpush.bf16.msrb.mxu1 %v4117_v23 }
  0xdb   :  { %6225 = vst [vmem:[#allocation11_spill] sm:$0xff] %v5102_v35  ;;  %v467_v39 = vadd.f32 %v466_v37, %v5010_v28  ;;  %v291_v43 = vpop.f32.mrf.mxu0  ;;  %v556_v44 = vadd.f32 %v555_v41, %v5012_v29  ;;  %v380_v45 = vpop.f32.mrf.mxu1 }
  0xdc   :  { %v292_v63 = vadd.f32 %v291_v43, %v4999_v10  ;;  %v381_v3 = vadd.f32 %v380_v45, %v5002_v11 }
  0xdd   :  { %v648_v47 = vmax.f32 %v467_v39, 0.0  ;;  %v649_v49 = vmax.f32 %v556_v44, 0.0  ;;  %3934 = vmatmul.msk.bf16.gmra.mxu0 %vm213_vm0, %v103_v38 }
  0xde   :  { %3950 = vmatmul.msk.bf16.gmra.mxu1 %vm213_vm0, %v103_v38  ;;  %v650_v15 = vmax.f32 %v292_v63, 0.0  ;;  %v651_v19 = vmax.f32 %v381_v3, 0.0  ;;  %v87_v3 = vld [vmem:[%s6164_s0 + $0xe0] sm:$0xff] }
  0xdf   :  { %v5108_v50 = vpack.c.bf16 %v648_v47, %v644_v46  ;;  %3966 = vmatmul.msk.bf16.gmra.mxu2 %vm213_vm0, %v103_v38  ;;  %v5112_v51 = vpack.c.bf16 %v649_v49, %v645_v48  ;;  %3982 = vmatmul.msk.bf16.gmra.mxu3 %vm213_vm0, %v103_v38 }
  0xe1   :  { %6226 = vst [vmem:[#allocation12_spill] sm:$0xff] %v5108_v50 }
  0xe2   :  { %6227 = vst [vmem:[#allocation13_spill] sm:$0xff] %v5112_v51  ;;  %v469_v0 = vpop.f32.mrf.mxu2  ;;  %v558_v4 = vpop.f32.mrf.mxu3 }
  0xe3   :  { %v293_v5 = vpop.f32.mrf.mxu0  ;;  %v382_v8 = vpop.f32.mrf.mxu1  ;;  %v470_v27 = vadd.f32 %v469_v0, %v5010_v28  ;;  %v559_v31 = vadd.f32 %v558_v4, %v5012_v29  ;;  %v88_v4 = vld [vmem:[%s6164_s0 + $0xe8] sm:$0xff] }
  0xe4   :  { %v294_v6 = vadd.f32 %v293_v5, %v4999_v10  ;;  %v383_v12 = vadd.f32 %v382_v8, %v5002_v11 }
  0xe5   :  { %v652_v43 = vmax.f32 %v470_v27, 0.0  ;;  %v653_v45 = vmax.f32 %v559_v31, 0.0 }
  0xe6   :  { %v654_v16 = vmax.f32 %v294_v6, 0.0  ;;  %v655_v20 = vmax.f32 %v383_v12, 0.0 }
  0xe8   :  { %v5125_v26 = vpack.c.bf16 %v654_v16, %v650_v15  ;;  %v5128_v30 = vpack.c.bf16 %v655_v20, %v651_v19  ;;  %v105_v16 = vpack.c.bf16 %v88_v4, %v87_v3 }
  0xea   :  { %6228 = vst [vmem:[#allocation14_spill] sm:$0xff] %v5125_v26  ;;  %v471_v32 = vpop.f32.mrf.mxu2  ;;  %v560_v37 = vpop.f32.mrf.mxu3 }
  0xeb   :  { %6229 = vst [vmem:[#allocation15_spill] sm:$0xff] %v5128_v30  ;;  %v472_v36 = vadd.f32 %v471_v32, %v5010_v28  ;;  %v296_v38 = vpop.f32.mrf.mxu0  ;;  %v561_v39 = vadd.f32 %v560_v37, %v5012_v29  ;;  %v385_v41 = vpop.f32.mrf.mxu1  ;;  %v4358_v37 = vld [vmem:[#allocation4 + $0x2f0] sm:$0xf0] }
  0xec   :  { %v297_v49 = vadd.f32 %v296_v38, %v4999_v10  ;;  %v386_v53 = vadd.f32 %v385_v41, %v5002_v11  ;;  %v4670_v38 = vld [vmem:[#allocation4 + $0xe4] sm:$0xf]  ;;  %v4102_v41 = vld [vmem:[#allocation4 + $0xf0] sm:$0xf0] }
  0xed   :  { %v656_v44 = vmax.f32 %v472_v36, 0.0  ;;  %v657_v46 = vmax.f32 %v561_v39, 0.0  ;;  %3935 = vmatmul.msk.bf16.gmra.mxu0 %vm213_vm0, %v104_v34  ;;  %v4734_v36 = vld [vmem:[#allocation4 + $0x2e4] sm:$0xf] }
  0xee   :  { %3951 = vmatmul.msk.bf16.gmra.mxu1 %vm213_vm0, %v104_v34  ;;  %v658_v63 = vmax.f32 %v297_v49, 0.0  ;;  %v659_v1 = vmax.f32 %v386_v53, 0.0  ;;  %v4361_v39 = vor.u32 %v4734_v36, %v4358_v37  ;;  %v4105_v49 = vor.u32 %v4670_v38, %v4102_v41 }
  0xef   :  { %v5134_v47 = vpack.c.bf16 %v656_v44, %v652_v43  ;;  %3967 = vmatmul.msk.bf16.gmra.mxu2 %vm213_vm0, %v104_v34  ;;  %v5138_v48 = vpack.c.bf16 %v657_v46, %v653_v45  ;;  %3983 = vmatmul.msk.bf16.gmra.mxu3 %vm213_vm0, %v104_v34  ;;  %v4766_v43 = vld [vmem:[#allocation4 + $0x3e4] sm:$0xf]  ;;  %v4486_v44 = vld [vmem:[#allocation4 + $0x3f0] sm:$0xf0] }
  0xf0   :  { %2122 = vmatpush.bf16.msra.mxu2 %v4361_v39  ;;  %1944 = vmatpush.bf16.msra.mxu0 %v4105_v49 }
  0xf1   :  { %6230 = vst [vmem:[#allocation16_spill] sm:$0xff] %v5134_v47 }
  0xf2   :  { %6231 = vst [vmem:[#allocation17_spill] sm:$0xff] %v5138_v48  ;;  %v474_v52 = vpop.f32.mrf.mxu2  ;;  %v563_v54 = vpop.f32.mrf.mxu3 }
  0xf3   :  { %v298_v57 = vpop.f32.mrf.mxu0  ;;  %v387_v61 = vpop.f32.mrf.mxu1  ;;  %v475_v6 = vadd.f32 %v474_v52, %v5010_v28  ;;  %v564_v12 = vadd.f32 %v563_v54, %v5012_v29  ;;  %v4489_v52 = vor.u32 %v4766_v43, %v4486_v44 }
  0xf4   :  { %v299_v59 = vadd.f32 %v298_v57, %v4999_v10  ;;  %v388_v62 = vadd.f32 %v387_v61, %v5002_v11 }
  0xf5   :  { %v660_v22 = vmax.f32 %v475_v6, 0.0  ;;  %v661_v27 = vmax.f32 %v564_v12, 0.0  ;;  %2211 = vmatpush.bf16.msra.mxu3 %v4489_v52  ;;  %v89_v6 = vld [vmem:[%s6164_s0 + $0xf0] sm:$0xff]  ;;  %v90_v12 = vld [vmem:[%s6164_s0 + $0xf8] sm:$0xff] }
  0xf6   :  { %v662_v0 = vmax.f32 %v299_v59, 0.0  ;;  %v663_v2 = vmax.f32 %v388_v62, 0.0 }
  0xf8   :  { %v5151_v5 = vpack.c.bf16 %v662_v0, %v658_v63  ;;  %v5154_v8 = vpack.c.bf16 %v663_v2, %v659_v1  ;;  %v4702_v1 = vld [vmem:[#allocation4 + $0x1e4] sm:$0xf]  ;;  %v4230_v2 = vld [vmem:[#allocation4 + $0x1f0] sm:$0xf0] }
  0xfa   :  { %6232 = vst [vmem:[#allocation18_spill] sm:$0xff] %v5151_v5  ;;  %v476_v15 = vpop.f32.mrf.mxu2  ;;  %v565_v18 = vpop.f32.mrf.mxu3 }
  0xfb   :  { %6233 = vst [vmem:[#allocation19_spill] sm:$0xff] %v5154_v8  ;;  %v477_v17 = vadd.f32 %v476_v15, %v5010_v28  ;;  %v301_v19 = vpop.f32.mrf.mxu0  ;;  %v566_v20 = vadd.f32 %v565_v18, %v5012_v29  ;;  %v390_v21 = vpop.f32.mrf.mxu1  ;;  %v4233_v15 = vor.u32 %v4702_v1, %v4230_v2 }
  0xfc   :  { %v302_v45 = vadd.f32 %v301_v19, %v4999_v10  ;;  %v391_v53 = vadd.f32 %v390_v21, %v5002_v11  ;;  %v106_v21 = vpack.c.bf16 %v90_v12, %v89_v6 }
  0xfd   :  { %v664_v23 = vmax.f32 %v477_v17, 0.0  ;;  %v665_v31 = vmax.f32 %v566_v20, 0.0  ;;  %3936 = vmatmul.msk.bf16.gmra.mxu0 %vm213_vm0, %v105_v16  ;;  %2033 = vmatpush.bf16.msra.mxu1 %v4233_v15 }
  0xfe   :  { %3952 = vmatmul.msk.bf16.gmra.mxu1 %vm213_vm0, %v105_v16  ;;  %v666_v63 = vmax.f32 %v302_v45, 0.0  ;;  %v667_v3 = vmax.f32 %v391_v53, 0.0 }
  0xff   :  { %v5160_v32 = vpack.c.bf16 %v664_v23, %v660_v22  ;;  %3968 = vmatmul.msk.bf16.gmra.mxu2 %vm213_vm0, %v105_v16  ;;  %v5164_v34 = vpack.c.bf16 %v665_v31, %v661_v27  ;;  %3984 = vmatmul.msk.bf16.gmra.mxu3 %vm213_vm0, %v105_v16 }
 0x101   :  { %6234 = vst [vmem:[#allocation20_spill] sm:$0xff] %v5160_v32 }
 0x102   :  { %6235 = vst [vmem:[#allocation21_spill] sm:$0xff] %v5164_v34  ;;  %v479_v46 = vpop.f32.mrf.mxu2  ;;  %v568_v54 = vpop.f32.mrf.mxu3 }
 0x103   :  { %v303_v57 = vpop.f32.mrf.mxu0  ;;  %v392_v61 = vpop.f32.mrf.mxu1  ;;  %v480_v17 = vadd.f32 %v479_v46, %v5010_v28  ;;  %v569_v19 = vadd.f32 %v568_v54, %v5012_v29 }
 0x104   :  { %v304_v59 = vadd.f32 %v303_v57, %v4999_v10  ;;  %v393_v62 = vadd.f32 %v392_v61, %v5002_v11 }
 0x105   :  { %v668_v37 = vmax.f32 %v480_v17, 0.0  ;;  %v669_v39 = vmax.f32 %v569_v19, 0.0 }
 0x106   :  { %v670_v0 = vmax.f32 %v304_v59, 0.0  ;;  %v671_v4 = vmax.f32 %v393_v62, 0.0 }
 0x108   :  { %v5177_v16 = vpack.c.bf16 %v670_v0, %v666_v63  ;;  %v5180_v18 = vpack.c.bf16 %v671_v4, %v667_v3 }
 0x10a   :  { %6236 = vst [vmem:[#allocation22_spill] sm:$0xff] %v5177_v16  ;;  %v481_v20 = vpop.f32.mrf.mxu2  ;;  %v570_v23 = vpop.f32.mrf.mxu3 }
 0x10b   :  { %6237 = vst [vmem:[#allocation23_spill] sm:$0xff] %v5180_v18  ;;  %v482_v22 = vadd.f32 %v481_v20, %v5010_v28  ;;  %v306_v27 = vpop.f32.mrf.mxu0  ;;  %v571_v31 = vadd.f32 %v570_v23, %v5012_v29  ;;  %v395_v36 = vpop.f32.mrf.mxu1 }
 0x10c   :  { %v307_v45 = vadd.f32 %v306_v27, %v4999_v10  ;;  %v396_v49 = vadd.f32 %v395_v36, %v5002_v11 }
 0x10d   :  { %v672_v38 = vmax.f32 %v482_v22, 0.0  ;;  %v673_v41 = vmax.f32 %v571_v31, 0.0  ;;  %3937 = vmatmul.msk.bf16.gmra.mxu0 %vm213_vm0, %v106_v21 }
 0x10e   :  { %3953 = vmatmul.msk.bf16.gmra.mxu1 %vm213_vm0, %v106_v21  ;;  %v674_v61 = vmax.f32 %v307_v45, 0.0  ;;  %v675_v63 = vmax.f32 %v396_v49, 0.0  ;;  %v4086_v45 = vld [vmem:[#allocation4 + $0xd0] sm:$0xf0] }
 0x10f   :  { %v5186_v43 = vpack.c.bf16 %v672_v38, %v668_v37  ;;  %3969 = vmatmul.msk.bf16.gmra.mxu2 %vm213_vm0, %v106_v21  ;;  %v5190_v44 = vpack.c.bf16 %v673_v41, %v669_v39  ;;  %3985 = vmatmul.msk.bf16.gmra.mxu3 %vm213_vm0, %v106_v21  ;;  %v4730_v37 = vld [vmem:[#allocation4 + $0x2c4] sm:$0xf]  ;;  %v4342_v38 = vld [vmem:[#allocation4 + $0x2d0] sm:$0xf0] }
 0x110   :  { %v4666_v39 = vld [vmem:[#allocation4 + $0xc4] sm:$0xf]  ;;  %v4345_v41 = vor.u32 %v4730_v37, %v4342_v38  ;;  %v4470_v49 = vld [vmem:[#allocation4 + $0x3d0] sm:$0xf0] }
 0x111   :  { %6238 = vst [vmem:[#allocation24_spill] sm:$0xff] %v5186_v43 }
 0x112   :  { %6239 = vst [vmem:[#allocation25_spill] sm:$0xff] %v5190_v44  ;;  %v484_v46 = vpop.f32.mrf.mxu2  ;;  %v573_v52 = vpop.f32.mrf.mxu3  ;;  %2123 = vmatpush.bf16.msra.mxu2 %v4345_v41 }
 0x113   :  { %v308_v53 = vpop.f32.mrf.mxu0  ;;  %v397_v57 = vpop.f32.mrf.mxu1  ;;  %v485_v2 = vadd.f32 %v484_v46, %v5010_v28  ;;  %v574_v4 = vadd.f32 %v573_v52, %v5012_v29  ;;  %v4762_v46 = vld [vmem:[#allocation4 + $0x3c4] sm:$0xf] }
 0x114   :  { %v309_v54 = vadd.f32 %v308_v53, %v4999_v10  ;;  %v398_v59 = vadd.f32 %v397_v57, %v5002_v11  ;;  %v4473_v57 = vor.u32 %v4762_v46, %v4470_v49 }
 0x115   :  { %v676_v21 = vmax.f32 %v485_v2, 0.0  ;;  %v677_v23 = vmax.f32 %v574_v4, 0.0 }
 0x116   :  { %v678_v62 = vmax.f32 %v309_v54, 0.0  ;;  %v679_v0 = vmax.f32 %v398_v59, 0.0  ;;  %v4089_v54 = vor.u32 %v4666_v39, %v4086_v45  ;;  %2212 = vmatpush.bf16.msra.mxu3 %v4473_v57 }
 0x118   :  { %v5197_v1 = vpack.c.bf16 %v678_v62, %v674_v61  ;;  %v5200_v3 = vpack.c.bf16 %v679_v0, %v675_v63  ;;  %1945 = vmatpush.bf16.msra.mxu0 %v4089_v54 }
 0x11a   :  { %v486_v6 = vpop.f32.mrf.mxu2  ;;  %v575_v15 = vpop.f32.mrf.mxu3 }
 0x11b   :  { %v487_v12 = vadd.f32 %v486_v6, %v5010_v28  ;;  %v311_v17 = vpop.f32.mrf.mxu0  ;;  %v576_v19 = vadd.f32 %v575_v15, %v5012_v29  ;;  %v400_v20 = vpop.f32.mrf.mxu1  ;;  %v4214_v15 = vld [vmem:[#allocation4 + $0x1d0] sm:$0xf0] }
 0x11c   :  { %v312_v52 = vadd.f32 %v311_v17, %v4999_v10  ;;  %v401_v59 = vadd.f32 %v400_v20, %v5002_v11 }
 0x11d   :  { %v680_v22 = vmax.f32 %v487_v12, 0.0  ;;  %v681_v27 = vmax.f32 %v576_v19, 0.0  ;;  %1596 = vmatmul.bf16.vlgmr.msrb.gmra.mxu0 %v5021_v40  ;;  %v4698_v12 = vld [vmem:[#allocation4 + $0x1c4] sm:$0xf] }
 0x11e   :  { %1685 = vmatmul.bf16.vlgmr.msrb.gmra.mxu1 %v5024_v42  ;;  %v682_v4 = vmax.f32 %v312_v52, 0.0  ;;  %v683_v17 = vmax.f32 %v401_v59, 0.0 }
 0x11f   :  { %v5206_v31 = vpack.c.bf16 %v680_v22, %v676_v21  ;;  %1774 = vmatmul.bf16.vlgmr.msrb.gmra.mxu2 %v5030_v55  ;;  %v5210_v36 = vpack.c.bf16 %v681_v27, %v677_v23  ;;  %1863 = vmatmul.bf16.vlgmr.msrb.gmra.mxu3 %v5034_v56  ;;  %v4217_v21 = vor.u32 %v4698_v12, %v4214_v15 }
 0x121   :  { %6240 = vst [vmem:[#allocation26_spill] sm:$0xff] %v5210_v36  ;;  %2034 = vmatpush.bf16.msra.mxu1 %v4217_v21 }
 0x122   :  { %v489_v53 = vpop.f32.mrf.mxu2  ;;  %v578_v61 = vpop.f32.mrf.mxu3 }
 0x123   :  { %v313_v62 = vpop.f32.mrf.mxu0  ;;  %v402_v0 = vpop.f32.mrf.mxu1  ;;  %v490_v20 = vadd.f32 %v489_v53, %v5010_v28  ;;  %v579_v27 = vadd.f32 %v578_v61, %v5012_v29 }
 0x124   :  { %v314_v63 = vadd.f32 %v313_v62, %v4999_v10  ;;  %v403_v2 = vadd.f32 %v402_v0, %v5002_v11 }
 0x125   :  { %v684_v49 = vmax.f32 %v490_v20, 0.0  ;;  %v685_v54 = vmax.f32 %v579_v27, 0.0 }
 0x126   :  { %v686_v6 = vmax.f32 %v314_v63, 0.0  ;;  %v687_v19 = vmax.f32 %v403_v2, 0.0 }
 0x128   :  { %v5217_v22 = vpack.c.bf16 %v686_v6, %v682_v4  ;;  %v5220_v23 = vpack.c.bf16 %v687_v19, %v683_v17 }
 0x12a   :  { %6241 = vst [vmem:[#allocation27_spill] sm:$0xff] %v5217_v22  ;;  %v491_v37 = vpop.f32.mrf.mxu2  ;;  %v580_v39 = vpop.f32.mrf.mxu3 }
 0x12b   :  { %6242 = vst [vmem:[#allocation28_spill] sm:$0xff] %v5220_v23  ;;  %v492_v38 = vadd.f32 %v491_v37, %v5010_v28  ;;  %v316_v41 = vpop.f32.mrf.mxu0  ;;  %v581_v45 = vadd.f32 %v580_v39, %v5012_v29  ;;  %v405_v46 = vpop.f32.mrf.mxu1 }
 0x12c   :  { %v317_v61 = vadd.f32 %v316_v41, %v4999_v10  ;;  %v406_v63 = vadd.f32 %v405_v46, %v5002_v11 }
 0x12d   :  { %v688_v52 = vmax.f32 %v492_v38, 0.0  ;;  %v689_v57 = vmax.f32 %v581_v45, 0.0  ;;  %1601 = vmatmul.bf16.gmra.mxu0 %v5047_v7 }
 0x12e   :  { %1690 = vmatmul.bf16.gmra.mxu1 %v5050_v9  ;;  %v690_v15 = vmax.f32 %v317_v61, 0.0  ;;  %v691_v19 = vmax.f32 %v406_v63, 0.0 }
 0x12f   :  { %v5226_v53 = vpack.c.bf16 %v688_v52, %v684_v49  ;;  %1779 = vmatmul.bf16.gmra.mxu2 %v5056_v24  ;;  %v5230_v59 = vpack.c.bf16 %v689_v57, %v685_v54  ;;  %1868 = vmatmul.bf16.gmra.mxu3 %v5060_v25 }
 0x131   :  { %6243 = vst [vmem:[#allocation29_spill] sm:$0xff] %v5226_v53 }
 0x132   :  { %6244 = vst [vmem:[#allocation30_spill] sm:$0xff] %v5230_v59  ;;  %v494_v62 = vpop.f32.mrf.mxu2  ;;  %v583_v0 = vpop.f32.mrf.mxu3 }
 0x133   :  { %v318_v2 = vpop.f32.mrf.mxu0  ;;  %v407_v6 = vpop.f32.mrf.mxu1  ;;  %v495_v27 = vadd.f32 %v494_v62, %v5010_v28  ;;  %v584_v38 = vadd.f32 %v583_v0, %v5012_v29  ;;  %v4726_v0 = vld [vmem:[#allocation4 + $0x2a4] sm:$0xf] }
 0x134   :  { %v319_v4 = vadd.f32 %v318_v2, %v4999_v10  ;;  %v408_v12 = vadd.f32 %v407_v6, %v5002_v11  ;;  %v4662_v6 = vld [vmem:[#allocation4 + $0xa4] sm:$0xf] }
 0x135   :  { %v692_v54 = vmax.f32 %v495_v27, 0.0  ;;  %v693_v61 = vmax.f32 %v584_v38, 0.0 }
 0x136   :  { %v694_v17 = vmax.f32 %v319_v4, 0.0  ;;  %v695_v21 = vmax.f32 %v408_v12, 0.0  ;;  %v4326_v4 = vld [vmem:[#allocation4 + $0x2b0] sm:$0xf0] }
 0x137   :  { %v4329_v12 = vor.u32 %v4726_v0, %v4326_v4  ;;  %v4694_v4 = vld [vmem:[#allocation4 + $0x1a4] sm:$0xf] }
 0x138   :  { %v5237_v20 = vpack.c.bf16 %v694_v17, %v690_v15  ;;  %v5240_v37 = vpack.c.bf16 %v695_v21, %v691_v19  ;;  %v4070_v15 = vld [vmem:[#allocation4 + $0xb0] sm:$0xf0]  ;;  %v4758_v17 = vld [vmem:[#allocation4 + $0x3a4] sm:$0xf] }
 0x139   :  { %v4454_v19 = vld [vmem:[#allocation4 + $0x3b0] sm:$0xf0]  ;;  %v4073_v38 = vor.u32 %v4662_v6, %v4070_v15  ;;  %2124 = vmatpush.bf16.msra.mxu2 %v4329_v12 }
 0x13a   :  { %v496_v39 = vpop.f32.mrf.mxu2  ;;  %v585_v45 = vpop.f32.mrf.mxu3 }
 0x13b   :  { %v497_v41 = vadd.f32 %v496_v39, %v5010_v28  ;;  %v321_v46 = vpop.f32.mrf.mxu0  ;;  %v586_v49 = vadd.f32 %v585_v45, %v5012_v29  ;;  %v410_v52 = vpop.f32.mrf.mxu1  ;;  %v4457_v39 = vor.u32 %v4758_v17, %v4454_v19  ;;  %1946 = vmatpush.bf16.msra.mxu0 %v4073_v38 }
 0x13c   :  { %v322_v21 = vadd.f32 %v321_v46, %v4999_v10 }
 0x13d   :  { %v696_v57 = vmax.f32 %v497_v41, 0.0  ;;  %v697_v63 = vmax.f32 %v586_v49, 0.0  ;;  %1606 = vmatmul.bf16.gmra.mxu0 %v5073_v58  ;;  %v411_v41 = vadd.f32 %v410_v52, %v5002_v11  ;;  %2213 = vmatpush.bf16.msra.mxu3 %v4457_v39 }
 0x13e   :  { %1695 = vmatmul.bf16.gmra.mxu1 %v5076_v60 }
 0x13f   :  { %v5246_v2 = vpack.c.bf16 %v696_v57, %v692_v54  ;;  %1784 = vmatmul.bf16.gmra.mxu2 %v5082_v13  ;;  %v5250_v62 = vpack.c.bf16 %v697_v63, %v693_v61  ;;  %1873 = vmatmul.bf16.gmra.mxu3 %v5086_v14  ;;  %v698_v63 = vmax.f32 %v322_v21, 0.0  ;;  %v4198_v14 = vld [vmem:[#allocation4 + $0x1b0] sm:$0xf0]  ;;  %v699_v46 = vmax.f32 %v411_v41, 0.0 }
 0x140   :  { %v4201_v6 = vor.u32 %v4694_v4, %v4198_v14 }
 0x142   :  { %v499_v27 = vpop.f32.mrf.mxu2  ;;  %v588_v45 = vpop.f32.mrf.mxu3  ;;  %2035 = vmatpush.bf16.msra.mxu1 %v4201_v6 }
 0x143   :  { %v323_v49 = vpop.f32.mrf.mxu0  ;;  %v412_v57 = vpop.f32.mrf.mxu1  ;;  %v500_v52 = vadd.f32 %v499_v27, %v5010_v28  ;;  %v589_v12 = vadd.f32 %v588_v45, %v5012_v29 }
 0x144   :  { %v324_v54 = vadd.f32 %v323_v49, %v4999_v10  ;;  %v413_v61 = vadd.f32 %v412_v57, %v5002_v11 }
 0x145   :  { %v700_v41 = vmax.f32 %v500_v52, 0.0  ;;  %v701_v14 = vmax.f32 %v589_v12, 0.0 }
 0x146   :  { %v702_v0 = vmax.f32 %v324_v54, 0.0  ;;  %v703_v13 = vmax.f32 %v413_v61, 0.0 }
 0x148   :  { %v5257_v15 = vpack.c.bf16 %v702_v0, %v698_v63  ;;  %v5260_v17 = vpack.c.bf16 %v703_v13, %v699_v46 }
 0x14a   :  { %v501_v19 = vpop.f32.mrf.mxu2  ;;  %v590_v39 = vpop.f32.mrf.mxu3 }
 0x14b   :  { %v502_v38 = vadd.f32 %v501_v19, %v5010_v28  ;;  %v326_v21 = vpop.f32.mrf.mxu0  ;;  %v591_v49 = vadd.f32 %v590_v39, %v5012_v29  ;;  %v415_v54 = vpop.f32.mrf.mxu1 }
 0x14c   :  { %v327_v45 = vadd.f32 %v326_v21, %v4999_v10  ;;  %v416_v0 = vadd.f32 %v415_v54, %v5002_v11 }
 0x14d   :  { %v704_v57 = vmax.f32 %v502_v38, 0.0  ;;  %v705_v61 = vmax.f32 %v591_v49, 0.0  ;;  %1611 = vmatmul.bf16.gmra.mxu0 %v5099_v33 }
 0x14e   :  { %1700 = vmatmul.bf16.gmra.mxu1 %v5102_v35  ;;  %v706_v19 = vmax.f32 %v327_v45, 0.0  ;;  %v707_v39 = vmax.f32 %v416_v0, 0.0  ;;  %v4182_v35 = vld [vmem:[#allocation4 + $0x190] sm:$0xf0] }
 0x14f   :  { %v5266_v27 = vpack.c.bf16 %v704_v57, %v700_v41  ;;  %1789 = vmatmul.bf16.gmra.mxu2 %v5108_v50  ;;  %v5270_v13 = vpack.c.bf16 %v705_v61, %v701_v14  ;;  %1878 = vmatmul.bf16.gmra.mxu3 %v5112_v51 }
 0x151   :  { %6245 = vst [vmem:[#allocation31_spill] sm:$0xff] %v5270_v13 }
 0x152   :  { %v504_v63 = vpop.f32.mrf.mxu2  ;;  %v593_v4 = vpop.f32.mrf.mxu3 }
 0x153   :  { %v328_v46 = vpop.f32.mrf.mxu0  ;;  %v417_v52 = vpop.f32.mrf.mxu1  ;;  %v505_v57 = vadd.f32 %v504_v63, %v5010_v28  ;;  %v594_v21 = vadd.f32 %v593_v4, %v5012_v29  ;;  %v4722_v4 = vld [vmem:[#allocation4 + $0x284] sm:$0xf] }
 0x154   :  { %v329_v6 = vadd.f32 %v328_v46, %v4999_v10  ;;  %v418_v12 = vadd.f32 %v417_v52, %v5002_v11 }
 0x155   :  { %v708_v45 = vmax.f32 %v505_v57, 0.0  ;;  %v709_v0 = vmax.f32 %v594_v21, 0.0  ;;  %v4754_v57 = vld [vmem:[#allocation4 + $0x384] sm:$0xf]  ;;  %v4438_v21 = vld [vmem:[#allocation4 + $0x390] sm:$0xf0] }
 0x156   :  { %v710_v38 = vmax.f32 %v329_v6, 0.0  ;;  %v711_v49 = vmax.f32 %v418_v12, 0.0 }
 0x158   :  { %v5277_v41 = vpack.c.bf16 %v710_v38, %v706_v19  ;;  %v5280_v14 = vpack.c.bf16 %v711_v49, %v707_v39  ;;  %v4310_v38 = vld [vmem:[#allocation4 + $0x290] sm:$0xf0] }
 0x159   :  { %v4313_v39 = vor.u32 %v4722_v4, %v4310_v38  ;;  %v4054_v49 = vld [vmem:[#allocation4 + $0x90] sm:$0xf0] }
 0x15a   :  { %v506_v54 = vpop.f32.mrf.mxu2  ;;  %v595_v51 = vpop.f32.mrf.mxu3 }
 0x15b   :  { %v507_v61 = vadd.f32 %v506_v54, %v5010_v28  ;;  %v331_v46 = vpop.f32.mrf.mxu0  ;;  %v596_v50 = vadd.f32 %v595_v51, %v5012_v29  ;;  %v420_v52 = vpop.f32.mrf.mxu1  ;;  %v4658_v51 = vld [vmem:[#allocation4 + $0x84] sm:$0xf]  ;;  %2125 = vmatpush.bf16.msra.mxu2 %v4313_v39 }
 0x15d   :  { %v712_v6 = vmax.f32 %v507_v61, 0.0  ;;  %v713_v12 = vmax.f32 %v596_v50, 0.0  ;;  %1616 = vmatmul.bf16.gmra.mxu0 %v5125_v26  ;;  %v332_v50 = vadd.f32 %v331_v46, %v4999_v10  ;;  %v4057_v61 = vor.u32 %v4658_v51, %v4054_v49  ;;  %v4690_v26 = vld [vmem:[#allocation4 + $0x184] sm:$0xf] }
 0x15e   :  { %1705 = vmatmul.bf16.gmra.mxu1 %v5128_v30  ;;  %v4185_v51 = vor.u32 %v4690_v26, %v4182_v35 }
 0x15f   :  { %v5286_v19 = vpack.c.bf16 %v712_v6, %v708_v45  ;;  %1794 = vmatmul.bf16.gmra.mxu2 %v5134_v47  ;;  %v5290_v63 = vpack.c.bf16 %v713_v12, %v709_v0  ;;  %1883 = vmatmul.bf16.gmra.mxu3 %v5138_v48  ;;  %v4441_v45 = vor.u32 %v4754_v57, %v4438_v21  ;;  %v714_v38 = vmax.f32 %v332_v50, 0.0 }
 0x160   :  { %v421_v6 = vadd.f32 %v420_v52, %v5002_v11  ;;  %1947 = vmatpush.bf16.msra.mxu0 %v4057_v61  ;;  %2036 = vmatpush.bf16.msra.mxu1 %v4185_v51 }
 0x161   :  { %2214 = vmatpush.bf16.msra.mxu3 %v4441_v45 }
 0x162   :  { %v509_v54 = vpop.f32.mrf.mxu2  ;;  %v598_v30 = vpop.f32.mrf.mxu3  ;;  %v715_v46 = vmax.f32 %v421_v6, 0.0 }
 0x163   :  { %v333_v47 = vpop.f32.mrf.mxu0  ;;  %v422_v12 = vpop.f32.mrf.mxu1  ;;  %v510_v52 = vadd.f32 %v509_v54, %v5010_v28 }
 0x164   :  { %v334_v0 = vadd.f32 %v333_v47, %v4999_v10  ;;  %v423_v4 = vadd.f32 %v422_v12, %v5002_v11  ;;  %v599_v47 = vadd.f32 %v598_v30, %v5012_v29 }
 0x165   :  { %v716_v6 = vmax.f32 %v510_v52, 0.0 }
 0x166   :  { %v718_v48 = vmax.f32 %v334_v0, 0.0  ;;  %v719_v33 = vmax.f32 %v423_v4, 0.0  ;;  %v717_v35 = vmax.f32 %v599_v47, 0.0 }
 0x168   :  { %v5297_v49 = vpack.c.bf16 %v718_v48, %v714_v38  ;;  %v5300_v57 = vpack.c.bf16 %v719_v33, %v715_v46 }
 0x16a   :  { %v511_v39 = vpop.f32.mrf.mxu2  ;;  %v600_v61 = vpop.f32.mrf.mxu3 }
 0x16b   :  { %v512_v21 = vadd.f32 %v511_v39, %v5010_v28  ;;  %v336_v50 = vpop.f32.mrf.mxu0  ;;  %v601_v45 = vadd.f32 %v600_v61, %v5012_v29  ;;  %v425_v0 = vpop.f32.mrf.mxu1 }
 0x16c   :  { %v337_v30 = vadd.f32 %v336_v50, %v4999_v10  ;;  %v426_v4 = vadd.f32 %v425_v0, %v5002_v11 }
 0x16d   :  { %v720_v12 = vmax.f32 %v512_v21, 0.0  ;;  %v721_v26 = vmax.f32 %v601_v45, 0.0  ;;  %1621 = vmatmul.bf16.gmra.mxu0 %v5151_v5  ;;  %v4166_v5 = vld [vmem:[#allocation4 + $0x170] sm:$0xf0] }
 0x16e   :  { %1710 = vmatmul.bf16.gmra.mxu1 %v5154_v8  ;;  %v722_v39 = vmax.f32 %v337_v30, 0.0  ;;  %v723_v61 = vmax.f32 %v426_v4, 0.0 }
 0x16f   :  { %v5306_v48 = vpack.c.bf16 %v720_v12, %v716_v6  ;;  %1799 = vmatmul.bf16.gmra.mxu2 %v5160_v32  ;;  %v5310_v33 = vpack.c.bf16 %v721_v26, %v717_v35  ;;  %1888 = vmatmul.bf16.gmra.mxu3 %v5164_v34 }
 0x172   :  { %v514_v54 = vpop.f32.mrf.mxu2  ;;  %v603_v38 = vpop.f32.mrf.mxu3 }
 0x173   :  { %v338_v46 = vpop.f32.mrf.mxu0  ;;  %v427_v52 = vpop.f32.mrf.mxu1  ;;  %v515_v12 = vadd.f32 %v514_v54, %v5010_v28  ;;  %v604_v50 = vadd.f32 %v603_v38, %v5012_v29  ;;  %v4718_v38 = vld [vmem:[#allocation4 + $0x264] sm:$0xf] }
 0x174   :  { %v339_v51 = vadd.f32 %v338_v46, %v4999_v10  ;;  %v428_v47 = vadd.f32 %v427_v52, %v5002_v11 }
 0x175   :  { %v724_v30 = vmax.f32 %v515_v12, 0.0  ;;  %v725_v4 = vmax.f32 %v604_v50, 0.0  ;;  %v4750_v12 = vld [vmem:[#allocation4 + $0x364] sm:$0xf]  ;;  %v4422_v50 = vld [vmem:[#allocation4 + $0x370] sm:$0xf0] }
 0x176   :  { %v726_v21 = vmax.f32 %v339_v51, 0.0  ;;  %v727_v45 = vmax.f32 %v428_v47, 0.0 }
 0x178   :  { %v5317_v6 = vpack.c.bf16 %v726_v21, %v722_v39  ;;  %v5320_v35 = vpack.c.bf16 %v727_v45, %v723_v61  ;;  %v4294_v21 = vld [vmem:[#allocation4 + $0x270] sm:$0xf0] }
 0x179   :  { %v4297_v61 = vor.u32 %v4718_v38, %v4294_v21  ;;  %v4038_v45 = vld [vmem:[#allocation4 + $0x70] sm:$0xf0] }
 0x17a   :  { %v516_v0 = vpop.f32.mrf.mxu2  ;;  %v605_v34 = vpop.f32.mrf.mxu3 }
 0x17b   :  { %v517_v26 = vadd.f32 %v516_v0, %v5010_v28  ;;  %v341_v46 = vpop.f32.mrf.mxu0  ;;  %v606_v32 = vadd.f32 %v605_v34, %v5012_v29  ;;  %v430_v52 = vpop.f32.mrf.mxu1  ;;  %v4654_v34 = vld [vmem:[#allocation4 + $0x64] sm:$0xf]  ;;  %2126 = vmatpush.bf16.msra.mxu2 %v4297_v61 }
 0x17d   :  { %v728_v51 = vmax.f32 %v517_v26, 0.0  ;;  %v729_v47 = vmax.f32 %v606_v32, 0.0  ;;  %1626 = vmatmul.bf16.gmra.mxu0 %v5177_v16  ;;  %v342_v32 = vadd.f32 %v341_v46, %v4999_v10  ;;  %v4041_v26 = vor.u32 %v4654_v34, %v4038_v45  ;;  %v4686_v46 = vld [vmem:[#allocation4 + $0x164] sm:$0xf] }
 0x17e   :  { %1715 = vmatmul.bf16.gmra.mxu1 %v5180_v18  ;;  %v4169_v45 = vor.u32 %v4686_v46, %v4166_v5 }
 0x17f   :  { %v5326_v39 = vpack.c.bf16 %v728_v51, %v724_v30  ;;  %1804 = vmatmul.bf16.gmra.mxu2 %v5186_v43  ;;  %v5330_v54 = vpack.c.bf16 %v729_v47, %v725_v4  ;;  %1893 = vmatmul.bf16.gmra.mxu3 %v5190_v44  ;;  %v4425_v30 = vor.u32 %v4750_v12, %v4422_v50  ;;  %v730_v21 = vmax.f32 %v342_v32, 0.0 }
 0x180   :  { %v431_v51 = vadd.f32 %v430_v52, %v5002_v11  ;;  %1948 = vmatpush.bf16.msra.mxu0 %v4041_v26  ;;  %2037 = vmatpush.bf16.msra.mxu1 %v4169_v45 }
 0x181   :  { %2215 = vmatpush.bf16.msra.mxu3 %v4425_v30 }
 0x182   :  { %v519_v0 = vpop.f32.mrf.mxu2  ;;  %v608_v18 = vpop.f32.mrf.mxu3  ;;  %v731_v16 = vmax.f32 %v431_v51, 0.0 }
 0x183   :  { %v343_v43 = vpop.f32.mrf.mxu0  ;;  %v432_v47 = vpop.f32.mrf.mxu1  ;;  %v520_v52 = vadd.f32 %v519_v0, %v5010_v28 }
 0x184   :  { %v344_v4 = vadd.f32 %v343_v43, %v4999_v10  ;;  %v433_v38 = vadd.f32 %v432_v47, %v5002_v11  ;;  %v609_v43 = vadd.f32 %v608_v18, %v5012_v29 }
 0x186   :  { %v734_v44 = vmax.f32 %v344_v4, 0.0  ;;  %v735_v8 = vmax.f32 %v433_v38, 0.0  ;;  %v732_v4 = vmax.f32 %v520_v52, 0.0 }
 0x188   :  { %v5337_v34 = vpack.c.bf16 %v734_v44, %v730_v21  ;;  %v5340_v12 = vpack.c.bf16 %v735_v8, %v731_v16  ;;  %v733_v44 = vmax.f32 %v609_v43, 0.0 }
 0x18a   :  { %v521_v61 = vpop.f32.mrf.mxu2  ;;  %v610_v26 = vpop.f32.mrf.mxu3 }
 0x18b   :  { %v522_v50 = vadd.f32 %v521_v61, %v5010_v28  ;;  %v346_v32 = vpop.f32.mrf.mxu0  ;;  %v611_v30 = vadd.f32 %v610_v26, %v5012_v29  ;;  %v435_v51 = vpop.f32.mrf.mxu1  ;;  %v5360_v61 = vld [vmem:[%s6168_s4] sm:$0xf] }
 0x18c   :  { %v347_v16 = vadd.f32 %v346_v32, %v4999_v10  ;;  %v436_v0 = vadd.f32 %v435_v51, %v5002_v11  ;;  %6246 = vst [vmem:[#allocation32_spill] sm:$0xff] %v5360_v61  ;;  %v5365_v51 = vperm.slane %v5360_v61, 0 }
 0x18d   :  { %v736_v47 = vmax.f32 %v522_v50, 0.0  ;;  %v737_v38 = vmax.f32 %v611_v30, 0.0  ;;  %1631 = vmatmul.bf16.gmra.mxu0 %v5197_v1 }
 0x18e   :  { %1720 = vmatmul.bf16.gmra.mxu1 %v5200_v3  ;;  %v738_v50 = vmax.f32 %v347_v16, 0.0  ;;  %v739_v30 = vmax.f32 %v436_v0, 0.0 }
 0x18f   :  { %v5346_v5 = vpack.c.bf16 %v736_v47, %v732_v4  ;;  %1809 = vmatmul.bf16.gmra.mxu2 %v5206_v31  ;;  %v5350_v8 = vpack.c.bf16 %v737_v38, %v733_v44  ;;  %1898 = vmatmul.bf16.gmra.mxu3 %v5210_v36 }
 0x192   :  { %v524_v18 = vpop.f32.mrf.mxu2  ;;  %v613_v21 = vpop.f32.mrf.mxu3 }
 0x193   :  { %v348_v46 = vpop.f32.mrf.mxu0  ;;  %v437_v52 = vpop.f32.mrf.mxu1  ;;  %v525_v47 = vadd.f32 %v524_v18, %v5010_v28 }
 0x194   :  { %v349_v45 = vadd.f32 %v348_v46, %v4999_v10  ;;  %v438_v43 = vadd.f32 %v437_v52, %v5002_v11  ;;  %v614_v11 = vadd.f32 %v613_v21, %v5012_v29  ;;  %v4278_v21 = vld [vmem:[#allocation4 + $0x250] sm:$0xf0] }
 0x196   :  { %v742_v26 = vmax.f32 %v349_v45, 0.0  ;;  %v743_v4 = vmax.f32 %v438_v43, 0.0  ;;  %v740_v43 = vmax.f32 %v525_v47, 0.0  ;;  %v4022_v47 = vld [vmem:[#allocation4 + $0x50] sm:$0xf0] }
 0x198   :  { %v5362_v32 = vpack.c.bf16 %v742_v26, %v738_v50  ;;  %v5368_v10 = vpack.c.bf16 %v743_v4, %v739_v30  ;;  %v741_v26 = vmax.f32 %v614_v11, 0.0  ;;  %v4650_v30 = vld [vmem:[#allocation4 + $0x44] sm:$0xf] }
 0x199   :  { %v4746_v11 = vld [vmem:[#allocation4 + $0x344] sm:$0xf] }
 0x19a   :  { %v526_v44 = vpop.f32.mrf.mxu2  ;;  %v615_v46 = vpop.f32.mrf.mxu3 }
 0x19b   :  { %v527_v38 = vadd.f32 %v526_v44, %v5010_v28  ;;  %v1597_v52 = vpop.f32.mrf.mxu0  ;;  %v616_v16 = vadd.f32 %v615_v46, %v5012_v29  ;;  %v1686_v45 = vpop.f32.mrf.mxu1  ;;  %v4714_v29 = vld [vmem:[#allocation4 + $0x244] sm:$0xf]  ;;  %v4406_v44 = vld [vmem:[#allocation4 + $0x350] sm:$0xf0]  ;;  %v4025_v46 = vor.u32 %v4650_v30, %v4022_v47 }
 0x19c   :  { %v1598_v0 = vadd.f32 %v1597_v52, %v5365_v51  ;;  %v4281_v4 = vor.u32 %v4714_v29, %v4278_v21  ;;  %v4409_v52 = vor.u32 %v4746_v11, %v4406_v44 }
 0x19d   :  { %v744_v50 = vmax.f32 %v527_v38, 0.0  ;;  %v745_v61 = vmax.f32 %v616_v16, 0.0  ;;  %1636 = vmatmul.bf16.gmra.mxu0 %v5217_v22 }
 0x19e   :  { %v1687_v36 = vadd.f32 %v1686_v45, %v1598_v0  ;;  %1725 = vmatmul.bf16.gmra.mxu1 %v5220_v23  ;;  %2127 = vmatpush.bf16.msra.mxu2 %v4281_v4 }
 0x19f   :  { %v5375_v18 = vpack.c.bf16 %v744_v50, %v740_v43  ;;  %1814 = vmatmul.bf16.gmra.mxu2 %v5226_v53  ;;  %v5379_v28 = vpack.c.bf16 %v745_v61, %v741_v26  ;;  %1903 = vmatmul.bf16.gmra.mxu3 %v5230_v59  ;;  %v4682_v59 = vld [vmem:[#allocation4 + $0x144] sm:$0xf]  ;;  %v4150_v53 = vld [vmem:[#allocation4 + $0x150] sm:$0xf0] }
 0x1a0   :  { %1949 = vmatpush.bf16.msra.mxu0 %v4025_v46  ;;  %2216 = vmatpush.bf16.msra.mxu3 %v4409_v52  ;;  %v4153_v29 = vor.u32 %v4682_v59, %v4150_v53 }
 0x1a2   :  { %v1775_v38 = vpop.f32.mrf.mxu2  ;;  %v1864_v0 = vpop.f32.mrf.mxu3  ;;  %2038 = vmatpush.bf16.msra.mxu1 %v4153_v29 }
 0x1a3   :  { %v1776_v16 = vadd.f32 %v1775_v38, %v1687_v36  ;;  %v1599_v45 = vpop.f32.mrf.mxu0  ;;  %v1688_v61 = vpop.f32.mrf.mxu1 }
 0x1a4   :  { %v1600_v43 = vadd.f32 %v1599_v45, %v5365_v51 }
 0x1a5   :  { %v1865_v50 = vadd.f32 %v1864_v0, %v1776_v16 }
 0x1a6   :  { %v1689_v26 = vadd.f32 %v1688_v61, %v1600_v43 }
 0x1a7   :  { %v3012_v44 = vmax.f32 %v1865_v50, 0.0 }
 0x1aa   :  { %v1777_v21 = vpop.f32.mrf.mxu2  ;;  %v1866_v22 = vpop.f32.mrf.mxu3 }
 0x1ab   :  { %v1778_v23 = vadd.f32 %v1777_v21, %v1689_v26  ;;  %v1602_v30 = vpop.f32.mrf.mxu0  ;;  %v1691_v47 = vpop.f32.mrf.mxu1 }
 0x1ac   :  { %v1603_v36 = vadd.f32 %v1602_v30, %v5365_v51 }
 0x1ad   :  { %v1867_v11 = vadd.f32 %v1866_v22, %v1778_v23  ;;  %1641 = vmatmul.bf16.gmra.mxu0 %v5237_v20 }
 0x1ae   :  { %v1692_v4 = vadd.f32 %v1691_v47, %v1603_v36  ;;  %1730 = vmatmul.bf16.gmra.mxu1 %v5240_v37 }
 0x1af   :  { %v3016_v38 = vmax.f32 %v1867_v11, 0.0  ;;  %1819 = vmatmul.bf16.gmra.mxu2 %v5246_v2  ;;  %1908 = vmatmul.bf16.gmra.mxu3 %v5250_v62 }
 0x1b1   :  { %v5388_v53 = vpack.c.bf16 %v3016_v38, %v3012_v44  ;;  %v4262_v44 = vld [vmem:[#allocation4 + $0x230] sm:$0xf0]  ;;  %v4646_v38 = vld [vmem:[#allocation4 + $0x24] sm:$0xf] }
 0x1b2   :  { %v1780_v59 = vpop.f32.mrf.mxu2  ;;  %v1869_v52 = vpop.f32.mrf.mxu3 }
 0x1b3   :  { %6247 = vst [vmem:[#allocation33_spill] sm:$0xff] %v5388_v53  ;;  %v1781_v46 = vadd.f32 %v1780_v59, %v1692_v4  ;;  %v1604_v16 = vpop.f32.mrf.mxu0  ;;  %v1693_v22 = vpop.f32.mrf.mxu1  ;;  %v4710_v4 = vld [vmem:[#allocation4 + $0x224] sm:$0xf] }
 0x1b4   :  { %v1605_v0 = vadd.f32 %v1604_v16, %v5365_v51  ;;  %v4265_v59 = vor.u32 %v4710_v4, %v4262_v44  ;;  %v4390_v16 = vld [vmem:[#allocation4 + $0x330] sm:$0xf0]  ;;  %v4678_v4 = vld [vmem:[#allocation4 + $0x124] sm:$0xf] }
 0x1b5   :  { %v1870_v23 = vadd.f32 %v1869_v52, %v1781_v46  ;;  %v4006_v46 = vld [vmem:[#allocation4 + $0x30] sm:$0xf0]  ;;  %v4742_v52 = vld [vmem:[#allocation4 + $0x324] sm:$0xf] }
 0x1b6   :  { %v1694_v45 = vadd.f32 %v1693_v22, %v1605_v0  ;;  %2128 = vmatpush.bf16.msra.mxu2 %v4265_v59  ;;  %v4134_v44 = vld [vmem:[#allocation4 + $0x130] sm:$0xf0] }
 0x1b7   :  { %v3020_v47 = vmax.f32 %v1870_v23, 0.0  ;;  %v4137_v53 = vor.u32 %v4678_v4, %v4134_v44 }
 0x1b9   :  { %2039 = vmatpush.bf16.msra.mxu1 %v4137_v53 }
 0x1ba   :  { %v1782_v43 = vpop.f32.mrf.mxu2  ;;  %v1871_v50 = vpop.f32.mrf.mxu3 }
 0x1bb   :  { %v1783_v61 = vadd.f32 %v1782_v43, %v1694_v45  ;;  %v1607_v26 = vpop.f32.mrf.mxu0  ;;  %v1696_v21 = vpop.f32.mrf.mxu1  ;;  %v4009_v45 = vor.u32 %v4646_v38, %v4006_v46  ;;  %v4393_v43 = vor.u32 %v4742_v52, %v4390_v16 }
 0x1bc   :  { %v1608_v29 = vadd.f32 %v1607_v26, %v5365_v51 }
 0x1bd   :  { %v1872_v30 = vadd.f32 %v1871_v50, %v1783_v61  ;;  %1646 = vmatmul.bf16.gmra.mxu0 %v5257_v15  ;;  %2217 = vmatpush.bf16.msra.mxu3 %v4393_v43 }
 0x1be   :  { %v1697_v36 = vadd.f32 %v1696_v21, %v1608_v29  ;;  %1735 = vmatmul.bf16.gmra.mxu1 %v5260_v17  ;;  %1950 = vmatpush.bf16.msra.mxu0 %v4009_v45 }
 0x1bf   :  { %v3024_v11 = vmax.f32 %v1872_v30, 0.0  ;;  %1824 = vmatmul.bf16.gmra.mxu2 %v5266_v27  ;;  %1913 = vmatmul.bf16.gmra.mxu3 %v5270_v13 }
 0x1c1   :  { %v5396_v0 = vpack.c.bf16 %v3024_v11, %v3020_v47 }
 0x1c2   :  { %v1785_v22 = vpop.f32.mrf.mxu2  ;;  %v1874_v61 = vpop.f32.mrf.mxu3 }
 0x1c3   :  { %6248 = vst [vmem:[#allocation34_spill] sm:$0xff] %v5396_v0  ;;  %v1786_v23 = vadd.f32 %v1785_v22, %v1697_v36  ;;  %v1609_v50 = vpop.f32.mrf.mxu0  ;;  %v1698_v29 = vpop.f32.mrf.mxu1 }
 0x1c4   :  { %v1610_v26 = vadd.f32 %v1609_v50, %v5365_v51 }
 0x1c5   :  { %v1875_v21 = vadd.f32 %v1874_v61, %v1786_v23 }
 0x1c6   :  { %v1699_v30 = vadd.f32 %v1698_v29, %v1610_v26 }
 0x1c7   :  { %v3028_v16 = vmax.f32 %v1875_v21, 0.0 }
 0x1ca   :  { %v1787_v13 = vpop.f32.mrf.mxu2  ;;  %v1876_v11 = vpop.f32.mrf.mxu3 }
 0x1cb   :  { %v1788_v47 = vadd.f32 %v1787_v13, %v1699_v30  ;;  %v1612_v38 = vpop.f32.mrf.mxu0  ;;  %v1701_v46 = vpop.f32.mrf.mxu1 }
 0x1cc   :  { %v1613_v36 = vadd.f32 %v1612_v38, %v5365_v51 }
 0x1cd   :  { %v1877_v52 = vadd.f32 %v1876_v11, %v1788_v47  ;;  %1651 = vmatmul.bf16.gmra.mxu0 %v5277_v41 }
 0x1ce   :  { %v1702_v59 = vadd.f32 %v1701_v46, %v1613_v36  ;;  %1740 = vmatmul.bf16.gmra.mxu1 %v5280_v14 }
 0x1cf   :  { %v3032_v22 = vmax.f32 %v1877_v52, 0.0  ;;  %1829 = vmatmul.bf16.gmra.mxu2 %v5286_v19  ;;  %1918 = vmatmul.bf16.gmra.mxu3 %v5290_v63 }
 0x1d1   :  { %v5404_v45 = vpack.c.bf16 %v3032_v22, %v3028_v16  ;;  %v4246_v16 = vld [vmem:[#allocation4 + $0x210] sm:$0xf0]  ;;  %v4642_v22 = vld [vmem:[#allocation4 + $0x4] sm:$0xf] }
 0x1d2   :  { %v1790_v13 = vpop.f32.mrf.mxu2  ;;  %v1879_v43 = vpop.f32.mrf.mxu3 }
 0x1d3   :  { %6249 = vst [vmem:[#allocation35_spill] sm:$0xff] %v5404_v45  ;;  %v1791_v53 = vadd.f32 %v1790_v13, %v1702_v59  ;;  %v1614_v23 = vpop.f32.mrf.mxu0  ;;  %v1703_v50 = vpop.f32.mrf.mxu1  ;;  %v4706_v59 = vld [vmem:[#allocation4 + $0x204] sm:$0xf] }
 0x1d4   :  { %v1615_v61 = vadd.f32 %v1614_v23, %v5365_v51  ;;  %v4249_v13 = vor.u32 %v4706_v59, %v4246_v16  ;;  %v4374_v23 = vld [vmem:[#allocation4 + $0x310] sm:$0xf0]  ;;  %v4674_v59 = vld [vmem:[#allocation4 + $0x104] sm:$0xf] }
 0x1d5   :  { %v1880_v26 = vadd.f32 %v1879_v43, %v1791_v53  ;;  %v3990_v53 = vld [vmem:[#allocation4 + $0x10] sm:$0xf0]  ;;  %v4738_v43 = vld [vmem:[#allocation4 + $0x304] sm:$0xf] }
 0x1d6   :  { %v1704_v29 = vadd.f32 %v1703_v50, %v1615_v61  ;;  %2129 = vmatpush.bf16.msra.mxu2 %v4249_v13  ;;  %v4118_v16 = vld [vmem:[#allocation4 + $0x110] sm:$0xf0] }
 0x1d7   :  { %v3036_v46 = vmax.f32 %v1880_v26, 0.0  ;;  %v4121_v45 = vor.u32 %v4674_v59, %v4118_v16 }
 0x1d9   :  { %2040 = vmatpush.bf16.msra.mxu1 %v4121_v45 }
 0x1da   :  { %v1792_v30 = vpop.f32.mrf.mxu2  ;;  %v1881_v4 = vpop.f32.mrf.mxu3 }
 0x1db   :  { %v1793_v21 = vadd.f32 %v1792_v30, %v1704_v29  ;;  %v1617_v44 = vpop.f32.mrf.mxu0  ;;  %v1706_v11 = vpop.f32.mrf.mxu1  ;;  %v3993_v29 = vor.u32 %v4642_v22, %v3990_v53  ;;  %v4377_v30 = vor.u32 %v4738_v43, %v4374_v23 }
 0x1dc   :  { %v1618_v47 = vadd.f32 %v1617_v44, %v5365_v51 }
 0x1dd   :  { %v1882_v38 = vadd.f32 %v1881_v4, %v1793_v21  ;;  %1656 = vmatmul.bf16.gmra.mxu0 %v5297_v49  ;;  %2218 = vmatpush.bf16.msra.mxu3 %v4377_v30 }
 0x1de   :  { %v1707_v36 = vadd.f32 %v1706_v11, %v1618_v47  ;;  %1745 = vmatmul.bf16.gmra.mxu1 %v5300_v57  ;;  %1951 = vmatpush.bf16.msra.mxu0 %v3993_v29 }
 0x1df   :  { %v3040_v52 = vmax.f32 %v1882_v38, 0.0  ;;  %1834 = vmatmul.bf16.gmra.mxu2 %v5306_v48  ;;  %1923 = vmatmul.bf16.gmra.mxu3 %v5310_v33 }
 0x1e1   :  { %v5412_v61 = vpack.c.bf16 %v3040_v52, %v3036_v46 }
 0x1e2   :  { %v1795_v50 = vpop.f32.mrf.mxu2  ;;  %v1884_v21 = vpop.f32.mrf.mxu3 }
 0x1e3   :  { %6250 = vst [vmem:[#allocation36_spill] sm:$0xff] %v5412_v61  ;;  %v1796_v26 = vadd.f32 %v1795_v50, %v1707_v36  ;;  %v1619_v4 = vpop.f32.mrf.mxu0  ;;  %v1708_v47 = vpop.f32.mrf.mxu1 }
 0x1e4   :  { %v1620_v44 = vadd.f32 %v1619_v4, %v5365_v51 }
 0x1e5   :  { %v1885_v11 = vadd.f32 %v1884_v21, %v1796_v26 }
 0x1e6   :  { %v1709_v38 = vadd.f32 %v1708_v47, %v1620_v44 }
 0x1e7   :  { %v3044_v23 = vmax.f32 %v1885_v11, 0.0 }
 0x1ea   :  { %v1797_v0 = vpop.f32.mrf.mxu2  ;;  %v1886_v52 = vpop.f32.mrf.mxu3 }
 0x1eb   :  { %v1798_v46 = vadd.f32 %v1797_v0, %v1709_v38  ;;  %v1622_v22 = vpop.f32.mrf.mxu0  ;;  %v1711_v53 = vpop.f32.mrf.mxu1 }
 0x1ec   :  { %v1623_v36 = vadd.f32 %v1622_v22, %v5365_v51 }
 0x1ed   :  { %v1887_v43 = vadd.f32 %v1886_v52, %v1798_v46  ;;  %1661 = vmatmul.bf16.gmra.mxu0 %v5317_v6 }
 0x1ee   :  { %v1712_v13 = vadd.f32 %v1711_v53, %v1623_v36  ;;  %1750 = vmatmul.bf16.gmra.mxu1 %v5320_v35 }
 0x1ef   :  { %v3048_v50 = vmax.f32 %v1887_v43, 0.0  ;;  %1839 = vmatmul.bf16.gmra.mxu2 %v5326_v39  ;;  %1928 = vmatmul.bf16.gmra.mxu3 %v5330_v54 }
 0x1f1   :  { %v5420_v29 = vpack.c.bf16 %v3048_v50, %v3044_v23  ;;  %v4737_v23 = vld [vmem:[#allocation4 + $0x2f4] sm:$0xf0]  ;;  %v4108_v50 = vld [vmem:[#allocation4 + $0xe8] sm:$0xf] }
 0x1f2   :  { %v1800_v0 = vpop.f32.mrf.mxu2  ;;  %v1889_v30 = vpop.f32.mrf.mxu3 }
 0x1f3   :  { %6251 = vst [vmem:[#allocation37_spill] sm:$0xff] %v5420_v29  ;;  %v1801_v45 = vadd.f32 %v1800_v0, %v1712_v13  ;;  %v1624_v26 = vpop.f32.mrf.mxu0  ;;  %v1713_v4 = vpop.f32.mrf.mxu1  ;;  %v4364_v13 = vld [vmem:[#allocation4 + $0x2e8] sm:$0xf] }
 0x1f4   :  { %v1625_v21 = vadd.f32 %v1624_v26, %v5365_v51  ;;  %v4365_v0 = vor.u32 %v4737_v23, %v4364_v13  ;;  %v4769_v26 = vld [vmem:[#allocation4 + $0x3f4] sm:$0xf0]  ;;  %v4236_v13 = vld [vmem:[#allocation4 + $0x1e8] sm:$0xf] }
 0x1f5   :  { %v1890_v44 = vadd.f32 %v1889_v30, %v1801_v45  ;;  %v4673_v45 = vld [vmem:[#allocation4 + $0xf4] sm:$0xf0]  ;;  %v4492_v30 = vld [vmem:[#allocation4 + $0x3e8] sm:$0xf] }
 0x1f6   :  { %v1714_v47 = vadd.f32 %v1713_v4, %v1625_v21  ;;  %2478 = vmatpush.bf16.msrb.mxu2 %v4365_v0  ;;  %v4705_v23 = vld [vmem:[#allocation4 + $0x1f4] sm:$0xf0] }
 0x1f7   :  { %v3052_v53 = vmax.f32 %v1890_v44, 0.0  ;;  %v4237_v29 = vor.u32 %v4705_v23, %v4236_v13 }
 0x1f9   :  { %2389 = vmatpush.bf16.msrb.mxu1 %v4237_v29 }
 0x1fa   :  { %v1802_v38 = vpop.f32.mrf.mxu2  ;;  %v1891_v59 = vpop.f32.mrf.mxu3 }
 0x1fb   :  { %v1803_v11 = vadd.f32 %v1802_v38, %v1714_v47  ;;  %v1627_v16 = vpop.f32.mrf.mxu0  ;;  %v1716_v52 = vpop.f32.mrf.mxu1  ;;  %v4109_v47 = vor.u32 %v4673_v45, %v4108_v50  ;;  %v4493_v38 = vor.u32 %v4769_v26, %v4492_v30 }
 0x1fc   :  { %v1628_v46 = vadd.f32 %v1627_v16, %v5365_v51 }
 0x1fd   :  { %v1892_v22 = vadd.f32 %v1891_v59, %v1803_v11  ;;  %1666 = vmatmul.bf16.gmra.mxu0 %v5337_v34  ;;  %2567 = vmatpush.bf16.msrb.mxu3 %v4493_v38 }
 0x1fe   :  { %v1717_v36 = vadd.f32 %v1716_v52, %v1628_v46  ;;  %1755 = vmatmul.bf16.gmra.mxu1 %v5340_v12  ;;  %2300 = vmatpush.bf16.msrb.mxu0 %v4109_v47 }
 0x1ff   :  { %v3056_v43 = vmax.f32 %v1892_v22, 0.0  ;;  %1844 = vmatmul.bf16.gmra.mxu2 %v5346_v5  ;;  %1933 = vmatmul.bf16.gmra.mxu3 %v5350_v8 }
 0x201   :  { %v5428_v21 = vpack.c.bf16 %v3056_v43, %v3052_v53 }
 0x202   :  { %v1805_v4 = vpop.f32.mrf.mxu2  ;;  %v1894_v11 = vpop.f32.mrf.mxu3 }
 0x203   :  { %6252 = vst [vmem:[#allocation38_spill] sm:$0xff] %v5428_v21  ;;  %v1806_v44 = vadd.f32 %v1805_v4, %v1717_v36  ;;  %v1629_v59 = vpop.f32.mrf.mxu0  ;;  %v1718_v46 = vpop.f32.mrf.mxu1 }
 0x204   :  { %v1630_v16 = vadd.f32 %v1629_v59, %v5365_v51 }
 0x205   :  { %v1895_v52 = vadd.f32 %v1894_v11, %v1806_v44 }
 0x206   :  { %v1719_v22 = vadd.f32 %v1718_v46, %v1630_v16 }
 0x207   :  { %v3060_v26 = vmax.f32 %v1895_v52, 0.0 }
 0x20a   :  { %v1807_v61 = vpop.f32.mrf.mxu2  ;;  %v1896_v43 = vpop.f32.mrf.mxu3 }
 0x20b   :  { %v1808_v53 = vadd.f32 %v1807_v61, %v1719_v22  ;;  %v1632_v50 = vpop.f32.mrf.mxu0  ;;  %v1721_v45 = vpop.f32.mrf.mxu1 }
 0x20c   :  { %v1633_v36 = vadd.f32 %v1632_v50, %v5365_v51 }
 0x20d   :  { %v1897_v30 = vadd.f32 %v1896_v43, %v1808_v53  ;;  %1671 = vmatmul.bf16.gmra.mxu0 %v5362_v32 }
 0x20e   :  { %v1722_v0 = vadd.f32 %v1721_v45, %v1633_v36  ;;  %1760 = vmatmul.bf16.gmra.mxu1 %v5368_v10 }
 0x20f   :  { %v3064_v4 = vmax.f32 %v1897_v30, 0.0  ;;  %1849 = vmatmul.bf16.gmra.mxu2 %v5375_v18  ;;  %1938 = vmatmul.bf16.gmra.mxu3 %v5379_v28 }
 0x211   :  { %v5436_v47 = vpack.c.bf16 %v3064_v4, %v3060_v26  ;;  %v4733_v26 = vld [vmem:[#allocation4 + $0x2d4] sm:$0xf0]  ;;  %v4092_v4 = vld [vmem:[#allocation4 + $0xc8] sm:$0xf] }
 0x212   :  { %v1810_v61 = vpop.f32.mrf.mxu2  ;;  %v1899_v38 = vpop.f32.mrf.mxu3 }
 0x213   :  { %6253 = vst [vmem:[#allocation39_spill] sm:$0xff] %v5436_v47  ;;  %v1811_v29 = vadd.f32 %v1810_v61, %v1722_v0  ;;  %v1634_v44 = vpop.f32.mrf.mxu0  ;;  %v1723_v59 = vpop.f32.mrf.mxu1  ;;  %v4348_v0 = vld [vmem:[#allocation4 + $0x2c8] sm:$0xf] }
 0x214   :  { %v1635_v11 = vadd.f32 %v1634_v44, %v5365_v51  ;;  %v4349_v61 = vor.u32 %v4733_v26, %v4348_v0  ;;  %v4765_v44 = vld [vmem:[#allocation4 + $0x3d4] sm:$0xf0]  ;;  %v4220_v0 = vld [vmem:[#allocation4 + $0x1c8] sm:$0xf] }
 0x215   :  { %v1900_v16 = vadd.f32 %v1899_v38, %v1811_v29  ;;  %v4669_v29 = vld [vmem:[#allocation4 + $0xd4] sm:$0xf0]  ;;  %v4476_v38 = vld [vmem:[#allocation4 + $0x3c8] sm:$0xf] }
 0x216   :  { %v1724_v46 = vadd.f32 %v1723_v59, %v1635_v11  ;;  %2479 = vmatpush.bf16.msrb.mxu2 %v4349_v61  ;;  %v4701_v26 = vld [vmem:[#allocation4 + $0x1d4] sm:$0xf0] }
 0x217   :  { %v3068_v45 = vmax.f32 %v1900_v16, 0.0  ;;  %v4221_v47 = vor.u32 %v4701_v26, %v4220_v0 }
 0x219   :  { %2390 = vmatpush.bf16.msrb.mxu1 %v4221_v47 }
 0x21a   :  { %v1812_v22 = vpop.f32.mrf.mxu2  ;;  %v1901_v13 = vpop.f32.mrf.mxu3 }
 0x21b   :  { %v1813_v52 = vadd.f32 %v1812_v22, %v1724_v46  ;;  %v1637_v23 = vpop.f32.mrf.mxu0  ;;  %v1726_v43 = vpop.f32.mrf.mxu1  ;;  %v4093_v46 = vor.u32 %v4669_v29, %v4092_v4  ;;  %v4477_v22 = vor.u32 %v4765_v44, %v4476_v38 }
 0x21c   :  { %v1638_v53 = vadd.f32 %v1637_v23, %v5365_v51 }
 0x21d   :  { %v1902_v50 = vadd.f32 %v1901_v13, %v1813_v52  ;;  %1952 = vmatmul.bf16.vlgmr.msra.gmra.mxu0 %v5021_v40  ;;  %2568 = vmatpush.bf16.msrb.mxu3 %v4477_v22 }
 0x21e   :  { %v1727_v36 = vadd.f32 %v1726_v43, %v1638_v53  ;;  %2041 = vmatmul.bf16.vlgmr.msra.gmra.mxu1 %v5024_v42  ;;  %2301 = vmatpush.bf16.msrb.mxu0 %v4093_v46 }
 0x21f   :  { %v3072_v30 = vmax.f32 %v1902_v50, 0.0  ;;  %2130 = vmatmul.bf16.vlgmr.msra.gmra.mxu2 %v5030_v55  ;;  %2219 = vmatmul.bf16.vlgmr.msra.gmra.mxu3 %v5034_v56 }
 0x221   :  { %v5444_v11 = vpack.c.bf16 %v3072_v30, %v3068_v45 }
 0x222   :  { %v1815_v59 = vpop.f32.mrf.mxu2  ;;  %v1904_v52 = vpop.f32.mrf.mxu3 }
 0x223   :  { %6254 = vst [vmem:[#allocation40_spill] sm:$0xff] %v5444_v11  ;;  %v1816_v16 = vadd.f32 %v1815_v59, %v1727_v36  ;;  %v1639_v13 = vpop.f32.mrf.mxu0  ;;  %v1728_v53 = vpop.f32.mrf.mxu1 }
 0x224   :  { %v1640_v23 = vadd.f32 %v1639_v13, %v5365_v51 }
 0x225   :  { %v1905_v43 = vadd.f32 %v1904_v52, %v1816_v16 }
 0x226   :  { %v1729_v50 = vadd.f32 %v1728_v53, %v1640_v23 }
 0x227   :  { %v3076_v44 = vmax.f32 %v1905_v43, 0.0 }
 0x22a   :  { %v1817_v21 = vpop.f32.mrf.mxu2  ;;  %v1906_v30 = vpop.f32.mrf.mxu3 }
 0x22b   :  { %v1818_v45 = vadd.f32 %v1817_v21, %v1729_v50  ;;  %v1642_v4 = vpop.f32.mrf.mxu0  ;;  %v1731_v29 = vpop.f32.mrf.mxu1 }
 0x22c   :  { %v1643_v36 = vadd.f32 %v1642_v4, %v5365_v51 }
 0x22d   :  { %v1907_v38 = vadd.f32 %v1906_v30, %v1818_v45  ;;  %1957 = vmatmul.bf16.gmra.mxu0 %v5047_v7 }
 0x22e   :  { %v1732_v61 = vadd.f32 %v1731_v29, %v1643_v36  ;;  %2046 = vmatmul.bf16.gmra.mxu1 %v5050_v9 }
 0x22f   :  { %v3080_v59 = vmax.f32 %v1907_v38, 0.0  ;;  %2135 = vmatmul.bf16.gmra.mxu2 %v5056_v24  ;;  %2224 = vmatmul.bf16.gmra.mxu3 %v5060_v25 }
 0x231   :  { %v5452_v46 = vpack.c.bf16 %v3080_v59, %v3076_v44  ;;  %v6257_v44 = vld [vmem:[#allocation9_spill] sm:$0xff] }
 0x232   :  { %v1820_v21 = vpop.f32.mrf.mxu2  ;;  %v1909_v22 = vpop.f32.mrf.mxu3  ;;  %v4332_v59 = vld [vmem:[#allocation4 + $0x2a8] sm:$0xf] }
 0x233   :  { %6255 = vst [vmem:[#allocation41_spill] sm:$0xff] %v5452_v46  ;;  %v1821_v47 = vadd.f32 %v1820_v21, %v1732_v61  ;;  %v1644_v16 = vpop.f32.mrf.mxu0  ;;  %v1733_v13 = vpop.f32.mrf.mxu1  ;;  %v6256_v61 = vld [vmem:[#allocation8_spill] sm:$0xff]  ;;  %v4729_v21 = vld [vmem:[#allocation4 + $0x2b4] sm:$0xf0] }
 0x234   :  { %v1645_v52 = vadd.f32 %v1644_v16, %v5365_v51  ;;  %v4665_v16 = vld [vmem:[#allocation4 + $0xb4] sm:$0xf0] }
 0x235   :  { %v1910_v23 = vadd.f32 %v1909_v22, %v1821_v47  ;;  %v4076_v47 = vld [vmem:[#allocation4 + $0xa8] sm:$0xf]  ;;  %v4333_v22 = vor.u32 %v4729_v21, %v4332_v59  ;;  %v4697_v21 = vld [vmem:[#allocation4 + $0x1b4] sm:$0xf0] }
 0x236   :  { %v1734_v53 = vadd.f32 %v1733_v13, %v1645_v52  ;;  %v4460_v52 = vld [vmem:[#allocation4 + $0x3a8] sm:$0xf]  ;;  %v4761_v13 = vld [vmem:[#allocation4 + $0x3b4] sm:$0xf0] }
 0x237   :  { %v3084_v29 = vmax.f32 %v1910_v23, 0.0  ;;  %2480 = vmatpush.bf16.msrb.mxu2 %v4333_v22  ;;  %v4204_v59 = vld [vmem:[#allocation4 + $0x1a8] sm:$0xf] }
 0x23a   :  { %v1822_v50 = vpop.f32.mrf.mxu2  ;;  %v1911_v0 = vpop.f32.mrf.mxu3 }
 0x23b   :  { %v1823_v43 = vadd.f32 %v1822_v50, %v1734_v53  ;;  %v1647_v26 = vpop.f32.mrf.mxu0  ;;  %v1736_v30 = vpop.f32.mrf.mxu1 }
 0x23c   :  { %v1648_v45 = vadd.f32 %v1647_v26, %v5365_v51 }
 0x23d   :  { %v1912_v4 = vadd.f32 %v1911_v0, %v1823_v43  ;;  %1962 = vmatmul.bf16.gmra.mxu0 %v5073_v58  ;;  %v4077_v43 = vor.u32 %v4665_v16, %v4076_v47  ;;  %v4461_v0 = vor.u32 %v4761_v13, %v4460_v52  ;;  %v6259_v13 = vld [vmem:[#allocation10_spill] sm:$0xff] }
 0x23e   :  { %v1737_v36 = vadd.f32 %v1736_v30, %v1648_v45  ;;  %2051 = vmatmul.bf16.gmra.mxu1 %v5076_v60 }
 0x23f   :  { %v3088_v38 = vmax.f32 %v1912_v4, 0.0  ;;  %2140 = vmatmul.bf16.gmra.mxu2 %v6256_v61  ;;  %2229 = vmatmul.bf16.gmra.mxu3 %v6257_v44  ;;  %v4205_v44 = vor.u32 %v4697_v21, %v4204_v59 }
 0x240   :  { %2302 = vmatpush.bf16.msrb.mxu0 %v4077_v43  ;;  %2569 = vmatpush.bf16.msrb.mxu3 %v4461_v0  ;;  %v6260_v0 = vld [vmem:[#allocation11_spill] sm:$0xff] }
 0x241   :  { %v5460_v53 = vpack.c.bf16 %v3088_v38, %v3084_v29  ;;  %2391 = vmatpush.bf16.msrb.mxu1 %v4205_v44 }
 0x242   :  { %v1825_v50 = vpop.f32.mrf.mxu2  ;;  %v1914_v26 = vpop.f32.mrf.mxu3 }
 0x243   :  { %6258 = vst [vmem:[#allocation42_spill] sm:$0xff] %v5460_v53  ;;  %v1826_v23 = vadd.f32 %v1825_v50, %v1737_v36  ;;  %v1649_v45 = vpop.f32.mrf.mxu0  ;;  %v1738_v4 = vpop.f32.mrf.mxu1 }
 0x244   :  { %v1650_v30 = vadd.f32 %v1649_v45, %v5365_v51 }
 0x245   :  { %v1915_v46 = vadd.f32 %v1914_v26, %v1826_v23  ;;  %v6261_v23 = vld [vmem:[#allocation12_spill] sm:$0xff]  ;;  %v6262_v26 = vld [vmem:[#allocation13_spill] sm:$0xff] }
 0x246   :  { %v1739_v11 = vadd.f32 %v1738_v4, %v1650_v30 }
 0x247   :  { %v3092_v50 = vmax.f32 %v1915_v46, 0.0 }
 0x24a   :  { %v1827_v61 = vpop.f32.mrf.mxu2  ;;  %v1916_v38 = vpop.f32.mrf.mxu3 }
 0x24b   :  { %v1828_v29 = vadd.f32 %v1827_v61, %v1739_v11  ;;  %v1652_v47 = vpop.f32.mrf.mxu0  ;;  %v1741_v16 = vpop.f32.mrf.mxu1 }
 0x24c   :  { %v1653_v36 = vadd.f32 %v1652_v47, %v5365_v51 }
 0x24d   :  { %v1917_v52 = vadd.f32 %v1916_v38, %v1828_v29  ;;  %1967 = vmatmul.bf16.gmra.mxu0 %v6259_v13 }
 0x24e   :  { %v1742_v22 = vadd.f32 %v1741_v16, %v1653_v36  ;;  %2056 = vmatmul.bf16.gmra.mxu1 %v6260_v0 }
 0x24f   :  { %v3096_v43 = vmax.f32 %v1917_v52, 0.0  ;;  %2145 = vmatmul.bf16.gmra.mxu2 %v6261_v23  ;;  %2234 = vmatmul.bf16.gmra.mxu3 %v6262_v26 }
 0x251   :  { %v5468_v45 = vpack.c.bf16 %v3096_v43, %v3092_v50  ;;  %v6264_v50 = vld [vmem:[#allocation14_spill] sm:$0xff] }
 0x252   :  { %v1830_v11 = vpop.f32.mrf.mxu2  ;;  %v1919_v44 = vpop.f32.mrf.mxu3 }
 0x253   :  { %6263 = vst [vmem:[#allocation43_spill] sm:$0xff] %v5468_v45  ;;  %v1831_v61 = vadd.f32 %v1830_v11, %v1742_v22  ;;  %v1654_v30 = vpop.f32.mrf.mxu0  ;;  %v1743_v59 = vpop.f32.mrf.mxu1  ;;  %v6265_v11 = vld [vmem:[#allocation15_spill] sm:$0xff]  ;;  %v6266_v45 = vld [vmem:[#allocation16_spill] sm:$0xff] }
 0x254   :  { %v1655_v4 = vadd.f32 %v1654_v30, %v5365_v51  ;;  %v6267_v30 = vld [vmem:[#allocation17_spill] sm:$0xff] }
 0x255   :  { %v1920_v21 = vadd.f32 %v1919_v44, %v1831_v61  ;;  %v4316_v61 = vld [vmem:[#allocation4 + $0x288] sm:$0xf]  ;;  %v4725_v44 = vld [vmem:[#allocation4 + $0x294] sm:$0xf0] }
 0x256   :  { %v1744_v29 = vadd.f32 %v1743_v59, %v1655_v4  ;;  %v4060_v4 = vld [vmem:[#allocation4 + $0x88] sm:$0xf]  ;;  %v4317_v59 = vor.u32 %v4725_v44, %v4316_v61  ;;  %v4693_v44 = vld [vmem:[#allocation4 + $0x194] sm:$0xf0] }
 0x257   :  { %v3100_v43 = vmax.f32 %v1920_v21, 0.0  ;;  %v4188_v61 = vld [vmem:[#allocation4 + $0x188] sm:$0xf] }
 0x258   :  { %2481 = vmatpush.bf16.msrb.mxu2 %v4317_v59  ;;  %v4189_v0 = vor.u32 %v4693_v44, %v4188_v61 }
 0x25a   :  { %v1832_v38 = vpop.f32.mrf.mxu2  ;;  %v1921_v47 = vpop.f32.mrf.mxu3  ;;  %2392 = vmatpush.bf16.msrb.mxu1 %v4189_v0 }
 0x25b   :  { %v1833_v46 = vadd.f32 %v1832_v38, %v1744_v29  ;;  %v1657_v36 = vpop.f32.mrf.mxu0  ;;  %v1746_v52 = vpop.f32.mrf.mxu1  ;;  %v4661_v29 = vld [vmem:[#allocation4 + $0x94] sm:$0xf0]  ;;  %v4444_v38 = vld [vmem:[#allocation4 + $0x388] sm:$0xf] }
 0x25c   :  { %v1658_v16 = vadd.f32 %v1657_v36, %v5365_v51  ;;  %v4757_v36 = vld [vmem:[#allocation4 + $0x394] sm:$0xf0] }
 0x25d   :  { %v1922_v53 = vadd.f32 %v1921_v47, %v1833_v46  ;;  %1972 = vmatmul.bf16.gmra.mxu0 %v6264_v50  ;;  %v4061_v47 = vor.u32 %v4661_v29, %v4060_v4 }
 0x25e   :  { %v1747_v26 = vadd.f32 %v1746_v52, %v1658_v16  ;;  %2061 = vmatmul.bf16.gmra.mxu1 %v6265_v11  ;;  %v4445_v16 = vor.u32 %v4757_v36, %v4444_v38  ;;  %v6269_v36 = vld [vmem:[#allocation18_spill] sm:$0xff] }
 0x25f   :  { %v3104_v22 = vmax.f32 %v1922_v53, 0.0  ;;  %2150 = vmatmul.bf16.gmra.mxu2 %v6266_v45  ;;  %2239 = vmatmul.bf16.gmra.mxu3 %v6267_v30 }
 0x260   :  { %2303 = vmatpush.bf16.msrb.mxu0 %v4061_v47  ;;  %2570 = vmatpush.bf16.msrb.mxu3 %v4445_v16  ;;  %v6270_v16 = vld [vmem:[#allocation19_spill] sm:$0xff] }
 0x261   :  { %v5476_v23 = vpack.c.bf16 %v3104_v22, %v3100_v43 }
 0x262   :  { %v1835_v46 = vpop.f32.mrf.mxu2  ;;  %v1924_v53 = vpop.f32.mrf.mxu3 }
 0x263   :  { %6268 = vst [vmem:[#allocation44_spill] sm:$0xff] %v5476_v23  ;;  %v1836_v21 = vadd.f32 %v1835_v46, %v1747_v26  ;;  %v1659_v52 = vpop.f32.mrf.mxu0  ;;  %v1748_v11 = vpop.f32.mrf.mxu1 }
 0x264   :  { %v1660_v45 = vadd.f32 %v1659_v52, %v5365_v51 }
 0x265   :  { %v1925_v30 = vadd.f32 %v1924_v53, %v1836_v21 }
 0x266   :  { %v1749_v50 = vadd.f32 %v1748_v11, %v1660_v45  ;;  %v6271_v45 = vld [vmem:[#allocation20_spill] sm:$0xff]  ;;  %v6272_v11 = vld [vmem:[#allocation21_spill] sm:$0xff] }
 0x267   :  { %v3108_v46 = vmax.f32 %v1925_v30, 0.0 }
 0x26a   :  { %v1837_v13 = vpop.f32.mrf.mxu2  ;;  %v1926_v22 = vpop.f32.mrf.mxu3 }
 0x26b   :  { %v1838_v43 = vadd.f32 %v1837_v13, %v1749_v50  ;;  %v1662_v4 = vpop.f32.mrf.mxu0  ;;  %v1751_v29 = vpop.f32.mrf.mxu1 }
 0x26c   :  { %v1663_v26 = vadd.f32 %v1662_v4, %v5365_v51 }
 0x26d   :  { %v1927_v38 = vadd.f32 %v1926_v22, %v1838_v43  ;;  %1977 = vmatmul.bf16.gmra.mxu0 %v6269_v36 }
 0x26e   :  { %v1752_v59 = vadd.f32 %v1751_v29, %v1663_v26  ;;  %2066 = vmatmul.bf16.gmra.mxu1 %v6270_v16 }
 0x26f   :  { %v3112_v47 = vmax.f32 %v1927_v38, 0.0  ;;  %2155 = vmatmul.bf16.gmra.mxu2 %v6271_v45  ;;  %2244 = vmatmul.bf16.gmra.mxu3 %v6272_v11 }
 0x271   :  { %v5484_v21 = vpack.c.bf16 %v3112_v47, %v3108_v46  ;;  %v6274_v46 = vld [vmem:[#allocation22_spill] sm:$0xff] }
 0x272   :  { %v1840_v13 = vpop.f32.mrf.mxu2  ;;  %v1929_v50 = vpop.f32.mrf.mxu3 }
 0x273   :  { %6273 = vst [vmem:[#allocation45_spill] sm:$0xff] %v5484_v21  ;;  %v1841_v0 = vadd.f32 %v1840_v13, %v1752_v59  ;;  %v1664_v53 = vpop.f32.mrf.mxu0  ;;  %v1753_v61 = vpop.f32.mrf.mxu1  ;;  %v6275_v13 = vld [vmem:[#allocation23_spill] sm:$0xff]  ;;  %v6276_v21 = vld [vmem:[#allocation24_spill] sm:$0xff] }
 0x274   :  { %v1665_v52 = vadd.f32 %v1664_v53, %v5365_v51  ;;  %v6277_v53 = vld [vmem:[#allocation25_spill] sm:$0xff] }
 0x275   :  { %v1930_v44 = vadd.f32 %v1929_v50, %v1841_v0  ;;  %v4300_v0 = vld [vmem:[#allocation4 + $0x268] sm:$0xf]  ;;  %v4721_v50 = vld [vmem:[#allocation4 + $0x274] sm:$0xf0] }
 0x276   :  { %v1754_v43 = vadd.f32 %v1753_v61, %v1665_v52  ;;  %v4044_v52 = vld [vmem:[#allocation4 + $0x68] sm:$0xf]  ;;  %v4301_v61 = vor.u32 %v4721_v50, %v4300_v0  ;;  %v4689_v50 = vld [vmem:[#allocation4 + $0x174] sm:$0xf0] }
 0x277   :  { %v3116_v47 = vmax.f32 %v1930_v44, 0.0  ;;  %v4172_v0 = vld [vmem:[#allocation4 + $0x168] sm:$0xf] }
 0x278   :  { %2482 = vmatpush.bf16.msrb.mxu2 %v4301_v61  ;;  %v4173_v16 = vor.u32 %v4689_v50, %v4172_v0  ;;  %v6281_v0 = vld [vmem:[#allocation32_spill] sm:$0xff] }
 0x27a   :  { %v1842_v22 = vpop.f32.mrf.mxu2  ;;  %v1931_v4 = vpop.f32.mrf.mxu3  ;;  %2393 = vmatpush.bf16.msrb.mxu1 %v4173_v16 }
 0x27b   :  { %v1843_v30 = vadd.f32 %v1842_v22, %v1754_v43  ;;  %v1667_v26 = vpop.f32.mrf.mxu0  ;;  %v1756_v38 = vpop.f32.mrf.mxu1  ;;  %v4657_v43 = vld [vmem:[#allocation4 + $0x74] sm:$0xf0]  ;;  %v4428_v22 = vld [vmem:[#allocation4 + $0x368] sm:$0xf] }
 0x27c   :  { %v1668_v29 = vadd.f32 %v1667_v26, %v5365_v51  ;;  %v4753_v26 = vld [vmem:[#allocation4 + $0x374] sm:$0xf0] }
 0x27d   :  { %v1932_v23 = vadd.f32 %v1931_v4, %v1843_v30  ;;  %1982 = vmatmul.bf16.gmra.mxu0 %v6274_v46  ;;  %v4045_v4 = vor.u32 %v4657_v43, %v4044_v52 }
 0x27e   :  { %v1757_v11 = vadd.f32 %v1756_v38, %v1668_v29  ;;  %2071 = vmatmul.bf16.gmra.mxu1 %v6275_v13  ;;  %v4429_v29 = vor.u32 %v4753_v26, %v4428_v22 }
 0x27f   :  { %v3120_v59 = vmax.f32 %v1932_v23, 0.0  ;;  %2160 = vmatmul.bf16.gmra.mxu2 %v6276_v21  ;;  %2249 = vmatmul.bf16.gmra.mxu3 %v6277_v53 }
 0x280   :  { %2304 = vmatpush.bf16.msrb.mxu0 %v4045_v4  ;;  %2571 = vmatpush.bf16.msrb.mxu3 %v4429_v29 }
 0x281   :  { %v5492_v45 = vpack.c.bf16 %v3120_v59, %v3116_v47 }
 0x282   :  { %v1845_v30 = vpop.f32.mrf.mxu2  ;;  %v1934_v23 = vpop.f32.mrf.mxu3 }
 0x283   :  { %6278 = vst [vmem:[#allocation46_spill] sm:$0xff] %v5492_v45  ;;  %v1846_v44 = vadd.f32 %v1845_v30, %v1757_v11  ;;  %v1669_v38 = vpop.f32.mrf.mxu0  ;;  %v1758_v13 = vpop.f32.mrf.mxu1 }
 0x284   :  { %v1670_v21 = vadd.f32 %v1669_v38, %v5365_v51 }
 0x285   :  { %v1935_v53 = vadd.f32 %v1934_v23, %v1846_v44 }
 0x286   :  { %v1759_v46 = vadd.f32 %v1758_v13, %v1670_v21  ;;  %v6279_v21 = vld [vmem:[#allocation26_spill] sm:$0xff] }
 0x287   :  { %v3124_v26 = vmax.f32 %v1935_v53, 0.0  ;;  %v5504_v53 = vperm.slane %v6281_v0, 1  ;;  %v4653_v0 = vld [vmem:[#allocation4 + $0x54] sm:$0xf0] }
 0x28a   :  { %v1847_v36 = vpop.f32.mrf.mxu2  ;;  %v1936_v59 = vpop.f32.mrf.mxu3 }
 0x28b   :  { %v1848_v47 = vadd.f32 %v1847_v36, %v1759_v46  ;;  %v1672_v52 = vpop.f32.mrf.mxu0  ;;  %v1761_v43 = vpop.f32.mrf.mxu1 }
 0x28c   :  { %v1673_v11 = vadd.f32 %v1672_v52, %v5365_v51 }
 0x28d   :  { %v1937_v22 = vadd.f32 %v1936_v59, %v1848_v47  ;;  %1987 = vmatmul.bf16.gmra.mxu0 %v5197_v1 }
 0x28e   :  { %v1762_v61 = vadd.f32 %v1761_v43, %v1673_v11  ;;  %2076 = vmatmul.bf16.gmra.mxu1 %v5200_v3 }
 0x28f   :  { %v3128_v30 = vmax.f32 %v1937_v22, 0.0  ;;  %2165 = vmatmul.bf16.gmra.mxu2 %v5206_v31  ;;  %2254 = vmatmul.bf16.gmra.mxu3 %v6279_v21 }
 0x291   :  { %v5500_v13 = vpack.c.bf16 %v3128_v30, %v3124_v26 }
 0x292   :  { %v1850_v36 = vpop.f32.mrf.mxu2  ;;  %v1939_v46 = vpop.f32.mrf.mxu3 }
 0x293   :  { %6280 = vst [vmem:[#allocation47_spill] sm:$0xff] %v5500_v13  ;;  %v1851_v16 = vadd.f32 %v1850_v36, %v1762_v61  ;;  %v1674_v4 = vpop.f32.mrf.mxu0  ;;  %v1763_v44 = vpop.f32.mrf.mxu1  ;;  %v6282_v61 = vld [vmem:[#allocation27_spill] sm:$0xff] }
 0x294   :  { %v1675_v29 = vadd.f32 %v1674_v4, %v5365_v51  ;;  %v6283_v51 = vld [vmem:[#allocation28_spill] sm:$0xff]  ;;  %v4284_v4 = vld [vmem:[#allocation4 + $0x248] sm:$0xf] }
 0x295   :  { %v1940_v23 = vadd.f32 %v1939_v46, %v1851_v16  ;;  %v6284_v16 = vld [vmem:[#allocation29_spill] sm:$0xff]  ;;  %v6285_v46 = vld [vmem:[#allocation30_spill] sm:$0xff] }
 0x296   :  { %v1764_v38 = vadd.f32 %v1763_v44, %v1675_v29  ;;  %v4717_v29 = vld [vmem:[#allocation4 + $0x254] sm:$0xf0]  ;;  %v4028_v44 = vld [vmem:[#allocation4 + $0x48] sm:$0xf] }
 0x297   :  { %v3132_v30 = vmax.f32 %v1940_v23, 0.0 }
 0x29a   :  { %v1852_v50 = vpop.f32.mrf.mxu2  ;;  %v1941_v59 = vpop.f32.mrf.mxu3 }
 0x29b   :  { %v1853_v47 = vadd.f32 %v1852_v50, %v1764_v38  ;;  %v1953_v52 = vpop.f32.mrf.mxu0  ;;  %v2042_v43 = vpop.f32.mrf.mxu1  ;;  %v4285_v38 = vor.u32 %v4717_v29, %v4284_v4  ;;  %v4412_v50 = vld [vmem:[#allocation4 + $0x348] sm:$0xf]  ;;  %v4685_v29 = vld [vmem:[#allocation4 + $0x154] sm:$0xf0] }
 0x29c   :  { %v1954_v11 = vadd.f32 %v1953_v52, %v5504_v53  ;;  %v4749_v52 = vld [vmem:[#allocation4 + $0x354] sm:$0xf0]  ;;  %v4156_v4 = vld [vmem:[#allocation4 + $0x148] sm:$0xf] }
 0x29d   :  { %v1942_v22 = vadd.f32 %v1941_v59, %v1853_v47  ;;  %1992 = vmatmul.bf16.gmra.mxu0 %v6282_v61  ;;  %v4029_v59 = vor.u32 %v4653_v0, %v4028_v44  ;;  %2483 = vmatpush.bf16.msrb.mxu2 %v4285_v38  ;;  %v4157_v61 = vor.u32 %v4685_v29, %v4156_v4 }
 0x29e   :  { %v2043_v26 = vadd.f32 %v2042_v43, %v1954_v11  ;;  %2081 = vmatmul.bf16.gmra.mxu1 %v6283_v51  ;;  %v4413_v11 = vor.u32 %v4749_v52, %v4412_v50 }
 0x29f   :  { %v3136_v36 = vmax.f32 %v1942_v22, 0.0  ;;  %2170 = vmatmul.bf16.gmra.mxu2 %v6284_v16  ;;  %2259 = vmatmul.bf16.gmra.mxu3 %v6285_v46 }
 0x2a0   :  { %2305 = vmatpush.bf16.msrb.mxu0 %v4029_v59  ;;  %2572 = vmatpush.bf16.msrb.mxu3 %v4413_v11 }
 0x2a1   :  { %v5511_v13 = vpack.c.bf16 %v3136_v36, %v3132_v30  ;;  %2394 = vmatpush.bf16.msrb.mxu1 %v4157_v61 }
 0x2a2   :  { %v2131_v47 = vpop.f32.mrf.mxu2  ;;  %v2220_v43 = vpop.f32.mrf.mxu3 }
 0x2a3   :  { %6286 = vst [vmem:[#allocation32_spill] sm:$0xff] %v5511_v13  ;;  %v2132_v23 = vadd.f32 %v2131_v47, %v2043_v26  ;;  %v1955_v22 = vpop.f32.mrf.mxu0  ;;  %v2044_v16 = vpop.f32.mrf.mxu1 }
 0x2a4   :  { %v1956_v45 = vadd.f32 %v1955_v22, %v5504_v53 }
 0x2a5   :  { %v2221_v46 = vadd.f32 %v2220_v43, %v2132_v23 }
 0x2a6   :  { %v2045_v51 = vadd.f32 %v2044_v16, %v1956_v45 }
 0x2a7   :  { %v3013_v52 = vmax.f32 %v2221_v46, 0.0 }
 0x2aa   :  { %v2133_v21 = vpop.f32.mrf.mxu2  ;;  %v2222_v36 = vpop.f32.mrf.mxu3 }
 0x2ab   :  { %v2134_v30 = vadd.f32 %v2133_v21, %v2045_v51  ;;  %v1958_v44 = vpop.f32.mrf.mxu0  ;;  %v2047_v0 = vpop.f32.mrf.mxu1 }
 0x2ac   :  { %v1959_v26 = vadd.f32 %v1958_v44, %v5504_v53 }
 0x2ad   :  { %v2223_v50 = vadd.f32 %v2222_v36, %v2134_v30  ;;  %1997 = vmatmul.bf16.gmra.mxu0 %v5237_v20 }
 0x2ae   :  { %v2048_v38 = vadd.f32 %v2047_v0, %v1959_v26  ;;  %2086 = vmatmul.bf16.gmra.mxu1 %v5240_v37 }
 0x2af   :  { %v3017_v47 = vmax.f32 %v2223_v50, 0.0  ;;  %2175 = vmatmul.bf16.gmra.mxu2 %v5246_v2  ;;  %2264 = vmatmul.bf16.gmra.mxu3 %v5250_v62 }
 0x2b1   :  { %v5519_v45 = vpack.c.bf16 %v3017_v47, %v3013_v52  ;;  %v4268_v52 = vld [vmem:[#allocation4 + $0x228] sm:$0xf]  ;;  %v4713_v47 = vld [vmem:[#allocation4 + $0x234] sm:$0xf0] }
 0x2b2   :  { %v2136_v21 = vpop.f32.mrf.mxu2  ;;  %v2225_v51 = vpop.f32.mrf.mxu3 }
 0x2b3   :  { %6287 = vst [vmem:[#allocation48_spill] sm:$0xff] %v5519_v45  ;;  %v2137_v61 = vadd.f32 %v2136_v21, %v2048_v38  ;;  %v1960_v16 = vpop.f32.mrf.mxu0  ;;  %v2049_v11 = vpop.f32.mrf.mxu1  ;;  %v6288_v38 = vld [vmem:[#allocation31_spill] sm:$0xff]  ;;  %v4012_v21 = vld [vmem:[#allocation4 + $0x28] sm:$0xf] }
 0x2b4   :  { %v1961_v59 = vadd.f32 %v1960_v16, %v5504_v53  ;;  %v4396_v16 = vld [vmem:[#allocation4 + $0x328] sm:$0xf] }
 0x2b5   :  { %v2226_v23 = vadd.f32 %v2225_v51, %v2137_v61  ;;  %v4269_v61 = vor.u32 %v4713_v47, %v4268_v52  ;;  %v4649_v51 = vld [vmem:[#allocation4 + $0x34] sm:$0xf0]  ;;  %v4140_v52 = vld [vmem:[#allocation4 + $0x128] sm:$0xf] }
 0x2b6   :  { %v2050_v43 = vadd.f32 %v2049_v11, %v1961_v59  ;;  %v4745_v59 = vld [vmem:[#allocation4 + $0x334] sm:$0xf0] }
 0x2b7   :  { %v3021_v0 = vmax.f32 %v2226_v23, 0.0  ;;  %2484 = vmatpush.bf16.msrb.mxu2 %v4269_v61  ;;  %v4681_v47 = vld [vmem:[#allocation4 + $0x134] sm:$0xf0] }
 0x2b8   :  { %v4141_v45 = vor.u32 %v4681_v47, %v4140_v52 }
 0x2ba   :  { %v2138_v22 = vpop.f32.mrf.mxu2  ;;  %v2227_v4 = vpop.f32.mrf.mxu3  ;;  %2395 = vmatpush.bf16.msrb.mxu1 %v4141_v45 }
 0x2bb   :  { %v2139_v46 = vadd.f32 %v2138_v22, %v2050_v43  ;;  %v1963_v29 = vpop.f32.mrf.mxu0  ;;  %v2052_v36 = vpop.f32.mrf.mxu1  ;;  %v4013_v22 = vor.u32 %v4649_v51, %v4012_v21 }
 0x2bc   :  { %v1964_v30 = vadd.f32 %v1963_v29, %v5504_v53 }
 0x2bd   :  { %v2228_v44 = vadd.f32 %v2227_v4, %v2139_v46  ;;  %2002 = vmatmul.bf16.gmra.mxu0 %v5257_v15  ;;  %v4397_v46 = vor.u32 %v4745_v59, %v4396_v16 }
 0x2be   :  { %v2053_v26 = vadd.f32 %v2052_v36, %v1964_v30  ;;  %2091 = vmatmul.bf16.gmra.mxu1 %v5260_v17  ;;  %2306 = vmatpush.bf16.msrb.mxu0 %v4013_v22 }
 0x2bf   :  { %v3025_v50 = vmax.f32 %v2228_v44, 0.0  ;;  %2180 = vmatmul.bf16.gmra.mxu2 %v5266_v27  ;;  %2269 = vmatmul.bf16.gmra.mxu3 %v6288_v38 }
 0x2c0   :  { %2573 = vmatpush.bf16.msrb.mxu3 %v4397_v46 }
 0x2c1   :  { %v5527_v11 = vpack.c.bf16 %v3025_v50, %v3021_v0 }
 0x2c2   :  { %v2141_v43 = vpop.f32.mrf.mxu2  ;;  %v2230_v4 = vpop.f32.mrf.mxu3 }
 0x2c3   :  { %6289 = vst [vmem:[#allocation49_spill] sm:$0xff] %v5527_v11  ;;  %v2142_v23 = vadd.f32 %v2141_v43, %v2053_v26  ;;  %v1965_v29 = vpop.f32.mrf.mxu0  ;;  %v2054_v36 = vpop.f32.mrf.mxu1 }
 0x2c4   :  { %v1966_v30 = vadd.f32 %v1965_v29, %v5504_v53 }
 0x2c5   :  { %v2231_v44 = vadd.f32 %v2230_v4, %v2142_v23 }
 0x2c6   :  { %v2055_v13 = vadd.f32 %v2054_v36, %v1966_v30 }
 0x2c7   :  { %v3029_v59 = vmax.f32 %v2231_v44, 0.0 }
 0x2ca   :  { %v2143_v38 = vpop.f32.mrf.mxu2  ;;  %v2232_v50 = vpop.f32.mrf.mxu3 }
 0x2cb   :  { %v2144_v0 = vadd.f32 %v2143_v38, %v2055_v13  ;;  %v1968_v21 = vpop.f32.mrf.mxu0  ;;  %v2057_v51 = vpop.f32.mrf.mxu1 }
 0x2cc   :  { %v1969_v26 = vadd.f32 %v1968_v21, %v5504_v53 }
 0x2cd   :  { %v2233_v16 = vadd.f32 %v2232_v50, %v2144_v0  ;;  %2007 = vmatmul.bf16.gmra.mxu0 %v5277_v41 }
 0x2ce   :  { %v2058_v61 = vadd.f32 %v2057_v51, %v1969_v26  ;;  %2096 = vmatmul.bf16.gmra.mxu1 %v5280_v14 }
 0x2cf   :  { %v3033_v43 = vmax.f32 %v2233_v16, 0.0  ;;  %2185 = vmatmul.bf16.gmra.mxu2 %v5286_v19  ;;  %2274 = vmatmul.bf16.gmra.mxu3 %v5290_v63 }
 0x2d1   :  { %v5535_v22 = vpack.c.bf16 %v3033_v43, %v3029_v59  ;;  %v4709_v59 = vld [vmem:[#allocation4 + $0x214] sm:$0xf0]  ;;  %v3996_v43 = vld [vmem:[#allocation4 + $0x8] sm:$0xf] }
 0x2d2   :  { %v2146_v13 = vpop.f32.mrf.mxu2  ;;  %v2235_v38 = vpop.f32.mrf.mxu3 }
 0x2d3   :  { %6290 = vst [vmem:[#allocation50_spill] sm:$0xff] %v5535_v22  ;;  %v2147_v45 = vadd.f32 %v2146_v13, %v2058_v61  ;;  %v1970_v46 = vpop.f32.mrf.mxu0  ;;  %v2059_v4 = vpop.f32.mrf.mxu1  ;;  %v4252_v61 = vld [vmem:[#allocation4 + $0x208] sm:$0xf] }
 0x2d4   :  { %v1971_v23 = vadd.f32 %v1970_v46, %v5504_v53  ;;  %v4253_v13 = vor.u32 %v4709_v59, %v4252_v61  ;;  %v4741_v46 = vld [vmem:[#allocation4 + $0x314] sm:$0xf0]  ;;  %v4124_v61 = vld [vmem:[#allocation4 + $0x108] sm:$0xf] }
 0x2d5   :  { %v2236_v29 = vadd.f32 %v2235_v38, %v2147_v45  ;;  %v4645_v45 = vld [vmem:[#allocation4 + $0x14] sm:$0xf0]  ;;  %v4380_v38 = vld [vmem:[#allocation4 + $0x308] sm:$0xf] }
 0x2d6   :  { %v2060_v30 = vadd.f32 %v2059_v4, %v1971_v23  ;;  %2485 = vmatpush.bf16.msrb.mxu2 %v4253_v13  ;;  %v4677_v59 = vld [vmem:[#allocation4 + $0x114] sm:$0xf0] }
 0x2d7   :  { %v3037_v51 = vmax.f32 %v2236_v29, 0.0  ;;  %v4125_v22 = vor.u32 %v4677_v59, %v4124_v61 }
 0x2d9   :  { %2396 = vmatpush.bf16.msrb.mxu1 %v4125_v22 }
 0x2da   :  { %v2148_v36 = vpop.f32.mrf.mxu2  ;;  %v2237_v52 = vpop.f32.mrf.mxu3 }
 0x2db   :  { %v2149_v44 = vadd.f32 %v2148_v36, %v2060_v30  ;;  %v1973_v47 = vpop.f32.mrf.mxu0  ;;  %v2062_v50 = vpop.f32.mrf.mxu1  ;;  %v3997_v30 = vor.u32 %v4645_v45, %v3996_v43  ;;  %v4381_v36 = vor.u32 %v4741_v46, %v4380_v38 }
 0x2dc   :  { %v1974_v0 = vadd.f32 %v1973_v47, %v5504_v53 }
 0x2dd   :  { %v2238_v21 = vadd.f32 %v2237_v52, %v2149_v44  ;;  %2012 = vmatmul.bf16.gmra.mxu0 %v5297_v49  ;;  %2574 = vmatpush.bf16.msrb.mxu3 %v4381_v36 }
 0x2de   :  { %v2063_v26 = vadd.f32 %v2062_v50, %v1974_v0  ;;  %2101 = vmatmul.bf16.gmra.mxu1 %v5300_v57  ;;  %2307 = vmatpush.bf16.msrb.mxu0 %v3997_v30 }
 0x2df   :  { %v3041_v16 = vmax.f32 %v2238_v21, 0.0  ;;  %2190 = vmatmul.bf16.gmra.mxu2 %v5306_v48  ;;  %2279 = vmatmul.bf16.gmra.mxu3 %v5310_v33 }
 0x2e1   :  { %v5543_v23 = vpack.c.bf16 %v3041_v16, %v3037_v51 }
 0x2e2   :  { %v2151_v4 = vpop.f32.mrf.mxu2  ;;  %v2240_v44 = vpop.f32.mrf.mxu3 }
 0x2e3   :  { %6291 = vst [vmem:[#allocation51_spill] sm:$0xff] %v5543_v23  ;;  %v2152_v29 = vadd.f32 %v2151_v4, %v2063_v26  ;;  %v1975_v52 = vpop.f32.mrf.mxu0  ;;  %v2064_v0 = vpop.f32.mrf.mxu1 }
 0x2e4   :  { %v1976_v47 = vadd.f32 %v1975_v52, %v5504_v53 }
 0x2e5   :  { %v2241_v50 = vadd.f32 %v2240_v44, %v2152_v29 }
 0x2e6   :  { %v2065_v21 = vadd.f32 %v2064_v0, %v1976_v47 }
 0x2e7   :  { %v3045_v46 = vmax.f32 %v2241_v50, 0.0 }
 0x2ea   :  { %v2153_v11 = vpop.f32.mrf.mxu2  ;;  %v2242_v16 = vpop.f32.mrf.mxu3 }
 0x2eb   :  { %v2154_v51 = vadd.f32 %v2153_v11, %v2065_v21  ;;  %v1978_v43 = vpop.f32.mrf.mxu0  ;;  %v2067_v45 = vpop.f32.mrf.mxu1 }
 0x2ec   :  { %v1979_v26 = vadd.f32 %v1978_v43, %v5504_v53 }
 0x2ed   :  { %v2243_v38 = vadd.f32 %v2242_v16, %v2154_v51  ;;  %2017 = vmatmul.bf16.gmra.mxu0 %v5317_v6 }
 0x2ee   :  { %v2068_v13 = vadd.f32 %v2067_v45, %v1979_v26  ;;  %2106 = vmatmul.bf16.gmra.mxu1 %v5320_v35 }
 0x2ef   :  { %v3049_v4 = vmax.f32 %v2243_v38, 0.0  ;;  %2195 = vmatmul.bf16.gmra.mxu2 %v5326_v39  ;;  %2284 = vmatmul.bf16.gmra.mxu3 %v5330_v54 }
 0x2f1   :  { %v5551_v30 = vpack.c.bf16 %v3049_v4, %v3045_v46  ;;  %v4366_v46 = vld [vmem:[#allocation4 + $0x2f8] sm:$0xf0]  ;;  %v4671_v4 = vld [vmem:[#allocation4 + $0xec] sm:$0xf] }
 0x2f2   :  { %v2156_v11 = vpop.f32.mrf.mxu2  ;;  %v2245_v36 = vpop.f32.mrf.mxu3 }
 0x2f3   :  { %6292 = vst [vmem:[#allocation52_spill] sm:$0xff] %v5551_v30  ;;  %v2157_v22 = vadd.f32 %v2156_v11, %v2068_v13  ;;  %v1980_v29 = vpop.f32.mrf.mxu0  ;;  %v2069_v52 = vpop.f32.mrf.mxu1  ;;  %v4735_v13 = vld [vmem:[#allocation4 + $0x2ec] sm:$0xf] }
 0x2f4   :  { %v1981_v44 = vadd.f32 %v1980_v29, %v5504_v53  ;;  %v4369_v11 = vor.u32 %v4735_v13, %v4366_v46  ;;  %v4494_v29 = vld [vmem:[#allocation4 + $0x3f8] sm:$0xf0]  ;;  %v4703_v13 = vld [vmem:[#allocation4 + $0x1ec] sm:$0xf] }
 0x2f5   :  { %v2246_v47 = vadd.f32 %v2245_v36, %v2157_v22  ;;  %v4110_v22 = vld [vmem:[#allocation4 + $0xf8] sm:$0xf0]  ;;  %v4767_v36 = vld [vmem:[#allocation4 + $0x3ec] sm:$0xf] }
 0x2f6   :  { %v2070_v0 = vadd.f32 %v2069_v52, %v1981_v44  ;;  %2834 = vmatpush.bf16.msra.mxu2 %v4369_v11  ;;  %v4238_v46 = vld [vmem:[#allocation4 + $0x1f8] sm:$0xf0] }
 0x2f7   :  { %v3053_v45 = vmax.f32 %v2246_v47, 0.0  ;;  %v4241_v30 = vor.u32 %v4703_v13, %v4238_v46 }
 0x2f9   :  { %2745 = vmatpush.bf16.msra.mxu1 %v4241_v30 }
 0x2fa   :  { %v2158_v21 = vpop.f32.mrf.mxu2  ;;  %v2247_v61 = vpop.f32.mrf.mxu3 }
 0x2fb   :  { %v2159_v50 = vadd.f32 %v2158_v21, %v2070_v0  ;;  %v1983_v59 = vpop.f32.mrf.mxu0  ;;  %v2072_v16 = vpop.f32.mrf.mxu1  ;;  %v4113_v0 = vor.u32 %v4671_v4, %v4110_v22  ;;  %v4497_v21 = vor.u32 %v4767_v36, %v4494_v29 }
 0x2fc   :  { %v1984_v51 = vadd.f32 %v1983_v59, %v5504_v53 }
 0x2fd   :  { %v2248_v43 = vadd.f32 %v2247_v61, %v2159_v50  ;;  %2022 = vmatmul.bf16.gmra.mxu0 %v5337_v34  ;;  %2923 = vmatpush.bf16.msra.mxu3 %v4497_v21 }
 0x2fe   :  { %v2073_v26 = vadd.f32 %v2072_v16, %v1984_v51  ;;  %2111 = vmatmul.bf16.gmra.mxu1 %v5340_v12  ;;  %2656 = vmatpush.bf16.msra.mxu0 %v4113_v0 }
 0x2ff   :  { %v3057_v38 = vmax.f32 %v2248_v43, 0.0  ;;  %2200 = vmatmul.bf16.gmra.mxu2 %v5346_v5  ;;  %2289 = vmatmul.bf16.gmra.mxu3 %v5350_v8 }
 0x301   :  { %v5559_v44 = vpack.c.bf16 %v3057_v38, %v3053_v45 }
 0x302   :  { %v2161_v52 = vpop.f32.mrf.mxu2  ;;  %v2250_v50 = vpop.f32.mrf.mxu3 }
 0x303   :  { %6293 = vst [vmem:[#allocation53_spill] sm:$0xff] %v5559_v44  ;;  %v2162_v47 = vadd.f32 %v2161_v52, %v2073_v26  ;;  %v1985_v61 = vpop.f32.mrf.mxu0  ;;  %v2074_v51 = vpop.f32.mrf.mxu1 }
 0x304   :  { %v1986_v59 = vadd.f32 %v1985_v61, %v5504_v53 }
 0x305   :  { %v2251_v16 = vadd.f32 %v2250_v50, %v2162_v47 }
 0x306   :  { %v2075_v43 = vadd.f32 %v2074_v51, %v1986_v59 }
 0x307   :  { %v3061_v29 = vmax.f32 %v2251_v16, 0.0 }
 0x30a   :  { %v2163_v23 = vpop.f32.mrf.mxu2  ;;  %v2252_v38 = vpop.f32.mrf.mxu3 }
 0x30b   :  { %v2164_v45 = vadd.f32 %v2163_v23, %v2075_v43  ;;  %v1988_v4 = vpop.f32.mrf.mxu0  ;;  %v2077_v22 = vpop.f32.mrf.mxu1 }
 0x30c   :  { %v1989_v26 = vadd.f32 %v1988_v4, %v5504_v53 }
 0x30d   :  { %v2253_v36 = vadd.f32 %v2252_v38, %v2164_v45  ;;  %2027 = vmatmul.bf16.gmra.mxu0 %v5362_v32 }
 0x30e   :  { %v2078_v11 = vadd.f32 %v2077_v22, %v1989_v26  ;;  %2116 = vmatmul.bf16.gmra.mxu1 %v5368_v10 }
 0x30f   :  { %v3065_v52 = vmax.f32 %v2253_v36, 0.0  ;;  %2205 = vmatmul.bf16.gmra.mxu2 %v5375_v18  ;;  %2294 = vmatmul.bf16.gmra.mxu3 %v5379_v28 }
 0x311   :  { %v5567_v0 = vpack.c.bf16 %v3065_v52, %v3061_v29  ;;  %v4350_v29 = vld [vmem:[#allocation4 + $0x2d8] sm:$0xf0]  ;;  %v4667_v52 = vld [vmem:[#allocation4 + $0xcc] sm:$0xf] }
 0x312   :  { %v2166_v23 = vpop.f32.mrf.mxu2  ;;  %v2255_v21 = vpop.f32.mrf.mxu3 }
 0x313   :  { %6294 = vst [vmem:[#allocation54_spill] sm:$0xff] %v5567_v0  ;;  %v2167_v30 = vadd.f32 %v2166_v23, %v2078_v11  ;;  %v1990_v47 = vpop.f32.mrf.mxu0  ;;  %v2079_v61 = vpop.f32.mrf.mxu1  ;;  %v4731_v11 = vld [vmem:[#allocation4 + $0x2cc] sm:$0xf] }
 0x314   :  { %v1991_v50 = vadd.f32 %v1990_v47, %v5504_v53  ;;  %v4353_v23 = vor.u32 %v4731_v11, %v4350_v29  ;;  %v4478_v47 = vld [vmem:[#allocation4 + $0x3d8] sm:$0xf0]  ;;  %v4699_v11 = vld [vmem:[#allocation4 + $0x1cc] sm:$0xf] }
 0x315   :  { %v2256_v59 = vadd.f32 %v2255_v21, %v2167_v30  ;;  %v4094_v30 = vld [vmem:[#allocation4 + $0xd8] sm:$0xf0]  ;;  %v4763_v21 = vld [vmem:[#allocation4 + $0x3cc] sm:$0xf] }
 0x316   :  { %v2080_v51 = vadd.f32 %v2079_v61, %v1991_v50  ;;  %2835 = vmatpush.bf16.msra.mxu2 %v4353_v23  ;;  %v4222_v29 = vld [vmem:[#allocation4 + $0x1d8] sm:$0xf0] }
 0x317   :  { %v3069_v22 = vmax.f32 %v2256_v59, 0.0  ;;  %v4225_v0 = vor.u32 %v4699_v11, %v4222_v29 }
 0x319   :  { %2746 = vmatpush.bf16.msra.mxu1 %v4225_v0 }
 0x31a   :  { %v2168_v43 = vpop.f32.mrf.mxu2  ;;  %v2257_v13 = vpop.f32.mrf.mxu3 }
 0x31b   :  { %v2169_v16 = vadd.f32 %v2168_v43, %v2080_v51  ;;  %v1993_v46 = vpop.f32.mrf.mxu0  ;;  %v2082_v38 = vpop.f32.mrf.mxu1  ;;  %v4097_v51 = vor.u32 %v4667_v52, %v4094_v30  ;;  %v4481_v43 = vor.u32 %v4763_v21, %v4478_v47 }
 0x31c   :  { %v1994_v45 = vadd.f32 %v1993_v46, %v5504_v53 }
 0x31d   :  { %v2258_v4 = vadd.f32 %v2257_v13, %v2169_v16  ;;  %2308 = vmatmul.bf16.vlgmr.msrb.gmra.mxu0 %v5021_v40  ;;  %2924 = vmatpush.bf16.msra.mxu3 %v4481_v43 }
 0x31e   :  { %v2083_v26 = vadd.f32 %v2082_v38, %v1994_v45  ;;  %2397 = vmatmul.bf16.vlgmr.msrb.gmra.mxu1 %v5024_v42  ;;  %2657 = vmatpush.bf16.msra.mxu0 %v4097_v51 }
 0x31f   :  { %v3073_v36 = vmax.f32 %v2258_v4, 0.0  ;;  %2486 = vmatmul.bf16.vlgmr.msrb.gmra.mxu2 %v5030_v55  ;;  %2575 = vmatmul.bf16.vlgmr.msrb.gmra.mxu3 %v5034_v56 }
 0x321   :  { %v5575_v50 = vpack.c.bf16 %v3073_v36, %v3069_v22 }
 0x322   :  { %v2171_v61 = vpop.f32.mrf.mxu2  ;;  %v2260_v16 = vpop.f32.mrf.mxu3 }
 0x323   :  { %6295 = vst [vmem:[#allocation55_spill] sm:$0xff] %v5575_v50  ;;  %v2172_v59 = vadd.f32 %v2171_v61, %v2083_v26  ;;  %v1995_v13 = vpop.f32.mrf.mxu0  ;;  %v2084_v45 = vpop.f32.mrf.mxu1 }
 0x324   :  { %v1996_v46 = vadd.f32 %v1995_v13, %v5504_v53 }
 0x325   :  { %v2261_v38 = vadd.f32 %v2260_v16, %v2172_v59 }
 0x326   :  { %v2085_v4 = vadd.f32 %v2084_v45, %v1996_v46 }
 0x327   :  { %v3077_v47 = vmax.f32 %v2261_v38, 0.0 }
 0x32a   :  { %v2173_v44 = vpop.f32.mrf.mxu2  ;;  %v2262_v36 = vpop.f32.mrf.mxu3 }
 0x32b   :  { %v2174_v22 = vadd.f32 %v2173_v44, %v2085_v4  ;;  %v1998_v52 = vpop.f32.mrf.mxu0  ;;  %v2087_v30 = vpop.f32.mrf.mxu1 }
 0x32c   :  { %v1999_v26 = vadd.f32 %v1998_v52, %v5504_v53 }
 0x32d   :  { %v2263_v21 = vadd.f32 %v2262_v36, %v2174_v22  ;;  %2313 = vmatmul.bf16.gmra.mxu0 %v5047_v7 }
 0x32e   :  { %v2088_v23 = vadd.f32 %v2087_v30, %v1999_v26  ;;  %2402 = vmatmul.bf16.gmra.mxu1 %v5050_v9 }
 0x32f   :  { %v3081_v61 = vmax.f32 %v2263_v21, 0.0  ;;  %2491 = vmatmul.bf16.gmra.mxu2 %v5056_v24  ;;  %2580 = vmatmul.bf16.gmra.mxu3 %v5060_v25 }
 0x331   :  { %v5583_v51 = vpack.c.bf16 %v3081_v61, %v3077_v47  ;;  %v6298_v47 = vld [vmem:[#allocation9_spill] sm:$0xff] }
 0x332   :  { %v2176_v44 = vpop.f32.mrf.mxu2  ;;  %v2265_v43 = vpop.f32.mrf.mxu3  ;;  %v4727_v61 = vld [vmem:[#allocation4 + $0x2ac] sm:$0xf] }
 0x333   :  { %6296 = vst [vmem:[#allocation56_spill] sm:$0xff] %v5583_v51  ;;  %v2177_v0 = vadd.f32 %v2176_v44, %v2088_v23  ;;  %v2000_v59 = vpop.f32.mrf.mxu0  ;;  %v2089_v13 = vpop.f32.mrf.mxu1  ;;  %v6297_v23 = vld [vmem:[#allocation8_spill] sm:$0xff]  ;;  %v4334_v44 = vld [vmem:[#allocation4 + $0x2b8] sm:$0xf0] }
 0x334   :  { %v2001_v16 = vadd.f32 %v2000_v59, %v5504_v53  ;;  %v4078_v59 = vld [vmem:[#allocation4 + $0xb8] sm:$0xf0] }
 0x335   :  { %v2266_v46 = vadd.f32 %v2265_v43, %v2177_v0  ;;  %v4663_v0 = vld [vmem:[#allocation4 + $0xac] sm:$0xf]  ;;  %v4337_v43 = vor.u32 %v4727_v61, %v4334_v44  ;;  %v4206_v44 = vld [vmem:[#allocation4 + $0x1b8] sm:$0xf0] }
 0x336   :  { %v2090_v45 = vadd.f32 %v2089_v13, %v2001_v16  ;;  %v4759_v16 = vld [vmem:[#allocation4 + $0x3ac] sm:$0xf]  ;;  %v4462_v13 = vld [vmem:[#allocation4 + $0x3b8] sm:$0xf0] }
 0x337   :  { %v3085_v30 = vmax.f32 %v2266_v46, 0.0  ;;  %2836 = vmatpush.bf16.msra.mxu2 %v4337_v43  ;;  %v4695_v61 = vld [vmem:[#allocation4 + $0x1ac] sm:$0xf] }
 0x33a   :  { %v2178_v4 = vpop.f32.mrf.mxu2  ;;  %v2267_v11 = vpop.f32.mrf.mxu3 }
 0x33b   :  { %v2179_v38 = vadd.f32 %v2178_v4, %v2090_v45  ;;  %v2003_v29 = vpop.f32.mrf.mxu0  ;;  %v2092_v36 = vpop.f32.mrf.mxu1 }
 0x33c   :  { %v2004_v22 = vadd.f32 %v2003_v29, %v5504_v53 }
 0x33d   :  { %v2268_v52 = vadd.f32 %v2267_v11, %v2179_v38  ;;  %2318 = vmatmul.bf16.gmra.mxu0 %v5073_v58  ;;  %v4081_v38 = vor.u32 %v4663_v0, %v4078_v59  ;;  %v4465_v11 = vor.u32 %v4759_v16, %v4462_v13  ;;  %v6300_v13 = vld [vmem:[#allocation10_spill] sm:$0xff] }
 0x33e   :  { %v2093_v26 = vadd.f32 %v2092_v36, %v2004_v22  ;;  %2407 = vmatmul.bf16.gmra.mxu1 %v5076_v60 }
 0x33f   :  { %v3089_v21 = vmax.f32 %v2268_v52, 0.0  ;;  %2496 = vmatmul.bf16.gmra.mxu2 %v6297_v23  ;;  %2585 = vmatmul.bf16.gmra.mxu3 %v6298_v47  ;;  %v4209_v47 = vor.u32 %v4695_v61, %v4206_v44 }
 0x340   :  { %2658 = vmatpush.bf16.msra.mxu0 %v4081_v38  ;;  %2925 = vmatpush.bf16.msra.mxu3 %v4465_v11  ;;  %v6301_v11 = vld [vmem:[#allocation11_spill] sm:$0xff] }
 0x341   :  { %v5591_v45 = vpack.c.bf16 %v3089_v21, %v3085_v30  ;;  %2747 = vmatpush.bf16.msra.mxu1 %v4209_v47 }
 0x342   :  { %v2181_v4 = vpop.f32.mrf.mxu2  ;;  %v2270_v29 = vpop.f32.mrf.mxu3 }
 0x343   :  { %6299 = vst [vmem:[#allocation57_spill] sm:$0xff] %v5591_v45  ;;  %v2182_v46 = vadd.f32 %v2181_v4, %v2093_v26  ;;  %v2005_v22 = vpop.f32.mrf.mxu0  ;;  %v2094_v52 = vpop.f32.mrf.mxu1 }
 0x344   :  { %v2006_v36 = vadd.f32 %v2005_v22, %v5504_v53 }
 0x345   :  { %v2271_v51 = vadd.f32 %v2270_v29, %v2182_v46  ;;  %v6302_v46 = vld [vmem:[#allocation12_spill] sm:$0xff]  ;;  %v6303_v29 = vld [vmem:[#allocation13_spill] sm:$0xff] }
 0x346   :  { %v2095_v50 = vadd.f32 %v2094_v52, %v2006_v36 }
 0x347   :  { %v3093_v4 = vmax.f32 %v2271_v51, 0.0 }
 0x34a   :  { %v2183_v23 = vpop.f32.mrf.mxu2  ;;  %v2272_v21 = vpop.f32.mrf.mxu3 }
 0x34b   :  { %v2184_v30 = vadd.f32 %v2183_v23, %v2095_v50  ;;  %v2008_v0 = vpop.f32.mrf.mxu0  ;;  %v2097_v59 = vpop.f32.mrf.mxu1 }
 0x34c   :  { %v2009_v26 = vadd.f32 %v2008_v0, %v5504_v53 }
 0x34d   :  { %v2273_v16 = vadd.f32 %v2272_v21, %v2184_v30  ;;  %2323 = vmatmul.bf16.gmra.mxu0 %v6300_v13 }
 0x34e   :  { %v2098_v43 = vadd.f32 %v2097_v59, %v2009_v26  ;;  %2412 = vmatmul.bf16.gmra.mxu1 %v6301_v11 }
 0x34f   :  { %v3097_v38 = vmax.f32 %v2273_v16, 0.0  ;;  %2501 = vmatmul.bf16.gmra.mxu2 %v6302_v46  ;;  %2590 = vmatmul.bf16.gmra.mxu3 %v6303_v29 }
 0x351   :  { %v5599_v22 = vpack.c.bf16 %v3097_v38, %v3093_v4  ;;  %v6305_v4 = vld [vmem:[#allocation14_spill] sm:$0xff] }
 0x352   :  { %v2186_v50 = vpop.f32.mrf.mxu2  ;;  %v2275_v47 = vpop.f32.mrf.mxu3 }
 0x353   :  { %6304 = vst [vmem:[#allocation58_spill] sm:$0xff] %v5599_v22  ;;  %v2187_v23 = vadd.f32 %v2186_v50, %v2098_v43  ;;  %v2010_v36 = vpop.f32.mrf.mxu0  ;;  %v2099_v61 = vpop.f32.mrf.mxu1  ;;  %v6306_v50 = vld [vmem:[#allocation15_spill] sm:$0xff]  ;;  %v6307_v22 = vld [vmem:[#allocation16_spill] sm:$0xff] }
 0x354   :  { %v2011_v52 = vadd.f32 %v2010_v36, %v5504_v53  ;;  %v6308_v36 = vld [vmem:[#allocation17_spill] sm:$0xff] }
 0x355   :  { %v2276_v44 = vadd.f32 %v2275_v47, %v2187_v23  ;;  %v4723_v23 = vld [vmem:[#allocation4 + $0x28c] sm:$0xf]  ;;  %v4318_v47 = vld [vmem:[#allocation4 + $0x298] sm:$0xf0] }
 0x356   :  { %v2100_v30 = vadd.f32 %v2099_v61, %v2011_v52  ;;  %v4659_v52 = vld [vmem:[#allocation4 + $0x8c] sm:$0xf]  ;;  %v4321_v61 = vor.u32 %v4723_v23, %v4318_v47  ;;  %v4190_v47 = vld [vmem:[#allocation4 + $0x198] sm:$0xf0] }
 0x357   :  { %v3101_v38 = vmax.f32 %v2276_v44, 0.0  ;;  %v4691_v23 = vld [vmem:[#allocation4 + $0x18c] sm:$0xf] }
 0x358   :  { %2837 = vmatpush.bf16.msra.mxu2 %v4321_v61  ;;  %v4193_v11 = vor.u32 %v4691_v23, %v4190_v47 }
 0x35a   :  { %v2188_v21 = vpop.f32.mrf.mxu2  ;;  %v2277_v0 = vpop.f32.mrf.mxu3  ;;  %2748 = vmatpush.bf16.msra.mxu1 %v4193_v11 }
 0x35b   :  { %v2189_v51 = vadd.f32 %v2188_v21, %v2100_v30  ;;  %v2013_v26 = vpop.f32.mrf.mxu0  ;;  %v2102_v16 = vpop.f32.mrf.mxu1  ;;  %v4062_v30 = vld [vmem:[#allocation4 + $0x98] sm:$0xf0]  ;;  %v4755_v21 = vld [vmem:[#allocation4 + $0x38c] sm:$0xf] }
 0x35c   :  { %v2014_v59 = vadd.f32 %v2013_v26, %v5504_v53  ;;  %v4446_v26 = vld [vmem:[#allocation4 + $0x398] sm:$0xf0] }
 0x35d   :  { %v2278_v45 = vadd.f32 %v2277_v0, %v2189_v51  ;;  %2328 = vmatmul.bf16.gmra.mxu0 %v6305_v4  ;;  %v4065_v0 = vor.u32 %v4659_v52, %v4062_v30 }
 0x35e   :  { %v2103_v29 = vadd.f32 %v2102_v16, %v2014_v59  ;;  %2417 = vmatmul.bf16.gmra.mxu1 %v6306_v50  ;;  %v4449_v59 = vor.u32 %v4755_v21, %v4446_v26  ;;  %v6310_v26 = vld [vmem:[#allocation18_spill] sm:$0xff] }
 0x35f   :  { %v3105_v43 = vmax.f32 %v2278_v45, 0.0  ;;  %2506 = vmatmul.bf16.gmra.mxu2 %v6307_v22  ;;  %2595 = vmatmul.bf16.gmra.mxu3 %v6308_v36 }
 0x360   :  { %2659 = vmatpush.bf16.msra.mxu0 %v4065_v0  ;;  %2926 = vmatpush.bf16.msra.mxu3 %v4449_v59  ;;  %v6311_v59 = vld [vmem:[#allocation19_spill] sm:$0xff] }
 0x361   :  { %v5607_v46 = vpack.c.bf16 %v3105_v43, %v3101_v38 }
 0x362   :  { %v2191_v51 = vpop.f32.mrf.mxu2  ;;  %v2280_v45 = vpop.f32.mrf.mxu3 }
 0x363   :  { %6309 = vst [vmem:[#allocation59_spill] sm:$0xff] %v5607_v46  ;;  %v2192_v44 = vadd.f32 %v2191_v51, %v2103_v29  ;;  %v2015_v16 = vpop.f32.mrf.mxu0  ;;  %v2104_v50 = vpop.f32.mrf.mxu1 }
 0x364   :  { %v2016_v22 = vadd.f32 %v2015_v16, %v5504_v53 }
 0x365   :  { %v2281_v36 = vadd.f32 %v2280_v45, %v2192_v44 }
 0x366   :  { %v2105_v4 = vadd.f32 %v2104_v50, %v2016_v22  ;;  %v6312_v22 = vld [vmem:[#allocation20_spill] sm:$0xff]  ;;  %v6313_v50 = vld [vmem:[#allocation21_spill] sm:$0xff] }
 0x367   :  { %v3109_v51 = vmax.f32 %v2281_v36, 0.0 }
 0x36a   :  { %v2193_v13 = vpop.f32.mrf.mxu2  ;;  %v2282_v43 = vpop.f32.mrf.mxu3 }
 0x36b   :  { %v2194_v38 = vadd.f32 %v2193_v13, %v2105_v4  ;;  %v2018_v52 = vpop.f32.mrf.mxu0  ;;  %v2107_v30 = vpop.f32.mrf.mxu1 }
 0x36c   :  { %v2019_v29 = vadd.f32 %v2018_v52, %v5504_v53 }
 0x36d   :  { %v2283_v21 = vadd.f32 %v2282_v43, %v2194_v38  ;;  %2333 = vmatmul.bf16.gmra.mxu0 %v6310_v26 }
 0x36e   :  { %v2108_v61 = vadd.f32 %v2107_v30, %v2019_v29  ;;  %2422 = vmatmul.bf16.gmra.mxu1 %v6311_v59 }
 0x36f   :  { %v3113_v0 = vmax.f32 %v2283_v21, 0.0  ;;  %2511 = vmatmul.bf16.gmra.mxu2 %v6312_v22  ;;  %2600 = vmatmul.bf16.gmra.mxu3 %v6313_v50 }
 0x371   :  { %v5615_v44 = vpack.c.bf16 %v3113_v0, %v3109_v51  ;;  %v6315_v51 = vld [vmem:[#allocation22_spill] sm:$0xff] }
 0x372   :  { %v2196_v13 = vpop.f32.mrf.mxu2  ;;  %v2285_v4 = vpop.f32.mrf.mxu3 }
 0x373   :  { %6314 = vst [vmem:[#allocation60_spill] sm:$0xff] %v5615_v44  ;;  %v2197_v11 = vadd.f32 %v2196_v13, %v2108_v61  ;;  %v2020_v45 = vpop.f32.mrf.mxu0  ;;  %v2109_v23 = vpop.f32.mrf.mxu1  ;;  %v6316_v13 = vld [vmem:[#allocation23_spill] sm:$0xff]  ;;  %v6317_v44 = vld [vmem:[#allocation24_spill] sm:$0xff] }
 0x374   :  { %v2021_v16 = vadd.f32 %v2020_v45, %v5504_v53  ;;  %v6318_v45 = vld [vmem:[#allocation25_spill] sm:$0xff] }
 0x375   :  { %v2286_v47 = vadd.f32 %v2285_v4, %v2197_v11  ;;  %v4719_v11 = vld [vmem:[#allocation4 + $0x26c] sm:$0xf]  ;;  %v4302_v4 = vld [vmem:[#allocation4 + $0x278] sm:$0xf0] }
 0x376   :  { %v2110_v38 = vadd.f32 %v2109_v23, %v2021_v16  ;;  %v4655_v16 = vld [vmem:[#allocation4 + $0x6c] sm:$0xf]  ;;  %v4305_v23 = vor.u32 %v4719_v11, %v4302_v4  ;;  %v4174_v4 = vld [vmem:[#allocation4 + $0x178] sm:$0xf0] }
 0x377   :  { %v3117_v0 = vmax.f32 %v2286_v47, 0.0  ;;  %v4687_v11 = vld [vmem:[#allocation4 + $0x16c] sm:$0xf] }
 0x378   :  { %2838 = vmatpush.bf16.msra.mxu2 %v4305_v23  ;;  %v4177_v59 = vor.u32 %v4687_v11, %v4174_v4 }
 0x37a   :  { %v2198_v43 = vpop.f32.mrf.mxu2  ;;  %v2287_v52 = vpop.f32.mrf.mxu3  ;;  %2749 = vmatpush.bf16.msra.mxu1 %v4177_v59 }
 0x37b   :  { %v2199_v36 = vadd.f32 %v2198_v43, %v2110_v38  ;;  %v2023_v29 = vpop.f32.mrf.mxu0  ;;  %v2112_v21 = vpop.f32.mrf.mxu1  ;;  %v4046_v38 = vld [vmem:[#allocation4 + $0x78] sm:$0xf0]  ;;  %v4751_v43 = vld [vmem:[#allocation4 + $0x36c] sm:$0xf] }
 0x37c   :  { %v2024_v30 = vadd.f32 %v2023_v29, %v5504_v53  ;;  %v4430_v29 = vld [vmem:[#allocation4 + $0x378] sm:$0xf0] }
 0x37d   :  { %v2288_v46 = vadd.f32 %v2287_v52, %v2199_v36  ;;  %2338 = vmatmul.bf16.gmra.mxu0 %v6315_v51  ;;  %v4049_v52 = vor.u32 %v4655_v16, %v4046_v38 }
 0x37e   :  { %v2113_v50 = vadd.f32 %v2112_v21, %v2024_v30  ;;  %2427 = vmatmul.bf16.gmra.mxu1 %v6316_v13  ;;  %v4433_v30 = vor.u32 %v4751_v43, %v4430_v29 }
 0x37f   :  { %v3121_v61 = vmax.f32 %v2288_v46, 0.0  ;;  %2516 = vmatmul.bf16.gmra.mxu2 %v6317_v44  ;;  %2605 = vmatmul.bf16.gmra.mxu3 %v6318_v45 }
 0x380   :  { %2660 = vmatpush.bf16.msra.mxu0 %v4049_v52  ;;  %2927 = vmatpush.bf16.msra.mxu3 %v4433_v30 }
 0x381   :  { %v5623_v22 = vpack.c.bf16 %v3121_v61, %v3117_v0 }
 0x382   :  { %v2201_v36 = vpop.f32.mrf.mxu2  ;;  %v2290_v46 = vpop.f32.mrf.mxu3 }
 0x383   :  { %6319 = vst [vmem:[#allocation61_spill] sm:$0xff] %v5623_v22  ;;  %v2202_v47 = vadd.f32 %v2201_v36, %v2113_v50  ;;  %v2025_v21 = vpop.f32.mrf.mxu0  ;;  %v2114_v13 = vpop.f32.mrf.mxu1 }
 0x384   :  { %v2026_v44 = vadd.f32 %v2025_v21, %v5504_v53 }
 0x385   :  { %v2291_v45 = vadd.f32 %v2290_v46, %v2202_v47 }
 0x386   :  { %v2115_v51 = vadd.f32 %v2114_v13, %v2026_v44  ;;  %v6320_v44 = vld [vmem:[#allocation26_spill] sm:$0xff] }
 0x387   :  { %v3125_v29 = vmax.f32 %v2291_v45, 0.0  ;;  %v5637_v45 = vld [vmem:[%s6168_s4] sm:$0xf] }
 0x388   :  { %6322 = vst [vmem:[#allocation63_spill] sm:$0xff] %v5637_v45  ;;  %v5640_v11 = vperm.slane %v5637_v45, 2 }
 0x38a   :  { %v2203_v26 = vpop.f32.mrf.mxu2  ;;  %v2292_v61 = vpop.f32.mrf.mxu3 }
 0x38b   :  { %v2204_v0 = vadd.f32 %v2203_v26, %v2115_v51  ;;  %v2028_v16 = vpop.f32.mrf.mxu0  ;;  %v2117_v38 = vpop.f32.mrf.mxu1 }
 0x38c   :  { %v2029_v50 = vadd.f32 %v2028_v16, %v5504_v53 }
 0x38d   :  { %v2293_v43 = vadd.f32 %v2292_v61, %v2204_v0  ;;  %2343 = vmatmul.bf16.gmra.mxu0 %v5197_v1 }
 0x38e   :  { %v2118_v23 = vadd.f32 %v2117_v38, %v2029_v50  ;;  %2432 = vmatmul.bf16.gmra.mxu1 %v5200_v3 }
 0x38f   :  { %v3129_v36 = vmax.f32 %v2293_v43, 0.0  ;;  %2521 = vmatmul.bf16.gmra.mxu2 %v5206_v31  ;;  %2610 = vmatmul.bf16.gmra.mxu3 %v6320_v44 }
 0x391   :  { %v5631_v13 = vpack.c.bf16 %v3129_v36, %v3125_v29 }
 0x392   :  { %v2206_v26 = vpop.f32.mrf.mxu2  ;;  %v2295_v51 = vpop.f32.mrf.mxu3 }
 0x393   :  { %6321 = vst [vmem:[#allocation62_spill] sm:$0xff] %v5631_v13  ;;  %v2207_v59 = vadd.f32 %v2206_v26, %v2118_v23  ;;  %v2030_v52 = vpop.f32.mrf.mxu0  ;;  %v2119_v47 = vpop.f32.mrf.mxu1  ;;  %v6323_v23 = vld [vmem:[#allocation27_spill] sm:$0xff]  ;;  %v6324_v26 = vld [vmem:[#allocation28_spill] sm:$0xff]  ;;  %v4747_v13 = vld [vmem:[#allocation4 + $0x34c] sm:$0xf] }
 0x394   :  { %v2031_v30 = vadd.f32 %v2030_v52, %v5504_v53  ;;  %v4715_v52 = vld [vmem:[#allocation4 + $0x24c] sm:$0xf] }
 0x395   :  { %v2296_v46 = vadd.f32 %v2295_v51, %v2207_v59  ;;  %v6325_v59 = vld [vmem:[#allocation29_spill] sm:$0xff]  ;;  %v6326_v51 = vld [vmem:[#allocation30_spill] sm:$0xff] }
 0x396   :  { %v2120_v21 = vadd.f32 %v2119_v47, %v2031_v30  ;;  %v4286_v30 = vld [vmem:[#allocation4 + $0x258] sm:$0xf0]  ;;  %v4651_v47 = vld [vmem:[#allocation4 + $0x4c] sm:$0xf] }
 0x397   :  { %v3133_v29 = vmax.f32 %v2296_v46, 0.0 }
 0x39a   :  { %v2208_v4 = vpop.f32.mrf.mxu2  ;;  %v2297_v61 = vpop.f32.mrf.mxu3 }
 0x39b   :  { %v2209_v0 = vadd.f32 %v2208_v4, %v2120_v21  ;;  %v2309_v16 = vpop.f32.mrf.mxu0  ;;  %v2398_v38 = vpop.f32.mrf.mxu1  ;;  %v4289_v21 = vor.u32 %v4715_v52, %v4286_v30  ;;  %v4030_v4 = vld [vmem:[#allocation4 + $0x58] sm:$0xf0]  ;;  %v4683_v52 = vld [vmem:[#allocation4 + $0x14c] sm:$0xf] }
 0x39c   :  { %v2310_v50 = vadd.f32 %v2309_v16, %v5640_v11  ;;  %v4414_v16 = vld [vmem:[#allocation4 + $0x358] sm:$0xf0] }
 0x39d   :  { %v2298_v43 = vadd.f32 %v2297_v61, %v2209_v0  ;;  %2348 = vmatmul.bf16.gmra.mxu0 %v6323_v23  ;;  %v4033_v61 = vor.u32 %v4651_v47, %v4030_v4  ;;  %2839 = vmatpush.bf16.msra.mxu2 %v4289_v21  ;;  %v4158_v30 = vld [vmem:[#allocation4 + $0x158] sm:$0xf0] }
 0x39e   :  { %v2399_v53 = vadd.f32 %v2398_v38, %v2310_v50  ;;  %2437 = vmatmul.bf16.gmra.mxu1 %v6324_v26  ;;  %v4417_v50 = vor.u32 %v4747_v13, %v4414_v16  ;;  %v4161_v45 = vor.u32 %v4683_v52, %v4158_v30 }
 0x39f   :  { %v3137_v36 = vmax.f32 %v2298_v43, 0.0  ;;  %2526 = vmatmul.bf16.gmra.mxu2 %v6325_v59  ;;  %2615 = vmatmul.bf16.gmra.mxu3 %v6326_v51 }
 0x3a0   :  { %2661 = vmatpush.bf16.msra.mxu0 %v4033_v61  ;;  %2928 = vmatpush.bf16.msra.mxu3 %v4417_v50 }
 0x3a1   :  { %v5647_v22 = vpack.c.bf16 %v3137_v36, %v3133_v29  ;;  %2750 = vmatpush.bf16.msra.mxu1 %v4161_v45 }
 0x3a2   :  { %v2487_v0 = vpop.f32.mrf.mxu2  ;;  %v2576_v38 = vpop.f32.mrf.mxu3 }
 0x3a3   :  { %6327 = vst [vmem:[#allocation64_spill] sm:$0xff] %v5647_v22  ;;  %v2488_v46 = vadd.f32 %v2487_v0, %v2399_v53  ;;  %v2311_v43 = vpop.f32.mrf.mxu0  ;;  %v2400_v26 = vpop.f32.mrf.mxu1 }
 0x3a4   :  { %v2312_v59 = vadd.f32 %v2311_v43, %v5640_v11 }
 0x3a5   :  { %v2577_v51 = vadd.f32 %v2576_v38, %v2488_v46 }
 0x3a6   :  { %v2401_v23 = vadd.f32 %v2400_v26, %v2312_v59 }
 0x3a7   :  { %v3014_v16 = vmax.f32 %v2577_v51, 0.0 }
 0x3aa   :  { %v2489_v44 = vpop.f32.mrf.mxu2  ;;  %v2578_v36 = vpop.f32.mrf.mxu3 }
 0x3ab   :  { %v2490_v29 = vadd.f32 %v2489_v44, %v2401_v23  ;;  %v2314_v47 = vpop.f32.mrf.mxu0  ;;  %v2403_v53 = vpop.f32.mrf.mxu1 }
 0x3ac   :  { %v2315_v13 = vadd.f32 %v2314_v47, %v5640_v11 }
 0x3ad   :  { %v2579_v4 = vadd.f32 %v2578_v36, %v2490_v29  ;;  %2353 = vmatmul.bf16.gmra.mxu0 %v5237_v20 }
 0x3ae   :  { %v2404_v21 = vadd.f32 %v2403_v53, %v2315_v13  ;;  %2442 = vmatmul.bf16.gmra.mxu1 %v5240_v37 }
 0x3af   :  { %v3018_v0 = vmax.f32 %v2579_v4, 0.0  ;;  %2531 = vmatmul.bf16.gmra.mxu2 %v5246_v2  ;;  %2620 = vmatmul.bf16.gmra.mxu3 %v5250_v62 }
 0x3b1   :  { %v5655_v26 = vpack.c.bf16 %v3018_v0, %v3014_v16  ;;  %v4711_v16 = vld [vmem:[#allocation4 + $0x22c] sm:$0xf]  ;;  %v4270_v0 = vld [vmem:[#allocation4 + $0x238] sm:$0xf0] }
 0x3b2   :  { %v2492_v44 = vpop.f32.mrf.mxu2  ;;  %v2581_v23 = vpop.f32.mrf.mxu3 }
 0x3b3   :  { %6328 = vst [vmem:[#allocation65_spill] sm:$0xff] %v5655_v26  ;;  %v2493_v45 = vadd.f32 %v2492_v44, %v2404_v21  ;;  %v2316_v59 = vpop.f32.mrf.mxu0  ;;  %v2405_v50 = vpop.f32.mrf.mxu1  ;;  %v6329_v21 = vld [vmem:[#allocation31_spill] sm:$0xff]  ;;  %v4647_v44 = vld [vmem:[#allocation4 + $0x2c] sm:$0xf] }
 0x3b4   :  { %v2317_v61 = vadd.f32 %v2316_v59, %v5640_v11  ;;  %v4743_v59 = vld [vmem:[#allocation4 + $0x32c] sm:$0xf] }
 0x3b5   :  { %v2582_v46 = vadd.f32 %v2581_v23, %v2493_v45  ;;  %v4273_v45 = vor.u32 %v4711_v16, %v4270_v0  ;;  %v4014_v23 = vld [vmem:[#allocation4 + $0x38] sm:$0xf0]  ;;  %v4679_v16 = vld [vmem:[#allocation4 + $0x12c] sm:$0xf] }
 0x3b6   :  { %v2406_v38 = vadd.f32 %v2405_v50, %v2317_v61  ;;  %v4398_v61 = vld [vmem:[#allocation4 + $0x338] sm:$0xf0] }
 0x3b7   :  { %v3022_v53 = vmax.f32 %v2582_v46, 0.0  ;;  %2840 = vmatpush.bf16.msra.mxu2 %v4273_v45  ;;  %v4142_v0 = vld [vmem:[#allocation4 + $0x138] sm:$0xf0] }
 0x3b8   :  { %v4145_v26 = vor.u32 %v4679_v16, %v4142_v0 }
 0x3ba   :  { %v2494_v43 = vpop.f32.mrf.mxu2  ;;  %v2583_v52 = vpop.f32.mrf.mxu3  ;;  %2751 = vmatpush.bf16.msra.mxu1 %v4145_v26 }
 0x3bb   :  { %v2495_v51 = vadd.f32 %v2494_v43, %v2406_v38  ;;  %v2319_v30 = vpop.f32.mrf.mxu0  ;;  %v2408_v36 = vpop.f32.mrf.mxu1  ;;  %v4017_v43 = vor.u32 %v4647_v44, %v4014_v23 }
 0x3bc   :  { %v2320_v29 = vadd.f32 %v2319_v30, %v5640_v11 }
 0x3bd   :  { %v2584_v47 = vadd.f32 %v2583_v52, %v2495_v51  ;;  %2358 = vmatmul.bf16.gmra.mxu0 %v5257_v15  ;;  %v4401_v51 = vor.u32 %v4743_v59, %v4398_v61 }
 0x3be   :  { %v2409_v13 = vadd.f32 %v2408_v36, %v2320_v29  ;;  %2447 = vmatmul.bf16.gmra.mxu1 %v5260_v17  ;;  %2662 = vmatpush.bf16.msra.mxu0 %v4017_v43 }
 0x3bf   :  { %v3026_v4 = vmax.f32 %v2584_v47, 0.0  ;;  %2536 = vmatmul.bf16.gmra.mxu2 %v5266_v27  ;;  %2625 = vmatmul.bf16.gmra.mxu3 %v6329_v21 }
 0x3c0   :  { %2929 = vmatpush.bf16.msra.mxu3 %v4401_v51 }
 0x3c1   :  { %v5663_v50 = vpack.c.bf16 %v3026_v4, %v3022_v53 }
 0x3c2   :  { %v2497_v38 = vpop.f32.mrf.mxu2  ;;  %v2586_v52 = vpop.f32.mrf.mxu3 }
 0x3c3   :  { %6330 = vst [vmem:[#allocation66_spill] sm:$0xff] %v5663_v50  ;;  %v2498_v46 = vadd.f32 %v2497_v38, %v2409_v13  ;;  %v2321_v30 = vpop.f32.mrf.mxu0  ;;  %v2410_v36 = vpop.f32.mrf.mxu1 }
 0x3c4   :  { %v2322_v29 = vadd.f32 %v2321_v30, %v5640_v11 }
 0x3c5   :  { %v2587_v47 = vadd.f32 %v2586_v52, %v2498_v46 }
 0x3c6   :  { %v2411_v22 = vadd.f32 %v2410_v36, %v2322_v29 }
 0x3c7   :  { %v3030_v61 = vmax.f32 %v2587_v47, 0.0 }
 0x3ca   :  { %v2499_v21 = vpop.f32.mrf.mxu2  ;;  %v2588_v4 = vpop.f32.mrf.mxu3 }
 0x3cb   :  { %v2500_v53 = vadd.f32 %v2499_v21, %v2411_v22  ;;  %v2324_v44 = vpop.f32.mrf.mxu0  ;;  %v2413_v23 = vpop.f32.mrf.mxu1 }
 0x3cc   :  { %v2325_v13 = vadd.f32 %v2324_v44, %v5640_v11 }
 0x3cd   :  { %v2589_v59 = vadd.f32 %v2588_v4, %v2500_v53  ;;  %2363 = vmatmul.bf16.gmra.mxu0 %v5277_v41 }
 0x3ce   :  { %v2414_v45 = vadd.f32 %v2413_v23, %v2325_v13  ;;  %2452 = vmatmul.bf16.gmra.mxu1 %v5280_v14 }
 0x3cf   :  { %v3034_v38 = vmax.f32 %v2589_v59, 0.0  ;;  %2541 = vmatmul.bf16.gmra.mxu2 %v5286_v19  ;;  %2630 = vmatmul.bf16.gmra.mxu3 %v5290_v63 }
 0x3d1   :  { %v5671_v43 = vpack.c.bf16 %v3034_v38, %v3030_v61  ;;  %v4254_v61 = vld [vmem:[#allocation4 + $0x218] sm:$0xf0]  ;;  %v4643_v38 = vld [vmem:[#allocation4 + $0xc] sm:$0xf] }
 0x3d2   :  { %v2502_v22 = vpop.f32.mrf.mxu2  ;;  %v2591_v21 = vpop.f32.mrf.mxu3 }
 0x3d3   :  { %6331 = vst [vmem:[#allocation67_spill] sm:$0xff] %v5671_v43  ;;  %v2503_v26 = vadd.f32 %v2502_v22, %v2414_v45  ;;  %v2326_v51 = vpop.f32.mrf.mxu0  ;;  %v2415_v52 = vpop.f32.mrf.mxu1  ;;  %v4707_v45 = vld [vmem:[#allocation4 + $0x20c] sm:$0xf] }
 0x3d4   :  { %v2327_v46 = vadd.f32 %v2326_v51, %v5640_v11  ;;  %v4257_v22 = vor.u32 %v4707_v45, %v4254_v61  ;;  %v4382_v51 = vld [vmem:[#allocation4 + $0x318] sm:$0xf0]  ;;  %v4675_v45 = vld [vmem:[#allocation4 + $0x10c] sm:$0xf] }
 0x3d5   :  { %v2592_v30 = vadd.f32 %v2591_v21, %v2503_v26  ;;  %v3998_v26 = vld [vmem:[#allocation4 + $0x18] sm:$0xf0]  ;;  %v4739_v21 = vld [vmem:[#allocation4 + $0x30c] sm:$0xf] }
 0x3d6   :  { %v2416_v29 = vadd.f32 %v2415_v52, %v2327_v46  ;;  %2841 = vmatpush.bf16.msra.mxu2 %v4257_v22  ;;  %v4126_v61 = vld [vmem:[#allocation4 + $0x118] sm:$0xf0] }
 0x3d7   :  { %v3038_v23 = vmax.f32 %v2592_v30, 0.0  ;;  %v4129_v43 = vor.u32 %v4675_v45, %v4126_v61 }
 0x3d9   :  { %2752 = vmatpush.bf16.msra.mxu1 %v4129_v43 }
 0x3da   :  { %v2504_v36 = vpop.f32.mrf.mxu2  ;;  %v2593_v16 = vpop.f32.mrf.mxu3 }
 0x3db   :  { %v2505_v47 = vadd.f32 %v2504_v36, %v2416_v29  ;;  %v2329_v0 = vpop.f32.mrf.mxu0  ;;  %v2418_v4 = vpop.f32.mrf.mxu1  ;;  %v4001_v29 = vor.u32 %v4643_v38, %v3998_v26  ;;  %v4385_v36 = vor.u32 %v4739_v21, %v4382_v51 }
 0x3dc   :  { %v2330_v53 = vadd.f32 %v2329_v0, %v5640_v11 }
 0x3dd   :  { %v2594_v44 = vadd.f32 %v2593_v16, %v2505_v47  ;;  %2368 = vmatmul.bf16.gmra.mxu0 %v5297_v49  ;;  %2930 = vmatpush.bf16.msra.mxu3 %v4385_v36 }
 0x3de   :  { %v2419_v13 = vadd.f32 %v2418_v4, %v2330_v53  ;;  %2457 = vmatmul.bf16.gmra.mxu1 %v5300_v57  ;;  %2663 = vmatpush.bf16.msra.mxu0 %v4001_v29 }
 0x3df   :  { %v3042_v59 = vmax.f32 %v2594_v44, 0.0  ;;  %2546 = vmatmul.bf16.gmra.mxu2 %v5306_v48  ;;  %2635 = vmatmul.bf16.gmra.mxu3 %v5310_v33 }
 0x3e1   :  { %v5679_v46 = vpack.c.bf16 %v3042_v59, %v3038_v23 }
 0x3e2   :  { %v2507_v52 = vpop.f32.mrf.mxu2  ;;  %v2596_v47 = vpop.f32.mrf.mxu3 }
 0x3e3   :  { %v2508_v30 = vadd.f32 %v2507_v52, %v2419_v13  ;;  %v2331_v16 = vpop.f32.mrf.mxu0  ;;  %v2420_v53 = vpop.f32.mrf.mxu1 }
 0x3e4   :  { %v2332_v0 = vadd.f32 %v2331_v16, %v5640_v11 }
 0x3e5   :  { %v2597_v4 = vadd.f32 %v2596_v47, %v2508_v30 }
 0x3e6   :  { %v2421_v44 = vadd.f32 %v2420_v53, %v2332_v0 }
 0x3e7   :  { %v3046_v51 = vmax.f32 %v2597_v4, 0.0 }
 0x3ea   :  { %v2509_v50 = vpop.f32.mrf.mxu2  ;;  %v2598_v59 = vpop.f32.mrf.mxu3 }
 0x3eb   :  { %v2510_v23 = vadd.f32 %v2509_v50, %v2421_v44  ;;  %v2334_v38 = vpop.f32.mrf.mxu0  ;;  %v2423_v26 = vpop.f32.mrf.mxu1 }
 0x3ec   :  { %v2335_v13 = vadd.f32 %v2334_v38, %v5640_v11 }
 0x3ed   :  { %v2599_v21 = vadd.f32 %v2598_v59, %v2510_v23  ;;  %2373 = vmatmul.bf16.gmra.mxu0 %v5317_v6 }
 0x3ee   :  { %v2424_v22 = vadd.f32 %v2423_v26, %v2335_v13  ;;  %2462 = vmatmul.bf16.gmra.mxu1 %v5320_v35 }
 0x3ef   :  { %v3050_v52 = vmax.f32 %v2599_v21, 0.0  ;;  %2551 = vmatmul.bf16.gmra.mxu2 %v5326_v39  ;;  %2640 = vmatmul.bf16.gmra.mxu3 %v5330_v54 }
 0x3f1   :  { %v5687_v29 = vpack.c.bf16 %v3050_v52, %v3046_v51  ;;  %v4777_v51 = vld [vmem:[%s6169_s5 + $0x38] sm:$0xff] }
 0x3f2   :  { %v2512_v50 = vpop.f32.mrf.mxu2  ;;  %v2601_v36 = vpop.f32.mrf.mxu3  ;;  %v4801_v52 = vld [vmem:[%s6169_s5 + $0xf8] sm:$0xff]  ;;  %3464 = vmatpush.bf16.msrb.mxu0 %v4777_v51 }
 0x3f3   :  { %v2513_v43 = vadd.f32 %v2512_v50, %v2424_v22  ;;  %v2336_v30 = vpop.f32.mrf.mxu0  ;;  %v2425_v16 = vpop.f32.mrf.mxu1  ;;  %v4793_v22 = vld [vmem:[%s6169_s5 + $0xb8] sm:$0xff]  ;;  %3731 = vmatpush.bf16.msrb.mxu3 %v4801_v52 }
 0x3f4   :  { %v2337_v47 = vadd.f32 %v2336_v30, %v5640_v11  ;;  %3642 = vmatpush.bf16.msrb.mxu2 %v4793_v22 }
 0x3f5   :  { %v2602_v0 = vadd.f32 %v2601_v36, %v2513_v43 }
 0x3f6   :  { %v2426_v53 = vadd.f32 %v2425_v16, %v2337_v47 }
 0x3f7   :  { %v3054_v26 = vmax.f32 %v2602_v0, 0.0 }
 0x3fa   :  { %v2514_v44 = vpop.f32.mrf.mxu2  ;;  %v2603_v45 = vpop.f32.mrf.mxu3 }
 0x3fb   :  { %v2515_v4 = vadd.f32 %v2514_v44, %v2426_v53  ;;  %v2339_v61 = vpop.f32.mrf.mxu0  ;;  %v2428_v59 = vpop.f32.mrf.mxu1 }
 0x3fc   :  { %v2340_v23 = vadd.f32 %v2339_v61, %v5640_v11 }
 0x3fd   :  { %v2604_v38 = vadd.f32 %v2603_v45, %v2515_v4  ;;  %2378 = vmatmul.bf16.gmra.mxu0 %v5337_v34  ;;  %v4785_v4 = vld [vmem:[%s6169_s5 + $0x78] sm:$0xff] }
 0x3fe   :  { %v2429_v13 = vadd.f32 %v2428_v59, %v2340_v23  ;;  %2467 = vmatmul.bf16.gmra.mxu1 %v5340_v12 }
 0x3ff   :  { %v3058_v21 = vmax.f32 %v2604_v38, 0.0  ;;  %2556 = vmatmul.bf16.gmra.mxu2 %v5346_v5  ;;  %2645 = vmatmul.bf16.gmra.mxu3 %v5350_v8 }
 0x400   :  { %3553 = vmatpush.bf16.msrb.mxu1 %v4785_v4 }
 0x401   :  { %v5704_v50 = vpack.c.bf16 %v3058_v21, %v3054_v26 }
 0x402   :  { %v2517_v43 = vpop.f32.mrf.mxu2  ;;  %v2606_v30 = vpop.f32.mrf.mxu3 }
 0x403   :  { %v2518_v36 = vadd.f32 %v2517_v43, %v2429_v13  ;;  %v2341_v47 = vpop.f32.mrf.mxu0  ;;  %v2430_v0 = vpop.f32.mrf.mxu1 }
 0x404   :  { %v2342_v16 = vadd.f32 %v2341_v47, %v5640_v11 }
 0x405   :  { %v2607_v53 = vadd.f32 %v2606_v30, %v2518_v36 }
 0x406   :  { %v2431_v44 = vadd.f32 %v2430_v0, %v2342_v16 }
 0x407   :  { %v3062_v22 = vmax.f32 %v2607_v53, 0.0 }
 0x40a   :  { %v2519_v45 = vpop.f32.mrf.mxu2  ;;  %v2608_v23 = vpop.f32.mrf.mxu3 }
 0x40b   :  { %v2520_v61 = vadd.f32 %v2519_v45, %v2431_v44  ;;  %v2344_v59 = vpop.f32.mrf.mxu0  ;;  %v2433_v13 = vpop.f32.mrf.mxu1 }
 0x40c   :  { %v2345_v38 = vadd.f32 %v2344_v59, %v5640_v11 }
 0x40d   :  { %v2609_v26 = vadd.f32 %v2608_v23, %v2520_v61  ;;  %2383 = vmatmul.bf16.gmra.mxu0 %v5362_v32 }
 0x40e   :  { %v2434_v21 = vadd.f32 %v2433_v13, %v2345_v38  ;;  %2472 = vmatmul.bf16.gmra.mxu1 %v5368_v10 }
 0x40f   :  { %v3066_v51 = vmax.f32 %v2609_v26, 0.0  ;;  %2561 = vmatmul.bf16.gmra.mxu2 %v5375_v18  ;;  %2650 = vmatmul.bf16.gmra.mxu3 %v5379_v28 }
 0x411   :  { %v5715_v52 = vpack.c.bf16 %v3066_v51, %v3062_v22  ;;  %v4792_v51 = vld [vmem:[%s6169_s5 + $0xb0] sm:$0xff] }
 0x412   :  { %v2522_v43 = vpop.f32.mrf.mxu2  ;;  %v2611_v30 = vpop.f32.mrf.mxu3  ;;  %3643 = vmatpush.bf16.msrb.mxu2 %v4792_v51 }
 0x413   :  { %v2523_v36 = vadd.f32 %v2522_v43, %v2434_v21  ;;  %v2346_v47 = vpop.f32.mrf.mxu0  ;;  %v2435_v0 = vpop.f32.mrf.mxu1  ;;  %v4776_v43 = vld [vmem:[%s6169_s5 + $0x30] sm:$0xff] }
 0x414   :  { %v2347_v16 = vadd.f32 %v2346_v47, %v5640_v11  ;;  %3465 = vmatpush.bf16.msrb.mxu0 %v4776_v43 }
 0x415   :  { %v2612_v44 = vadd.f32 %v2611_v30, %v2523_v36 }
 0x416   :  { %v2436_v4 = vadd.f32 %v2435_v0, %v2347_v16 }
 0x417   :  { %v3070_v22 = vmax.f32 %v2612_v44, 0.0 }
 0x41a   :  { %v2524_v45 = vpop.f32.mrf.mxu2  ;;  %v2613_v61 = vpop.f32.mrf.mxu3 }
 0x41b   :  { %v2525_v53 = vadd.f32 %v2524_v45, %v2436_v4  ;;  %v2349_v23 = vpop.f32.mrf.mxu0  ;;  %v2438_v38 = vpop.f32.mrf.mxu1  ;;  %v4784_v4 = vld [vmem:[%s6169_s5 + $0x70] sm:$0xff] }
 0x41c   :  { %v2350_v59 = vadd.f32 %v2349_v23, %v5640_v11  ;;  %3554 = vmatpush.bf16.msrb.mxu1 %v4784_v4 }
 0x41d   :  { %v2614_v13 = vadd.f32 %v2613_v61, %v2525_v53  ;;  %2664 = vmatmul.bf16.vlgmr.msra.gmra.mxu0 %v5021_v40  ;;  %v4800_v40 = vld [vmem:[%s6169_s5 + $0xf0] sm:$0xff] }
 0x41e   :  { %v2439_v26 = vadd.f32 %v2438_v38, %v2350_v59  ;;  %2753 = vmatmul.bf16.vlgmr.msra.gmra.mxu1 %v5024_v42  ;;  %3732 = vmatpush.bf16.msrb.mxu3 %v4800_v40 }
 0x41f   :  { %v3074_v21 = vmax.f32 %v2614_v13, 0.0  ;;  %2842 = vmatmul.bf16.vlgmr.msra.gmra.mxu2 %v5030_v55  ;;  %2931 = vmatmul.bf16.vlgmr.msra.gmra.mxu3 %v5034_v56 }
 0x421   :  { %v5732_v36 = vpack.c.bf16 %v3074_v21, %v3070_v22 }
 0x422   :  { %v2527_v30 = vpop.f32.mrf.mxu2  ;;  %v2616_v55 = vpop.f32.mrf.mxu3 }
 0x423   :  { %v2528_v42 = vadd.f32 %v2527_v30, %v2439_v26  ;;  %v2351_v56 = vpop.f32.mrf.mxu0  ;;  %v2440_v16 = vpop.f32.mrf.mxu1 }
 0x424   :  { %v2352_v47 = vadd.f32 %v2351_v56, %v5640_v11 }
 0x425   :  { %v2617_v0 = vadd.f32 %v2616_v55, %v2528_v42 }
 0x426   :  { %v2441_v44 = vadd.f32 %v2440_v16, %v2352_v47 }
 0x427   :  { %v3078_v22 = vmax.f32 %v2617_v0, 0.0 }
 0x42a   :  { %v2529_v45 = vpop.f32.mrf.mxu2  ;;  %v2618_v61 = vpop.f32.mrf.mxu3 }
 0x42b   :  { %v2530_v53 = vadd.f32 %v2529_v45, %v2441_v44  ;;  %v2354_v23 = vpop.f32.mrf.mxu0  ;;  %v2443_v38 = vpop.f32.mrf.mxu1 }
 0x42c   :  { %v2355_v59 = vadd.f32 %v2354_v23, %v5640_v11  ;;  %v6332_v23 = vld [vmem:[#allocation8_spill] sm:$0xff] }
 0x42d   :  { %v2619_v13 = vadd.f32 %v2618_v61, %v2530_v53  ;;  %2669 = vmatmul.bf16.gmra.mxu0 %v5047_v7 }
 0x42e   :  { %v2444_v26 = vadd.f32 %v2443_v38, %v2355_v59  ;;  %2758 = vmatmul.bf16.gmra.mxu1 %v5050_v9  ;;  %v6333_v59 = vld [vmem:[#allocation9_spill] sm:$0xff] }
 0x42f   :  { %v3082_v21 = vmax.f32 %v2619_v13, 0.0  ;;  %2847 = vmatmul.bf16.gmra.mxu2 %v5056_v24  ;;  %2936 = vmatmul.bf16.gmra.mxu3 %v5060_v25  ;;  %v4791_v38 = vld [vmem:[%s6169_s5 + $0xa8] sm:$0xff] }
 0x430   :  { %v4775_v13 = vld [vmem:[%s6169_s5 + $0x28] sm:$0xff]  ;;  %3644 = vmatpush.bf16.msrb.mxu2 %v4791_v38 }
 0x431   :  { %v5743_v51 = vpack.c.bf16 %v3082_v21, %v3078_v22  ;;  %3466 = vmatpush.bf16.msrb.mxu0 %v4775_v13 }
 0x432   :  { %v2532_v43 = vpop.f32.mrf.mxu2  ;;  %v2621_v30 = vpop.f32.mrf.mxu3 }
 0x433   :  { %v2533_v40 = vadd.f32 %v2532_v43, %v2444_v26  ;;  %v2356_v42 = vpop.f32.mrf.mxu0  ;;  %v2445_v56 = vpop.f32.mrf.mxu1 }
 0x434   :  { %v2357_v55 = vadd.f32 %v2356_v42, %v5640_v11 }
 0x435   :  { %v2622_v47 = vadd.f32 %v2621_v30, %v2533_v40 }
 0x436   :  { %v2446_v16 = vadd.f32 %v2445_v56, %v2357_v55  ;;  %v4783_v56 = vld [vmem:[%s6169_s5 + $0x68] sm:$0xff] }
 0x437   :  { %v3086_v53 = vmax.f32 %v2622_v47, 0.0  ;;  %3555 = vmatpush.bf16.msrb.mxu1 %v4783_v56 }
 0x43a   :  { %v2534_v7 = vpop.f32.mrf.mxu2  ;;  %v2623_v44 = vpop.f32.mrf.mxu3 }
 0x43b   :  { %v2535_v0 = vadd.f32 %v2534_v7, %v2446_v16  ;;  %v2359_v4 = vpop.f32.mrf.mxu0  ;;  %v2448_v24 = vpop.f32.mrf.mxu1 }
 0x43c   :  { %v2360_v9 = vadd.f32 %v2359_v4, %v5640_v11 }
 0x43d   :  { %v2624_v45 = vadd.f32 %v2623_v44, %v2535_v0  ;;  %2674 = vmatmul.bf16.gmra.mxu0 %v5073_v58  ;;  %v4799_v58 = vld [vmem:[%s6169_s5 + $0xe8] sm:$0xff] }
 0x43e   :  { %v2449_v25 = vadd.f32 %v2448_v24, %v2360_v9  ;;  %2763 = vmatmul.bf16.gmra.mxu1 %v5076_v60  ;;  %3733 = vmatpush.bf16.msrb.mxu3 %v4799_v58 }
 0x43f   :  { %v3090_v61 = vmax.f32 %v2624_v45, 0.0  ;;  %2852 = vmatmul.bf16.gmra.mxu2 %v6332_v23  ;;  %2941 = vmatmul.bf16.gmra.mxu3 %v6333_v59  ;;  %v6334_v45 = vld [vmem:[#allocation10_spill] sm:$0xff]  ;;  %v6336_v23 = vld [vmem:[#allocation12_spill] sm:$0xff]  ;;  %v6337_v59 = vld [vmem:[#allocation13_spill] sm:$0xff] }
 0x441   :  { %v5760_v26 = vpack.c.bf16 %v3090_v61, %v3086_v53  ;;  %v6335_v61 = vld [vmem:[#allocation11_spill] sm:$0xff] }
 0x442   :  { %v2537_v22 = vpop.f32.mrf.mxu2  ;;  %v2626_v21 = vpop.f32.mrf.mxu3 }
 0x443   :  { %v2538_v60 = vadd.f32 %v2537_v22, %v2449_v25  ;;  %v2361_v43 = vpop.f32.mrf.mxu0  ;;  %v2450_v30 = vpop.f32.mrf.mxu1 }
 0x444   :  { %v2362_v40 = vadd.f32 %v2361_v43, %v5640_v11 }
 0x445   :  { %v2627_v42 = vadd.f32 %v2626_v21, %v2538_v60 }
 0x446   :  { %v2451_v55 = vadd.f32 %v2450_v30, %v2362_v40 }
 0x447   :  { %v3094_v25 = vmax.f32 %v2627_v42, 0.0 }
 0x44a   :  { %v2539_v47 = vpop.f32.mrf.mxu2  ;;  %v2628_v7 = vpop.f32.mrf.mxu3 }
 0x44b   :  { %v2540_v16 = vadd.f32 %v2539_v47, %v2451_v55  ;;  %v2364_v0 = vpop.f32.mrf.mxu0  ;;  %v2453_v4 = vpop.f32.mrf.mxu1 }
 0x44c   :  { %v2365_v44 = vadd.f32 %v2364_v0, %v5640_v11 }
 0x44d   :  { %v2629_v9 = vadd.f32 %v2628_v7, %v2540_v16  ;;  %2679 = vmatmul.bf16.gmra.mxu0 %v6334_v45  ;;  %v6339_v45 = vld [vmem:[#allocation15_spill] sm:$0xff] }
 0x44e   :  { %v2454_v24 = vadd.f32 %v2453_v4, %v2365_v44  ;;  %2768 = vmatmul.bf16.gmra.mxu1 %v6335_v61  ;;  %v6338_v4 = vld [vmem:[#allocation14_spill] sm:$0xff]  ;;  %v4790_v61 = vld [vmem:[%s6169_s5 + $0xa0] sm:$0xff] }
 0x44f   :  { %v3098_v53 = vmax.f32 %v2629_v9, 0.0  ;;  %2857 = vmatmul.bf16.gmra.mxu2 %v6336_v23  ;;  %2946 = vmatmul.bf16.gmra.mxu3 %v6337_v59  ;;  %v4774_v23 = vld [vmem:[%s6169_s5 + $0x20] sm:$0xff] }
 0x450   :  { %v4798_v59 = vld [vmem:[%s6169_s5 + $0xe0] sm:$0xff]  ;;  %3645 = vmatpush.bf16.msrb.mxu2 %v4790_v61  ;;  %3467 = vmatpush.bf16.msrb.mxu0 %v4774_v23  ;;  %v6345_v23 = vld [vmem:[#allocation21_spill] sm:$0xff] }
 0x451   :  { %v5771_v38 = vpack.c.bf16 %v3098_v53, %v3094_v25  ;;  %v6340_v25 = vld [vmem:[#allocation16_spill] sm:$0xff]  ;;  %v6341_v53 = vld [vmem:[#allocation17_spill] sm:$0xff]  ;;  %3734 = vmatpush.bf16.msrb.mxu3 %v4798_v59 }
 0x452   :  { %v2542_v13 = vpop.f32.mrf.mxu2  ;;  %v2631_v22 = vpop.f32.mrf.mxu3  ;;  %v6344_v61 = vld [vmem:[#allocation20_spill] sm:$0xff] }
 0x453   :  { %v2543_v58 = vadd.f32 %v2542_v13, %v2454_v24  ;;  %v2366_v60 = vpop.f32.mrf.mxu0  ;;  %v2455_v43 = vpop.f32.mrf.mxu1 }
 0x454   :  { %v2367_v21 = vadd.f32 %v2366_v60, %v5640_v11 }
 0x455   :  { %v2632_v40 = vadd.f32 %v2631_v22, %v2543_v58 }
 0x456   :  { %v2456_v30 = vadd.f32 %v2455_v43, %v2367_v21 }
 0x457   :  { %v3102_v9 = vmax.f32 %v2632_v40, 0.0 }
 0x45a   :  { %v2544_v55 = vpop.f32.mrf.mxu2  ;;  %v2633_v56 = vpop.f32.mrf.mxu3 }
 0x45b   :  { %v2545_v42 = vadd.f32 %v2544_v55, %v2456_v30  ;;  %v2369_v47 = vpop.f32.mrf.mxu0  ;;  %v2458_v7 = vpop.f32.mrf.mxu1 }
 0x45c   :  { %v2370_v16 = vadd.f32 %v2369_v47, %v5640_v11 }
 0x45d   :  { %v2634_v0 = vadd.f32 %v2633_v56, %v2545_v42  ;;  %2684 = vmatmul.bf16.gmra.mxu0 %v6338_v4  ;;  %v4782_v42 = vld [vmem:[%s6169_s5 + $0x60] sm:$0xff] }
 0x45e   :  { %v2459_v44 = vadd.f32 %v2458_v7, %v2370_v16  ;;  %2773 = vmatmul.bf16.gmra.mxu1 %v6339_v45 }
 0x45f   :  { %v3106_v24 = vmax.f32 %v2634_v0, 0.0  ;;  %2862 = vmatmul.bf16.gmra.mxu2 %v6340_v25  ;;  %2951 = vmatmul.bf16.gmra.mxu3 %v6341_v53  ;;  %v6343_v53 = vld [vmem:[#allocation19_spill] sm:$0xff] }
 0x460   :  { %3556 = vmatpush.bf16.msrb.mxu1 %v4782_v42 }
 0x461   :  { %v5788_v13 = vpack.c.bf16 %v3106_v24, %v3102_v9  ;;  %v6342_v24 = vld [vmem:[#allocation18_spill] sm:$0xff] }
 0x462   :  { %v2547_v58 = vpop.f32.mrf.mxu2  ;;  %v2636_v60 = vpop.f32.mrf.mxu3 }
 0x463   :  { %v2548_v22 = vadd.f32 %v2547_v58, %v2459_v44  ;;  %v2371_v21 = vpop.f32.mrf.mxu0  ;;  %v2460_v40 = vpop.f32.mrf.mxu1 }
 0x464   :  { %v2372_v43 = vadd.f32 %v2371_v21, %v5640_v11 }
 0x465   :  { %v2637_v30 = vadd.f32 %v2636_v60, %v2548_v22 }
 0x466   :  { %v2461_v55 = vadd.f32 %v2460_v40, %v2372_v43 }
 0x467   :  { %v3110_v45 = vmax.f32 %v2637_v30, 0.0 }
 0x46a   :  { %v2549_v56 = vpop.f32.mrf.mxu2  ;;  %v2638_v16 = vpop.f32.mrf.mxu3 }
 0x46b   :  { %v2550_v47 = vadd.f32 %v2549_v56, %v2461_v55  ;;  %v2374_v7 = vpop.f32.mrf.mxu0  ;;  %v2463_v44 = vpop.f32.mrf.mxu1 }
 0x46c   :  { %v2375_v0 = vadd.f32 %v2374_v7, %v5640_v11 }
 0x46d   :  { %v2639_v4 = vadd.f32 %v2638_v16, %v2550_v47  ;;  %2689 = vmatmul.bf16.gmra.mxu0 %v6342_v24  ;;  %v6346_v24 = vld [vmem:[#allocation22_spill] sm:$0xff] }
 0x46e   :  { %v2464_v9 = vadd.f32 %v2463_v44, %v2375_v0  ;;  %2778 = vmatmul.bf16.gmra.mxu1 %v6343_v53  ;;  %v6348_v53 = vld [vmem:[#allocation24_spill] sm:$0xff] }
 0x46f   :  { %v3114_v25 = vmax.f32 %v2639_v4, 0.0  ;;  %2867 = vmatmul.bf16.gmra.mxu2 %v6344_v61  ;;  %2956 = vmatmul.bf16.gmra.mxu3 %v6345_v23  ;;  %v6349_v61 = vld [vmem:[#allocation25_spill] sm:$0xff]  ;;  %v4789_v23 = vld [vmem:[%s6169_s5 + $0x98] sm:$0xff] }
 0x470   :  { %3646 = vmatpush.bf16.msrb.mxu2 %v4789_v23  ;;  %v6350_v23 = vld [vmem:[#allocation26_spill] sm:$0xff] }
 0x471   :  { %v5799_v59 = vpack.c.bf16 %v3114_v25, %v3110_v45  ;;  %v6347_v25 = vld [vmem:[#allocation23_spill] sm:$0xff] }
 0x472   :  { %v2552_v58 = vpop.f32.mrf.mxu2  ;;  %v2641_v60 = vpop.f32.mrf.mxu3 }
 0x473   :  { %v2553_v22 = vadd.f32 %v2552_v58, %v2464_v9  ;;  %v2376_v21 = vpop.f32.mrf.mxu0  ;;  %v2465_v40 = vpop.f32.mrf.mxu1  ;;  %v4773_v58 = vld [vmem:[%s6169_s5 + $0x18] sm:$0xff] }
 0x474   :  { %v2377_v43 = vadd.f32 %v2376_v21, %v5640_v11  ;;  %3468 = vmatpush.bf16.msrb.mxu0 %v4773_v58 }
 0x475   :  { %v2642_v55 = vadd.f32 %v2641_v60, %v2553_v22  ;;  %v4797_v22 = vld [vmem:[%s6169_s5 + $0xd8] sm:$0xff] }
 0x476   :  { %v2466_v42 = vadd.f32 %v2465_v40, %v2377_v43  ;;  %3735 = vmatpush.bf16.msrb.mxu3 %v4797_v22 }
 0x477   :  { %v3118_v45 = vmax.f32 %v2642_v55, 0.0 }
 0x47a   :  { %v2554_v56 = vpop.f32.mrf.mxu2  ;;  %v2643_v47 = vpop.f32.mrf.mxu3 }
 0x47b   :  { %v2555_v30 = vadd.f32 %v2554_v56, %v2466_v42  ;;  %v2379_v16 = vpop.f32.mrf.mxu0  ;;  %v2468_v0 = vpop.f32.mrf.mxu1 }
 0x47c   :  { %v2380_v7 = vadd.f32 %v2379_v16, %v5640_v11  ;;  %v4781_v16 = vld [vmem:[%s6169_s5 + $0x58] sm:$0xff] }
 0x47d   :  { %v2644_v44 = vadd.f32 %v2643_v47, %v2555_v30  ;;  %2694 = vmatmul.bf16.gmra.mxu0 %v6346_v24  ;;  %3557 = vmatpush.bf16.msrb.mxu1 %v4781_v16 }
 0x47e   :  { %v2469_v4 = vadd.f32 %v2468_v0, %v2380_v7  ;;  %2783 = vmatmul.bf16.gmra.mxu1 %v6347_v25 }
 0x47f   :  { %v3122_v9 = vmax.f32 %v2644_v44, 0.0  ;;  %2872 = vmatmul.bf16.gmra.mxu2 %v6348_v53  ;;  %2961 = vmatmul.bf16.gmra.mxu3 %v6349_v61 }
 0x481   :  { %v5816_v60 = vpack.c.bf16 %v3122_v9, %v3118_v45 }
 0x482   :  { %v2557_v21 = vpop.f32.mrf.mxu2  ;;  %v2646_v40 = vpop.f32.mrf.mxu3 }
 0x483   :  { %v2558_v43 = vadd.f32 %v2557_v21, %v2469_v4  ;;  %v2381_v55 = vpop.f32.mrf.mxu0  ;;  %v2470_v56 = vpop.f32.mrf.mxu1 }
 0x484   :  { %v2382_v42 = vadd.f32 %v2381_v55, %v5640_v11 }
 0x485   :  { %v2647_v30 = vadd.f32 %v2646_v40, %v2558_v43 }
 0x486   :  { %v2471_v47 = vadd.f32 %v2470_v56, %v2382_v42 }
 0x487   :  { %v3126_v53 = vmax.f32 %v2647_v30, 0.0 }
 0x48a   :  { %v2559_v7 = vpop.f32.mrf.mxu2  ;;  %v2648_v44 = vpop.f32.mrf.mxu3 }
 0x48b   :  { %v2560_v0 = vadd.f32 %v2559_v7, %v2471_v47  ;;  %v2384_v24 = vpop.f32.mrf.mxu0  ;;  %v2473_v4 = vpop.f32.mrf.mxu1 }
 0x48c   :  { %v2385_v45 = vadd.f32 %v2384_v24, %v5640_v11 }
 0x48d   :  { %v2649_v9 = vadd.f32 %v2648_v44, %v2560_v0  ;;  %2699 = vmatmul.bf16.gmra.mxu0 %v5197_v1  ;;  %v6351_v1 = vld [vmem:[#allocation63_spill] sm:$0xff] }
 0x48e   :  { %v2474_v25 = vadd.f32 %v2473_v4, %v2385_v45  ;;  %2788 = vmatmul.bf16.gmra.mxu1 %v5200_v3  ;;  %v5831_v30 = vperm.slane %v6351_v1, 3  ;;  %v6352_v4 = vld [vmem:[#allocation27_spill] sm:$0xff] }
 0x48f   :  { %v3130_v61 = vmax.f32 %v2649_v9, 0.0  ;;  %2877 = vmatmul.bf16.gmra.mxu2 %v5206_v31  ;;  %2966 = vmatmul.bf16.gmra.mxu3 %v6350_v23  ;;  %v4788_v23 = vld [vmem:[%s6169_s5 + $0x90] sm:$0xff] }
 0x490   :  { %3647 = vmatpush.bf16.msrb.mxu2 %v4788_v23 }
 0x491   :  { %v5827_v58 = vpack.c.bf16 %v3130_v61, %v3126_v53  ;;  %v6354_v53 = vld [vmem:[#allocation29_spill] sm:$0xff]  ;;  %v6355_v61 = vld [vmem:[#allocation30_spill] sm:$0xff] }
 0x492   :  { %v2562_v22 = vpop.f32.mrf.mxu2  ;;  %v2651_v43 = vpop.f32.mrf.mxu3 }
 0x493   :  { %v2563_v21 = vadd.f32 %v2562_v22, %v2474_v25  ;;  %v2386_v40 = vpop.f32.mrf.mxu0  ;;  %v2475_v42 = vpop.f32.mrf.mxu1  ;;  %v4772_v22 = vld [vmem:[%s6169_s5 + $0x10] sm:$0xff] }
 0x494   :  { %v2387_v55 = vadd.f32 %v2386_v40, %v5640_v11  ;;  %v6353_v11 = vld [vmem:[#allocation28_spill] sm:$0xff]  ;;  %3469 = vmatpush.bf16.msrb.mxu0 %v4772_v22 }
 0x495   :  { %v2652_v56 = vadd.f32 %v2651_v43, %v2563_v21  ;;  %v4796_v21 = vld [vmem:[%s6169_s5 + $0xd0] sm:$0xff] }
 0x496   :  { %v2476_v47 = vadd.f32 %v2475_v42, %v2387_v55  ;;  %3736 = vmatpush.bf16.msrb.mxu3 %v4796_v21 }
 0x497   :  { %v3134_v9 = vmax.f32 %v2652_v56, 0.0 }
 0x49a   :  { %v2564_v16 = vpop.f32.mrf.mxu2  ;;  %v2653_v7 = vpop.f32.mrf.mxu3 }
 0x49b   :  { %v2565_v3 = vadd.f32 %v2564_v16, %v2476_v47  ;;  %v2665_v31 = vpop.f32.mrf.mxu0  ;;  %v2754_v44 = vpop.f32.mrf.mxu1 }
 0x49c   :  { %v2666_v0 = vadd.f32 %v2665_v31, %v5831_v30 }
 0x49d   :  { %v2654_v24 = vadd.f32 %v2653_v7, %v2565_v3  ;;  %2704 = vmatmul.bf16.gmra.mxu0 %v6352_v4  ;;  %v4780_v7 = vld [vmem:[%s6169_s5 + $0x50] sm:$0xff] }
 0x49e   :  { %v2755_v45 = vadd.f32 %v2754_v44, %v2666_v0  ;;  %2793 = vmatmul.bf16.gmra.mxu1 %v6353_v11 }
 0x49f   :  { %v3138_v25 = vmax.f32 %v2654_v24, 0.0  ;;  %2882 = vmatmul.bf16.gmra.mxu2 %v6354_v53  ;;  %2971 = vmatmul.bf16.gmra.mxu3 %v6355_v61 }
 0x4a0   :  { %3558 = vmatpush.bf16.msrb.mxu1 %v4780_v7 }
 0x4a1   :  { %v5847_v43 = vpack.c.bf16 %v3138_v25, %v3134_v9 }
 0x4a2   :  { %v2843_v40 = vpop.f32.mrf.mxu2  ;;  %v2932_v42 = vpop.f32.mrf.mxu3 }
 0x4a3   :  { %v2844_v55 = vadd.f32 %v2843_v40, %v2755_v45  ;;  %v2667_v56 = vpop.f32.mrf.mxu0  ;;  %v2756_v1 = vpop.f32.mrf.mxu1 }
 0x4a4   :  { %v2668_v47 = vadd.f32 %v2667_v56, %v5831_v30 }
 0x4a5   :  { %v2933_v16 = vadd.f32 %v2932_v42, %v2844_v55 }
 0x4a6   :  { %v2757_v3 = vadd.f32 %v2756_v1, %v2668_v47 }
 0x4a7   :  { %v3015_v11 = vmax.f32 %v2933_v16, 0.0 }
 0x4aa   :  { %v2845_v31 = vpop.f32.mrf.mxu2  ;;  %v2934_v44 = vpop.f32.mrf.mxu3 }
 0x4ab   :  { %v2846_v0 = vadd.f32 %v2845_v31, %v2757_v3  ;;  %v2670_v24 = vpop.f32.mrf.mxu0  ;;  %v2759_v45 = vpop.f32.mrf.mxu1 }
 0x4ac   :  { %v2671_v4 = vadd.f32 %v2670_v24, %v5831_v30  ;;  %v4787_v24 = vld [vmem:[%s6169_s5 + $0x88] sm:$0xff] }
 0x4ad   :  { %v2935_v9 = vadd.f32 %v2934_v44, %v2846_v0  ;;  %2709 = vmatmul.bf16.gmra.mxu0 %v5237_v20  ;;  %v6356_v44 = vld [vmem:[#allocation31_spill] sm:$0xff]  ;;  %3648 = vmatpush.bf16.msrb.mxu2 %v4787_v24 }
 0x4ae   :  { %v2760_v25 = vadd.f32 %v2759_v45, %v2671_v4  ;;  %2798 = vmatmul.bf16.gmra.mxu1 %v5240_v37  ;;  %v4771_v4 = vld [vmem:[%s6169_s5 + $0x8] sm:$0xff] }
 0x4af   :  { %v3019_v53 = vmax.f32 %v2935_v9, 0.0  ;;  %2887 = vmatmul.bf16.gmra.mxu2 %v5246_v2  ;;  %2976 = vmatmul.bf16.gmra.mxu3 %v5250_v62 }
 0x4b0   :  { %3470 = vmatpush.bf16.msrb.mxu0 %v4771_v4 }
 0x4b1   :  { %v5858_v61 = vpack.c.bf16 %v3019_v53, %v3015_v11 }
 0x4b2   :  { %v2848_v23 = vpop.f32.mrf.mxu2  ;;  %v2937_v21 = vpop.f32.mrf.mxu3 }
 0x4b3   :  { %v2849_v22 = vadd.f32 %v2848_v23, %v2760_v25  ;;  %v2672_v40 = vpop.f32.mrf.mxu0  ;;  %v2761_v42 = vpop.f32.mrf.mxu1 }
 0x4b4   :  { %v2673_v55 = vadd.f32 %v2672_v40, %v5831_v30 }
 0x4b5   :  { %v2938_v56 = vadd.f32 %v2937_v21, %v2849_v22  ;;  %v4779_v21 = vld [vmem:[%s6169_s5 + $0x48] sm:$0xff] }
 0x4b6   :  { %v2762_v47 = vadd.f32 %v2761_v42, %v2673_v55  ;;  %3559 = vmatpush.bf16.msrb.mxu1 %v4779_v21 }
 0x4b7   :  { %v3023_v31 = vmax.f32 %v2938_v56, 0.0 }
 0x4ba   :  { %v2850_v20 = vpop.f32.mrf.mxu2  ;;  %v2939_v16 = vpop.f32.mrf.mxu3 }
 0x4bb   :  { %v2851_v1 = vadd.f32 %v2850_v20, %v2762_v47  ;;  %v2675_v3 = vpop.f32.mrf.mxu0  ;;  %v2764_v2 = vpop.f32.mrf.mxu1 }
 0x4bc   :  { %v2676_v37 = vadd.f32 %v2675_v3, %v5831_v30 }
 0x4bd   :  { %v2940_v7 = vadd.f32 %v2939_v16, %v2851_v1  ;;  %2714 = vmatmul.bf16.gmra.mxu0 %v5257_v15  ;;  %v4795_v15 = vld [vmem:[%s6169_s5 + $0xc8] sm:$0xff] }
 0x4be   :  { %v2765_v62 = vadd.f32 %v2764_v2, %v2676_v37  ;;  %2803 = vmatmul.bf16.gmra.mxu1 %v5260_v17  ;;  %3737 = vmatpush.bf16.msrb.mxu3 %v4795_v15 }
 0x4bf   :  { %v3027_v0 = vmax.f32 %v2940_v7, 0.0  ;;  %2892 = vmatmul.bf16.gmra.mxu2 %v5266_v27  ;;  %2981 = vmatmul.bf16.gmra.mxu3 %v6356_v44 }
 0x4c1   :  { %v5875_v45 = vpack.c.bf16 %v3027_v0, %v3023_v31 }
 0x4c2   :  { %v2853_v9 = vpop.f32.mrf.mxu2  ;;  %v2942_v27 = vpop.f32.mrf.mxu3 }
 0x4c3   :  { %v2854_v17 = vadd.f32 %v2853_v9, %v2765_v62  ;;  %v2677_v25 = vpop.f32.mrf.mxu0  ;;  %v2766_v53 = vpop.f32.mrf.mxu1 }
 0x4c4   :  { %v2678_v11 = vadd.f32 %v2677_v25, %v5831_v30 }
 0x4c5   :  { %v2943_v23 = vadd.f32 %v2942_v27, %v2854_v17 }
 0x4c6   :  { %v2767_v22 = vadd.f32 %v2766_v53, %v2678_v11 }
 0x4c7   :  { %v3031_v3 = vmax.f32 %v2943_v23, 0.0  ;;  %v4786_v23 = vld [vmem:[%s6169_s5 + $0x80] sm:$0xff] }
 0x4c8   :  { %3649 = vmatpush.bf16.msrb.mxu2 %v4786_v23 }
 0x4ca   :  { %v2855_v40 = vpop.f32.mrf.mxu2  ;;  %v2944_v42 = vpop.f32.mrf.mxu3 }
 0x4cb   :  { %v2856_v55 = vadd.f32 %v2855_v40, %v2767_v22  ;;  %v2680_v56 = vpop.f32.mrf.mxu0  ;;  %v2769_v20 = vpop.f32.mrf.mxu1  ;;  %v4770_v22 = vld [vmem:[%s6169_s5] sm:$0xff] }
 0x4cc   :  { %v2681_v47 = vadd.f32 %v2680_v56, %v5831_v30  ;;  %3471 = vmatpush.bf16.msrb.mxu0 %v4770_v22 }
 0x4cd   :  { %v2945_v1 = vadd.f32 %v2944_v42, %v2856_v55  ;;  %2719 = vmatmul.bf16.gmra.mxu0 %v5277_v41 }
 0x4ce   :  { %v2770_v16 = vadd.f32 %v2769_v20, %v2681_v47  ;;  %2808 = vmatmul.bf16.gmra.mxu1 %v5280_v14  ;;  %v4778_v20 = vld [vmem:[%s6169_s5 + $0x40] sm:$0xff] }
 0x4cf   :  { %v3035_v37 = vmax.f32 %v2945_v1, 0.0  ;;  %2897 = vmatmul.bf16.gmra.mxu2 %v5286_v19  ;;  %2986 = vmatmul.bf16.gmra.mxu3 %v5290_v63 }
 0x4d0   :  { %3560 = vmatpush.bf16.msrb.mxu1 %v4778_v20 }
 0x4d1   :  { %v5886_v2 = vpack.c.bf16 %v3035_v37, %v3031_v3 }
 0x4d2   :  { %v2858_v7 = vpop.f32.mrf.mxu2  ;;  %v2947_v31 = vpop.f32.mrf.mxu3 }
 0x4d3   :  { %v2859_v62 = vadd.f32 %v2858_v7, %v2770_v16  ;;  %v2682_v0 = vpop.f32.mrf.mxu0  ;;  %v2771_v24 = vpop.f32.mrf.mxu1 }
 0x4d4   :  { %v2683_v44 = vadd.f32 %v2682_v0, %v5831_v30 }
 0x4d5   :  { %v2948_v4 = vadd.f32 %v2947_v31, %v2859_v62 }
 0x4d6   :  { %v2772_v15 = vadd.f32 %v2771_v24, %v2683_v44 }
 0x4d7   :  { %v3039_v11 = vmax.f32 %v2948_v4, 0.0 }
 0x4da   :  { %v2860_v41 = vpop.f32.mrf.mxu2  ;;  %v2949_v17 = vpop.f32.mrf.mxu3 }
 0x4db   :  { %v2861_v9 = vadd.f32 %v2860_v41, %v2772_v15  ;;  %v2685_v27 = vpop.f32.mrf.mxu0  ;;  %v2774_v19 = vpop.f32.mrf.mxu1 }
 0x4dc   :  { %v2686_v14 = vadd.f32 %v2685_v27, %v5831_v30 }
 0x4dd   :  { %v2950_v25 = vadd.f32 %v2949_v17, %v2861_v9  ;;  %2724 = vmatmul.bf16.gmra.mxu0 %v5297_v49  ;;  %v4794_v49 = vld [vmem:[%s6169_s5 + $0xc0] sm:$0xff] }
 0x4de   :  { %v2775_v63 = vadd.f32 %v2774_v19, %v2686_v14  ;;  %2813 = vmatmul.bf16.gmra.mxu1 %v5300_v57  ;;  %3738 = vmatpush.bf16.msrb.mxu3 %v4794_v49 }
 0x4df   :  { %v3043_v53 = vmax.f32 %v2950_v25, 0.0  ;;  %2902 = vmatmul.bf16.gmra.mxu2 %v5306_v48  ;;  %2991 = vmatmul.bf16.gmra.mxu3 %v5310_v33 }
 0x4e1   :  { %v5903_v21 = vpack.c.bf16 %v3043_v53, %v3039_v11 }
 0x4e2   :  { %v2863_v40 = vpop.f32.mrf.mxu2  ;;  %v2952_v48 = vpop.f32.mrf.mxu3 }
 0x4e3   :  { %v2864_v57 = vadd.f32 %v2863_v40, %v2775_v63  ;;  %v2687_v33 = vpop.f32.mrf.mxu0  ;;  %v2776_v42 = vpop.f32.mrf.mxu1 }
 0x4e4   :  { %v2688_v55 = vadd.f32 %v2687_v33, %v5831_v30 }
 0x4e5   :  { %v2953_v56 = vadd.f32 %v2952_v48, %v2864_v57 }
 0x4e6   :  { %v2777_v47 = vadd.f32 %v2776_v42, %v2688_v55 }
 0x4e7   :  { %v3047_v44 = vmax.f32 %v2953_v56, 0.0 }
 0x4ea   :  { %v2865_v1 = vpop.f32.mrf.mxu2  ;;  %v2954_v3 = vpop.f32.mrf.mxu3 }
 0x4eb   :  { %v2866_v16 = vadd.f32 %v2865_v1, %v2777_v47  ;;  %v2690_v37 = vpop.f32.mrf.mxu0  ;;  %v2779_v62 = vpop.f32.mrf.mxu1 }
 0x4ec   :  { %v2691_v7 = vadd.f32 %v2690_v37, %v5831_v30 }
 0x4ed   :  { %v2955_v31 = vadd.f32 %v2954_v3, %v2866_v16  ;;  %2729 = vmatmul.bf16.gmra.mxu0 %v5317_v6 }
 0x4ee   :  { %v2780_v0 = vadd.f32 %v2779_v62, %v2691_v7  ;;  %2818 = vmatmul.bf16.gmra.mxu1 %v5320_v35 }
 0x4ef   :  { %v3051_v24 = vmax.f32 %v2955_v31, 0.0  ;;  %2907 = vmatmul.bf16.gmra.mxu2 %v5326_v39  ;;  %2996 = vmatmul.bf16.gmra.mxu3 %v5330_v54 }
 0x4f1   :  { %v5914_v4 = vpack.c.bf16 %v3051_v24, %v3047_v44 }
 0x4f2   :  { %v2868_v15 = vpop.f32.mrf.mxu2  ;;  %v2957_v9 = vpop.f32.mrf.mxu3 }
 0x4f3   :  { %v2869_v41 = vadd.f32 %v2868_v15, %v2780_v0  ;;  %v2692_v17 = vpop.f32.mrf.mxu0  ;;  %v2781_v14 = vpop.f32.mrf.mxu1 }
 0x4f4   :  { %v2693_v27 = vadd.f32 %v2692_v17, %v5831_v30 }
 0x4f5   :  { %v2958_v19 = vadd.f32 %v2957_v9, %v2869_v41 }
 0x4f6   :  { %v2782_v25 = vadd.f32 %v2781_v14, %v2693_v27 }
 0x4f7   :  { %v3055_v22 = vmax.f32 %v2958_v19, 0.0 }
 0x4fa   :  { %v2870_v6 = vpop.f32.mrf.mxu2  ;;  %v2959_v11 = vpop.f32.mrf.mxu3 }
 0x4fb   :  { %v2871_v63 = vadd.f32 %v2870_v6, %v2782_v25  ;;  %v2695_v53 = vpop.f32.mrf.mxu0  ;;  %v2784_v39 = vpop.f32.mrf.mxu1 }
 0x4fc   :  { %v2696_v35 = vadd.f32 %v2695_v53, %v5831_v30 }
 0x4fd   :  { %v2960_v23 = vadd.f32 %v2959_v11, %v2871_v63  ;;  %2734 = vmatmul.bf16.gmra.mxu0 %v5337_v34  ;;  %v6357_v63 = vld [vmem:[#allocation33_spill] sm:$0xff] }
 0x4fe   :  { %v2785_v54 = vadd.f32 %v2784_v39, %v2696_v35  ;;  %2823 = vmatmul.bf16.gmra.mxu1 %v5340_v12  ;;  %v6358_v35 = vld [vmem:[#allocation48_spill] sm:$0xff]  ;;  %v6359_v39 = vld [vmem:[#allocation65_spill] sm:$0xff] }
 0x4ff   :  { %v3059_v49 = vmax.f32 %v2960_v23, 0.0  ;;  %2912 = vmatmul.bf16.gmra.mxu2 %v5346_v5  ;;  %3001 = vmatmul.bf16.gmra.mxu3 %v5350_v8 }
 0x501   :  { %v5922_v40 = vpack.c.bf16 %v3059_v49, %v3055_v22 }
 0x502   :  { %v2873_v57 = vpop.f32.mrf.mxu2  ;;  %v2962_v33 = vpop.f32.mrf.mxu3 }
 0x503   :  { %v2874_v48 = vadd.f32 %v2873_v57, %v2785_v54  ;;  %v2697_v55 = vpop.f32.mrf.mxu0  ;;  %v2786_v56 = vpop.f32.mrf.mxu1 }
 0x504   :  { %v2698_v42 = vadd.f32 %v2697_v55, %v5831_v30 }
 0x505   :  { %v2963_v47 = vadd.f32 %v2962_v33, %v2874_v48 }
 0x506   :  { %v2787_v20 = vadd.f32 %v2786_v56, %v2698_v42 }
 0x507   :  { %v3063_v7 = vmax.f32 %v2963_v47, 0.0 }
 0x50a   :  { %v2875_v34 = vpop.f32.mrf.mxu2  ;;  %v2964_v16 = vpop.f32.mrf.mxu3 }
 0x50b   :  { %v2876_v1 = vadd.f32 %v2875_v34, %v2787_v20  ;;  %v2700_v3 = vpop.f32.mrf.mxu0  ;;  %v2789_v5 = vpop.f32.mrf.mxu1 }
 0x50c   :  { %v2701_v12 = vadd.f32 %v2700_v3, %v5831_v30 }
 0x50d   :  { %v2965_v37 = vadd.f32 %v2964_v16, %v2876_v1  ;;  %2739 = vmatmul.bf16.gmra.mxu0 %v5362_v32 }
 0x50e   :  { %v2790_v8 = vadd.f32 %v2789_v5, %v2701_v12  ;;  %2828 = vmatmul.bf16.gmra.mxu1 %v5368_v10  ;;  %v6360_v12 = vld [vmem:[#allocation34_spill] sm:$0xff] }
 0x50f   :  { %v3067_v62 = vmax.f32 %v2965_v37, 0.0  ;;  %2917 = vmatmul.bf16.gmra.mxu2 %v5375_v18  ;;  %3006 = vmatmul.bf16.gmra.mxu3 %v5379_v28 }
 0x511   :  { %v5930_v31 = vpack.c.bf16 %v3067_v62, %v3063_v7  ;;  %v6362_v7 = vld [vmem:[#allocation66_spill] sm:$0xff] }
 0x512   :  { %v2878_v0 = vpop.f32.mrf.mxu2  ;;  %v2967_v24 = vpop.f32.mrf.mxu3 }
 0x513   :  { %v2879_v44 = vadd.f32 %v2878_v0, %v2790_v8  ;;  %v2702_v15 = vpop.f32.mrf.mxu0  ;;  %v2791_v9 = vpop.f32.mrf.mxu1  ;;  %v6361_v8 = vld [vmem:[#allocation49_spill] sm:$0xff] }
 0x514   :  { %v2703_v41 = vadd.f32 %v2702_v15, %v5831_v30 }
 0x515   :  { %v2968_v17 = vadd.f32 %v2967_v24, %v2879_v44 }
 0x516   :  { %v2792_v27 = vadd.f32 %v2791_v9, %v2703_v41 }
 0x517   :  { %v3071_v11 = vmax.f32 %v2968_v17, 0.0 }
 0x51a   :  { %v2880_v32 = vpop.f32.mrf.mxu2  ;;  %v2969_v19 = vpop.f32.mrf.mxu3 }
 0x51b   :  { %v2881_v14 = vadd.f32 %v2880_v32, %v2792_v27  ;;  %v2705_v25 = vpop.f32.mrf.mxu0  ;;  %v2794_v18 = vpop.f32.mrf.mxu1 }
 0x51c   :  { %v2706_v10 = vadd.f32 %v2705_v25, %v5831_v30 }
 0x51d   :  { %v2970_v6 = vadd.f32 %v2969_v19, %v2881_v14  ;;  %3472 = vmatmul.bf16.vlgmr.msrb.gmra.mxu0 %v6357_v63 }
 0x51e   :  { %v2795_v28 = vadd.f32 %v2794_v18, %v2706_v10  ;;  %3561 = vmatmul.bf16.vlgmr.msrb.gmra.mxu1 %v6358_v35  ;;  %v6365_v35 = vld [vmem:[#allocation67_spill] sm:$0xff] }
 0x51f   :  { %v3075_v53 = vmax.f32 %v2970_v6, 0.0  ;;  %3650 = vmatmul.bf16.vlgmr.msrb.gmra.mxu2 %v6359_v39  ;;  %3739 = vmatmul.bf16.vlgmr.msrb.gmra.mxu3 %v5858_v61 }
 0x521   :  { %v5938_v23 = vpack.c.bf16 %v3075_v53, %v3071_v11  ;;  %v6364_v53 = vld [vmem:[#allocation50_spill] sm:$0xff] }
 0x522   :  { %v2883_v54 = vpop.f32.mrf.mxu2  ;;  %v2972_v49 = vpop.f32.mrf.mxu3 }
 0x523   :  { %v2884_v22 = vadd.f32 %v2883_v54, %v2795_v28  ;;  %v2707_v57 = vpop.f32.mrf.mxu0  ;;  %v2796_v33 = vpop.f32.mrf.mxu1  ;;  %v6363_v28 = vld [vmem:[#allocation35_spill] sm:$0xff] }
 0x524   :  { %v2708_v48 = vadd.f32 %v2707_v57, %v5831_v30 }
 0x525   :  { %v2973_v55 = vadd.f32 %v2972_v49, %v2884_v22 }
 0x526   :  { %v2797_v42 = vadd.f32 %v2796_v33, %v2708_v48 }
 0x527   :  { %v3079_v5 = vmax.f32 %v2973_v55, 0.0 }
 0x52a   :  { %v2885_v56 = vpop.f32.mrf.mxu2  ;;  %v2974_v20 = vpop.f32.mrf.mxu3 }
 0x52b   :  { %v2886_v47 = vadd.f32 %v2885_v56, %v2797_v42  ;;  %v2710_v34 = vpop.f32.mrf.mxu0  ;;  %v2799_v16 = vpop.f32.mrf.mxu1 }
 0x52c   :  { %v2711_v1 = vadd.f32 %v2710_v34, %v5831_v30 }
 0x52d   :  { %v2975_v3 = vadd.f32 %v2974_v20, %v2886_v47  ;;  %3477 = vmatmul.bf16.gmra.mxu0 %v6360_v12 }
 0x52e   :  { %v2800_v61 = vadd.f32 %v2799_v16, %v2711_v1  ;;  %3566 = vmatmul.bf16.gmra.mxu1 %v6361_v8 }
 0x52f   :  { %v3083_v37 = vmax.f32 %v2975_v3, 0.0  ;;  %3655 = vmatmul.bf16.gmra.mxu2 %v6362_v7  ;;  %3744 = vmatmul.bf16.gmra.mxu3 %v5875_v45 }
 0x531   :  { %v5946_v62 = vpack.c.bf16 %v3083_v37, %v3079_v5  ;;  %v6367_v37 = vld [vmem:[#allocation51_spill] sm:$0xff] }
 0x532   :  { %v2888_v0 = vpop.f32.mrf.mxu2  ;;  %v2977_v24 = vpop.f32.mrf.mxu3 }
 0x533   :  { %v2889_v44 = vadd.f32 %v2888_v0, %v2800_v61  ;;  %v2712_v15 = vpop.f32.mrf.mxu0  ;;  %v2801_v9 = vpop.f32.mrf.mxu1  ;;  %v6366_v61 = vld [vmem:[#allocation36_spill] sm:$0xff] }
 0x534   :  { %v2713_v41 = vadd.f32 %v2712_v15, %v5831_v30 }
 0x535   :  { %v2978_v17 = vadd.f32 %v2977_v24, %v2889_v44 }
 0x536   :  { %v2802_v27 = vadd.f32 %v2801_v9, %v2713_v41 }
 0x537   :  { %v3087_v63 = vmax.f32 %v2978_v17, 0.0 }
 0x53a   :  { %v2890_v32 = vpop.f32.mrf.mxu2  ;;  %v2979_v19 = vpop.f32.mrf.mxu3 }
 0x53b   :  { %v2891_v14 = vadd.f32 %v2890_v32, %v2802_v27  ;;  %v2715_v25 = vpop.f32.mrf.mxu0  ;;  %v2804_v18 = vpop.f32.mrf.mxu1 }
 0x53c   :  { %v2716_v10 = vadd.f32 %v2715_v25, %v5831_v30 }
 0x53d   :  { %v2980_v6 = vadd.f32 %v2979_v19, %v2891_v14  ;;  %3482 = vmatmul.bf16.gmra.mxu0 %v6363_v28  ;;  %v6369_v28 = vld [vmem:[#allocation52_spill] sm:$0xff] }
 0x53e   :  { %v2805_v45 = vadd.f32 %v2804_v18, %v2716_v10  ;;  %3571 = vmatmul.bf16.gmra.mxu1 %v6364_v53  ;;  %v6368_v18 = vld [vmem:[#allocation37_spill] sm:$0xff] }
 0x53f   :  { %v3091_v11 = vmax.f32 %v2980_v6, 0.0  ;;  %3660 = vmatmul.bf16.gmra.mxu2 %v6365_v35  ;;  %3749 = vmatmul.bf16.gmra.mxu3 %v5886_v2 }
 0x541   :  { %v5954_v39 = vpack.c.bf16 %v3091_v11, %v3087_v63 }
 0x542   :  { %v2893_v54 = vpop.f32.mrf.mxu2  ;;  %v2982_v49 = vpop.f32.mrf.mxu3 }
 0x543   :  { %v2894_v22 = vadd.f32 %v2893_v54, %v2805_v45  ;;  %v2717_v57 = vpop.f32.mrf.mxu0  ;;  %v2806_v33 = vpop.f32.mrf.mxu1 }
 0x544   :  { %v2718_v48 = vadd.f32 %v2717_v57, %v5831_v30 }
 0x545   :  { %v2983_v55 = vadd.f32 %v2982_v49, %v2894_v22 }
 0x546   :  { %v2807_v42 = vadd.f32 %v2806_v33, %v2718_v48 }
 0x547   :  { %v3095_v12 = vmax.f32 %v2983_v55, 0.0 }
 0x54a   :  { %v2895_v56 = vpop.f32.mrf.mxu2  ;;  %v2984_v20 = vpop.f32.mrf.mxu3 }
 0x54b   :  { %v2896_v47 = vadd.f32 %v2895_v56, %v2807_v42  ;;  %v2720_v34 = vpop.f32.mrf.mxu0  ;;  %v2809_v16 = vpop.f32.mrf.mxu1 }
 0x54c   :  { %v2721_v1 = vadd.f32 %v2720_v34, %v5831_v30  ;;  %v6370_v34 = vld [vmem:[#allocation38_spill] sm:$0xff] }
 0x54d   :  { %v2985_v3 = vadd.f32 %v2984_v20, %v2896_v47  ;;  %3487 = vmatmul.bf16.gmra.mxu0 %v6366_v61 }
 0x54e   :  { %v2810_v2 = vadd.f32 %v2809_v16, %v2721_v1  ;;  %3576 = vmatmul.bf16.gmra.mxu1 %v6367_v37 }
 0x54f   :  { %v3099_v5 = vmax.f32 %v2985_v3, 0.0  ;;  %3665 = vmatmul.bf16.gmra.mxu2 %v5679_v46  ;;  %3754 = vmatmul.bf16.gmra.mxu3 %v5903_v21  ;;  %v6371_v3 = vld [vmem:[#allocation53_spill] sm:$0xff] }
 0x551   :  { %v5962_v8 = vpack.c.bf16 %v3099_v5, %v3095_v12 }
 0x552   :  { %v2898_v7 = vpop.f32.mrf.mxu2  ;;  %v2987_v44 = vpop.f32.mrf.mxu3 }
 0x553   :  { %v2899_v0 = vadd.f32 %v2898_v7, %v2810_v2  ;;  %v2722_v24 = vpop.f32.mrf.mxu0  ;;  %v2811_v41 = vpop.f32.mrf.mxu1 }
 0x554   :  { %v2723_v15 = vadd.f32 %v2722_v24, %v5831_v30 }
 0x555   :  { %v2988_v9 = vadd.f32 %v2987_v44, %v2899_v0 }
 0x556   :  { %v2812_v17 = vadd.f32 %v2811_v41, %v2723_v15 }
 0x557   :  { %v3103_v6 = vmax.f32 %v2988_v9, 0.0 }
 0x55a   :  { %v2900_v27 = vpop.f32.mrf.mxu2  ;;  %v2989_v14 = vpop.f32.mrf.mxu3 }
 0x55b   :  { %v2901_v32 = vadd.f32 %v2900_v27, %v2812_v17  ;;  %v2725_v19 = vpop.f32.mrf.mxu0  ;;  %v2814_v46 = vpop.f32.mrf.mxu1 }
 0x55c   :  { %v2726_v25 = vadd.f32 %v2725_v19, %v5831_v30 }
 0x55d   :  { %v2990_v10 = vadd.f32 %v2989_v14, %v2901_v32  ;;  %3492 = vmatmul.bf16.gmra.mxu0 %v6368_v18  ;;  %v6372_v14 = vld [vmem:[#allocation39_spill] sm:$0xff] }
 0x55e   :  { %v2815_v21 = vadd.f32 %v2814_v46, %v2726_v25  ;;  %3581 = vmatmul.bf16.gmra.mxu1 %v6369_v28  ;;  %v6373_v46 = vld [vmem:[#allocation54_spill] sm:$0xff] }
 0x55f   :  { %v3107_v45 = vmax.f32 %v2990_v10, 0.0  ;;  %3670 = vmatmul.bf16.gmra.mxu2 %v5687_v29  ;;  %3759 = vmatmul.bf16.gmra.mxu3 %v5914_v4 }
 0x561   :  { %v5970_v63 = vpack.c.bf16 %v3107_v45, %v3103_v6 }
 0x562   :  { %v2903_v11 = vpop.f32.mrf.mxu2  ;;  %v2992_v35 = vpop.f32.mrf.mxu3 }
 0x563   :  { %v2904_v53 = vadd.f32 %v2903_v11, %v2815_v21  ;;  %v2727_v54 = vpop.f32.mrf.mxu0  ;;  %v2816_v49 = vpop.f32.mrf.mxu1 }
 0x564   :  { %v2728_v22 = vadd.f32 %v2727_v54, %v5831_v30 }
 0x565   :  { %v2993_v57 = vadd.f32 %v2992_v35, %v2904_v53 }
 0x566   :  { %v2817_v48 = vadd.f32 %v2816_v49, %v2728_v22 }
 0x567   :  { %v3111_v1 = vmax.f32 %v2993_v57, 0.0 }
 0x56a   :  { %v2905_v33 = vpop.f32.mrf.mxu2  ;;  %v2994_v42 = vpop.f32.mrf.mxu3 }
 0x56b   :  { %v2906_v55 = vadd.f32 %v2905_v33, %v2817_v48  ;;  %v2730_v56 = vpop.f32.mrf.mxu0  ;;  %v2819_v29 = vpop.f32.mrf.mxu1 }
 0x56c   :  { %v2731_v47 = vadd.f32 %v2730_v56, %v5831_v30 }
 0x56d   :  { %v2995_v20 = vadd.f32 %v2994_v42, %v2906_v55  ;;  %3497 = vmatmul.bf16.gmra.mxu0 %v6370_v34  ;;  %v6374_v55 = vld [vmem:[#allocation40_spill] sm:$0xff] }
 0x56e   :  { %v2820_v4 = vadd.f32 %v2819_v29, %v2731_v47  ;;  %3586 = vmatmul.bf16.gmra.mxu1 %v6371_v3  ;;  %v6375_v47 = vld [vmem:[#allocation55_spill] sm:$0xff] }
 0x56f   :  { %v3115_v16 = vmax.f32 %v2995_v20, 0.0  ;;  %3675 = vmatmul.bf16.gmra.mxu2 %v5704_v50  ;;  %3764 = vmatmul.bf16.gmra.mxu3 %v5922_v40 }
 0x571   :  { %v5978_v2 = vpack.c.bf16 %v3115_v16, %v3111_v1 }
 0x572   :  { %v2908_v61 = vpop.f32.mrf.mxu2  ;;  %v2997_v5 = vpop.f32.mrf.mxu3 }
 0x573   :  { %v2909_v12 = vadd.f32 %v2908_v61, %v2820_v4  ;;  %v2732_v37 = vpop.f32.mrf.mxu0  ;;  %v2821_v0 = vpop.f32.mrf.mxu1 }
 0x574   :  { %v2733_v7 = vadd.f32 %v2732_v37, %v5831_v30 }
 0x575   :  { %v2998_v44 = vadd.f32 %v2997_v5, %v2909_v12  ;;  %v6000_v5 = vld [vmem:[%s6170_s6] ss:$0 sm:$0xff] }
 0x576   :  { %v2822_v24 = vadd.f32 %v2821_v0, %v2733_v7 }
 0x577   :  { %v3119_v19 = vmax.f32 %v2998_v44, 0.0 }
 0x57a   :  { %v2910_v15 = vpop.f32.mrf.mxu2  ;;  %v2999_v9 = vpop.f32.mrf.mxu3 }
 0x57b   :  { %v2911_v41 = vadd.f32 %v2910_v15, %v2822_v24  ;;  %v2735_v17 = vpop.f32.mrf.mxu0  ;;  %v2824_v50 = vpop.f32.mrf.mxu1  ;;  %v6376_v15 = vld [vmem:[#allocation41_spill] sm:$0xff] }
 0x57c   :  { %v2736_v27 = vadd.f32 %v2735_v17, %v5831_v30 }
 0x57d   :  { %v3000_v32 = vadd.f32 %v2999_v9, %v2911_v41  ;;  %3502 = vmatmul.bf16.gmra.mxu0 %v6372_v14  ;;  %v6377_v9 = vld [vmem:[#allocation56_spill] sm:$0xff] }
 0x57e   :  { %v2825_v40 = vadd.f32 %v2824_v50, %v2736_v27  ;;  %3591 = vmatmul.bf16.gmra.mxu1 %v6373_v46 }
 0x57f   :  { %v3123_v25 = vmax.f32 %v3000_v32, 0.0  ;;  %3680 = vmatmul.bf16.gmra.mxu2 %v5715_v52  ;;  %3769 = vmatmul.bf16.gmra.mxu3 %v5930_v31 }
 0x581   :  { %v5986_v10 = vpack.c.bf16 %v3123_v25, %v3119_v19 }
 0x582   :  { %v2913_v21 = vpop.f32.mrf.mxu2  ;;  %v3002_v6 = vpop.f32.mrf.mxu3 }
 0x583   :  { %v2914_v18 = vadd.f32 %v2913_v21, %v2825_v40  ;;  %v2737_v45 = vpop.f32.mrf.mxu0  ;;  %v2826_v11 = vpop.f32.mrf.mxu1 }
 0x584   :  { %v2738_v28 = vadd.f32 %v2737_v45, %v5831_v30 }
 0x585   :  { %v3003_v53 = vadd.f32 %v3002_v6, %v2914_v18 }
 0x586   :  { %v2827_v35 = vadd.f32 %v2826_v11, %v2738_v28 }
 0x587   :  { %v3127_v42 = vmax.f32 %v3003_v53, 0.0  ;;  %v6378_v53 = vld [vmem:[#allocation42_spill] sm:$0xff] }
 0x58a   :  { %v2915_v54 = vpop.f32.mrf.mxu2  ;;  %v3004_v49 = vpop.f32.mrf.mxu3 }
 0x58b   :  { %v2916_v22 = vadd.f32 %v2915_v54, %v2827_v35  ;;  %v2740_v57 = vpop.f32.mrf.mxu0  ;;  %v2829_v52 = vpop.f32.mrf.mxu1  ;;  %v6379_v35 = vld [vmem:[#allocation57_spill] sm:$0xff] }
 0x58c   :  { %v2741_v48 = vadd.f32 %v2740_v57, %v5831_v30 }
 0x58d   :  { %v3005_v33 = vadd.f32 %v3004_v49, %v2916_v22  ;;  %3507 = vmatmul.bf16.gmra.mxu0 %v6374_v55 }
 0x58e   :  { %v2830_v31 = vadd.f32 %v2829_v52, %v2741_v48  ;;  %3596 = vmatmul.bf16.gmra.mxu1 %v6375_v47 }
 0x58f   :  { %v3131_v56 = vmax.f32 %v3005_v33, 0.0  ;;  %3685 = vmatmul.bf16.gmra.mxu2 %v5732_v36  ;;  %3774 = vmatmul.bf16.gmra.mxu3 %v5938_v23 }
 0x591   :  { %v5994_v29 = vpack.c.bf16 %v3131_v56, %v3127_v42 }
 0x592   :  { %v2918_v20 = vpop.f32.mrf.mxu2  ;;  %v3007_v34 = vpop.f32.mrf.mxu3 }
 0x593   :  { %v2919_v4 = vadd.f32 %v2918_v20, %v2830_v31  ;;  %v2742_v1 = vpop.f32.mrf.mxu0  ;;  %v2831_v3 = vpop.f32.mrf.mxu1 }
 0x594   :  { %v2743_v16 = vadd.f32 %v2742_v1, %v5831_v30  ;;  %v6381_v1 = vld [vmem:[#allocation58_spill] sm:$0xff] }
 0x595   :  { %v3008_v61 = vadd.f32 %v3007_v34, %v2919_v4  ;;  %v6380_v34 = vld [vmem:[#allocation43_spill] sm:$0xff] }
 0x596   :  { %v2832_v12 = vadd.f32 %v2831_v3, %v2743_v16 }
 0x597   :  { %v3135_v41 = vmax.f32 %v3008_v61, 0.0 }
 0x59a   :  { %v2920_v37 = vpop.f32.mrf.mxu2  ;;  %v3009_v7 = vpop.f32.mrf.mxu3 }
 0x59b   :  { %v2921_v36 = vadd.f32 %v2920_v37, %v2832_v12  ;;  %v3473_v23 = vpop.f32.mrf.mxu0  ;;  %v3562_v0 = vpop.f32.mrf.mxu1 }
 0x59c   :  { %v3474_v24 = vadd.f32 %v6000_v5, %v3473_v23 }
 0x59d   :  { %v3010_v44 = vadd.f32 %v3009_v7, %v2921_v36  ;;  %3512 = vmatmul.bf16.gmra.mxu0 %v6376_v15 }
 0x59e   :  { %3601 = vmatmul.bf16.gmra.mxu1 %v6377_v9  ;;  %v3563_v17 = vadd.f32 %v3562_v0, %v3474_v24  ;;  %v6382_v9 = vld [vmem:[#allocation44_spill] sm:$0xff] }
 0x59f   :  { %v3139_v30 = vmax.f32 %v3010_v44, 0.0  ;;  %3690 = vmatmul.bf16.gmra.mxu2 %v5743_v51  ;;  %3779 = vmatmul.bf16.gmra.mxu3 %v5946_v62 }
 0x5a1   :  { %v6007_v27 = vpack.c.bf16 %v3139_v30, %v3135_v41 }
 0x5a2   :  { %v3651_v50 = vpop.f32.mrf.mxu2  ;;  %v3740_v40 = vpop.f32.mrf.mxu3 }
 0x5a3   :  { %v3652_v32 = vadd.f32 %v3651_v50, %v3563_v17  ;;  %v3475_v14 = vpop.f32.mrf.mxu0  ;;  %v3564_v19 = vpop.f32.mrf.mxu1  ;;  %v6383_v17 = vld [vmem:[#allocation59_spill] sm:$0xff] }
 0x5a4   :  { %v3476_v46 = vadd.f32 %v6000_v5, %v3475_v14 }
 0x5a5   :  { %v3741_v25 = vadd.f32 %v3740_v40, %v3652_v32 }
 0x5a6   :  { %v3565_v21 = vadd.f32 %v3564_v19, %v3476_v46 }
 0x5a7   :  { %3820 = vst [vmem:[%s6171_s7] sm:$0xff] %v3741_v25 }
 0x5aa   :  { %v3653_v18 = vpop.f32.mrf.mxu2  ;;  %v3742_v6 = vpop.f32.mrf.mxu3 }
 0x5ab   :  { %v3654_v51 = vadd.f32 %v3653_v18, %v3565_v21  ;;  %v3478_v62 = vpop.f32.mrf.mxu0  ;;  %v3567_v45 = vpop.f32.mrf.mxu1 }
 0x5ac   :  { %v3479_v11 = vadd.f32 %v6000_v5, %v3478_v62 }
 0x5ad   :  { %v3743_v28 = vadd.f32 %v3742_v6, %v3654_v51  ;;  %3517 = vmatmul.bf16.gmra.mxu0 %v6378_v53  ;;  %v6385_v53 = vld [vmem:[#allocation60_spill] sm:$0xff] }
 0x5ae   :  { %3606 = vmatmul.bf16.gmra.mxu1 %v6379_v35  ;;  %v3568_v54 = vadd.f32 %v3567_v45, %v3479_v11  ;;  %v6384_v11 = vld [vmem:[#allocation45_spill] sm:$0xff] }
 0x5af   :  { %3821 = vst [vmem:[%s6171_s7 + $0x8] sm:$0xff] %v3743_v28  ;;  %3695 = vmatmul.bf16.gmra.mxu2 %v5760_v26  ;;  %3784 = vmatmul.bf16.gmra.mxu3 %v5954_v39 }
 0x5b2   :  { %v3656_v22 = vpop.f32.mrf.mxu2  ;;  %v3745_v57 = vpop.f32.mrf.mxu3 }
 0x5b3   :  { %v3657_v49 = vadd.f32 %v3656_v22, %v3568_v54  ;;  %v3480_v48 = vpop.f32.mrf.mxu0  ;;  %v3569_v52 = vpop.f32.mrf.mxu1 }
 0x5b4   :  { %v3481_v31 = vadd.f32 %v6000_v5, %v3480_v48 }
 0x5b5   :  { %v3746_v33 = vadd.f32 %v3745_v57, %v3657_v49 }
 0x5b6   :  { %v3570_v55 = vadd.f32 %v3569_v52, %v3481_v31 }
 0x5b7   :  { %3822 = vst [vmem:[%s6171_s7 + $0x10] sm:$0xff] %v3746_v33 }
 0x5ba   :  { %v3658_v42 = vpop.f32.mrf.mxu2  ;;  %v3747_v47 = vpop.f32.mrf.mxu3 }
 0x5bb   :  { %v3659_v56 = vadd.f32 %v3658_v42, %v3570_v55  ;;  %v3483_v26 = vpop.f32.mrf.mxu0  ;;  %v3572_v20 = vpop.f32.mrf.mxu1 }
 0x5bc   :  { %v3484_v4 = vadd.f32 %v6000_v5, %v3483_v26 }
 0x5bd   :  { %v3748_v39 = vadd.f32 %v3747_v47, %v3659_v56  ;;  %3522 = vmatmul.bf16.gmra.mxu0 %v6380_v34 }
 0x5be   :  { %3611 = vmatmul.bf16.gmra.mxu1 %v6381_v1  ;;  %v3573_v16 = vadd.f32 %v3572_v20, %v3484_v4  ;;  %v6386_v20 = vld [vmem:[#allocation46_spill] sm:$0xff] }
 0x5bf   :  { %3823 = vst [vmem:[%s6171_s7 + $0x18] sm:$0xff] %v3748_v39  ;;  %3700 = vmatmul.bf16.gmra.mxu2 %v5771_v38  ;;  %3789 = vmatmul.bf16.gmra.mxu3 %v5962_v8  ;;  %v6387_v39 = vld [vmem:[#allocation61_spill] sm:$0xff] }
 0x5c2   :  { %v3661_v3 = vpop.f32.mrf.mxu2  ;;  %v3750_v12 = vpop.f32.mrf.mxu3 }
 0x5c3   :  { %v3662_v61 = vadd.f32 %v3661_v3, %v3573_v16  ;;  %v3485_v37 = vpop.f32.mrf.mxu0  ;;  %v3574_v36 = vpop.f32.mrf.mxu1 }
 0x5c4   :  { %v3486_v23 = vadd.f32 %v6000_v5, %v3485_v37 }
 0x5c5   :  { %v3751_v7 = vadd.f32 %v3750_v12, %v3662_v61 }
 0x5c6   :  { %v3575_v0 = vadd.f32 %v3574_v36, %v3486_v23 }
 0x5c7   :  { %3824 = vst [vmem:[%s6171_s7 + $0x20] sm:$0xff] %v3751_v7 }
 0x5ca   :  { %v3663_v44 = vpop.f32.mrf.mxu2  ;;  %v3752_v15 = vpop.f32.mrf.mxu3 }
 0x5cb   :  { %v3664_v24 = vadd.f32 %v3663_v44, %v3575_v0  ;;  %v3488_v38 = vpop.f32.mrf.mxu0  ;;  %v3577_v41 = vpop.f32.mrf.mxu1 }
 0x5cc   :  { %v3489_v30 = vadd.f32 %v6000_v5, %v3488_v38  ;;  %v6389_v38 = vld [vmem:[#allocation62_spill] sm:$0xff] }
 0x5cd   :  { %v3753_v8 = vadd.f32 %v3752_v15, %v3664_v24  ;;  %3527 = vmatmul.bf16.gmra.mxu0 %v6382_v9  ;;  %v6388_v15 = vld [vmem:[#allocation47_spill] sm:$0xff] }
 0x5ce   :  { %3616 = vmatmul.bf16.gmra.mxu1 %v6383_v17  ;;  %v3578_v50 = vadd.f32 %v3577_v41, %v3489_v30 }
 0x5cf   :  { %3825 = vst [vmem:[%s6171_s7 + $0x28] sm:$0xff] %v3753_v8  ;;  %3705 = vmatmul.bf16.gmra.mxu2 %v5788_v13  ;;  %3794 = vmatmul.bf16.gmra.mxu3 %v5970_v63 }
 0x5d2   :  { %v3666_v32 = vpop.f32.mrf.mxu2  ;;  %v3755_v14 = vpop.f32.mrf.mxu3 }
 0x5d3   :  { %v3667_v40 = vadd.f32 %v3666_v32, %v3578_v50  ;;  %v3490_v19 = vpop.f32.mrf.mxu0  ;;  %v3579_v25 = vpop.f32.mrf.mxu1 }
 0x5d4   :  { %v3491_v21 = vadd.f32 %v6000_v5, %v3490_v19 }
 0x5d5   :  { %v3756_v46 = vadd.f32 %v3755_v14, %v3667_v40 }
 0x5d6   :  { %v3580_v18 = vadd.f32 %v3579_v25, %v3491_v21 }
 0x5d7   :  { %3826 = vst [vmem:[%s6171_s7 + $0x30] sm:$0xff] %v3756_v46 }
 0x5da   :  { %v3668_v51 = vpop.f32.mrf.mxu2  ;;  %v3757_v62 = vpop.f32.mrf.mxu3 }
 0x5db   :  { %v3669_v6 = vadd.f32 %v3668_v51, %v3580_v18  ;;  %v3493_v13 = vpop.f32.mrf.mxu0  ;;  %v3582_v45 = vpop.f32.mrf.mxu1  ;;  %v6390_v51 = vld [vmem:[#allocation32_spill] sm:$0xff] }
 0x5dc   :  { %v3494_v28 = vadd.f32 %v6000_v5, %v3493_v13 }
 0x5dd   :  { %v3758_v63 = vadd.f32 %v3757_v62, %v3669_v6  ;;  %3532 = vmatmul.bf16.gmra.mxu0 %v6384_v11  ;;  %v6391_v6 = vld [vmem:[#allocation64_spill] sm:$0xff] }
 0x5de   :  { %3621 = vmatmul.bf16.gmra.mxu1 %v6385_v53  ;;  %v3583_v35 = vadd.f32 %v3582_v45, %v3494_v28 }
 0x5df   :  { %3827 = vst [vmem:[%s6171_s7 + $0x38] sm:$0xff] %v3758_v63  ;;  %3710 = vmatmul.bf16.gmra.mxu2 %v5799_v59  ;;  %3799 = vmatmul.bf16.gmra.mxu3 %v5978_v2 }
 0x5e2   :  { %v3671_v54 = vpop.f32.mrf.mxu2  ;;  %v3760_v49 = vpop.f32.mrf.mxu3 }
 0x5e3   :  { %v3672_v22 = vadd.f32 %v3671_v54, %v3583_v35  ;;  %v3495_v57 = vpop.f32.mrf.mxu0  ;;  %v3584_v48 = vpop.f32.mrf.mxu1 }
 0x5e4   :  { %v3496_v33 = vadd.f32 %v6000_v5, %v3495_v57 }
 0x5e5   :  { %v3761_v52 = vadd.f32 %v3760_v49, %v3672_v22 }
 0x5e6   :  { %v3585_v31 = vadd.f32 %v3584_v48, %v3496_v33 }
 0x5e7   :  { %3828 = vst [vmem:[%s6171_s7 + $0x40] sm:$0xff] %v3761_v52 }
 0x5ea   :  { %v3673_v55 = vpop.f32.mrf.mxu2  ;;  %v3762_v56 = vpop.f32.mrf.mxu3 }
 0x5eb   :  { %v3674_v42 = vadd.f32 %v3673_v55, %v3585_v31  ;;  %v3498_v59 = vpop.f32.mrf.mxu0  ;;  %v3587_v47 = vpop.f32.mrf.mxu1 }
 0x5ec   :  { %v3499_v26 = vadd.f32 %v6000_v5, %v3498_v59 }
 0x5ed   :  { %v3763_v2 = vadd.f32 %v3762_v56, %v3674_v42  ;;  %3537 = vmatmul.bf16.gmra.mxu0 %v6386_v20 }
 0x5ee   :  { %3626 = vmatmul.bf16.gmra.mxu1 %v6387_v39  ;;  %v3588_v4 = vadd.f32 %v3587_v47, %v3499_v26 }
 0x5ef   :  { %3829 = vst [vmem:[%s6171_s7 + $0x48] sm:$0xff] %v3763_v2  ;;  %3715 = vmatmul.bf16.gmra.mxu2 %v5816_v60  ;;  %3804 = vmatmul.bf16.gmra.mxu3 %v5986_v10 }
 0x5f2   :  { %v3676_v34 = vpop.f32.mrf.mxu2  ;;  %v3765_v16 = vpop.f32.mrf.mxu3 }
 0x5f3   :  { %v3677_v1 = vadd.f32 %v3676_v34, %v3588_v4  ;;  %v3500_v3 = vpop.f32.mrf.mxu0  ;;  %v3589_v61 = vpop.f32.mrf.mxu1 }
 0x5f4   :  { %v3501_v37 = vadd.f32 %v6000_v5, %v3500_v3 }
 0x5f5   :  { %v3766_v12 = vadd.f32 %v3765_v16, %v3677_v1 }
 0x5f6   :  { %v3590_v36 = vadd.f32 %v3589_v61, %v3501_v37 }
 0x5f7   :  { %3830 = vst [vmem:[%s6171_s7 + $0x50] sm:$0xff] %v3766_v12 }
 0x5fa   :  { %v3678_v7 = vpop.f32.mrf.mxu2  ;;  %v3767_v0 = vpop.f32.mrf.mxu3 }
 0x5fb   :  { %v3679_v23 = vadd.f32 %v3678_v7, %v3590_v36  ;;  %v3503_v60 = vpop.f32.mrf.mxu0  ;;  %v3592_v44 = vpop.f32.mrf.mxu1 }
 0x5fc   :  { %v3504_v24 = vadd.f32 %v6000_v5, %v3503_v60 }
 0x5fd   :  { %v3768_v10 = vadd.f32 %v3767_v0, %v3679_v23  ;;  %3542 = vmatmul.bf16.gmra.mxu0 %v6388_v15 }
 0x5fe   :  { %3631 = vmatmul.bf16.gmra.mxu1 %v6389_v38  ;;  %v3593_v41 = vadd.f32 %v3592_v44, %v3504_v24 }
 0x5ff   :  { %3831 = vst [vmem:[%s6171_s7 + $0x58] sm:$0xff] %v3768_v10  ;;  %3720 = vmatmul.bf16.gmra.mxu2 %v5827_v58  ;;  %3809 = vmatmul.bf16.gmra.mxu3 %v5994_v29 }
 0x602   :  { %v3681_v8 = vpop.f32.mrf.mxu2  ;;  %v3770_v9 = vpop.f32.mrf.mxu3 }
 0x603   :  { %v3682_v30 = vadd.f32 %v3681_v8, %v3593_v41  ;;  %v3505_v17 = vpop.f32.mrf.mxu0  ;;  %v3594_v50 = vpop.f32.mrf.mxu1 }
 0x604   :  { %v3506_v40 = vadd.f32 %v6000_v5, %v3505_v17 }
 0x605   :  { %v3771_v32 = vadd.f32 %v3770_v9, %v3682_v30 }
 0x606   :  { %v3595_v14 = vadd.f32 %v3594_v50, %v3506_v40 }
 0x607   :  { %3832 = vst [vmem:[%s6171_s7 + $0x60] sm:$0xff] %v3771_v32 }
 0x60a   :  { %v3683_v19 = vpop.f32.mrf.mxu2  ;;  %v3772_v46 = vpop.f32.mrf.mxu3 }
 0x60b   :  { %v3684_v25 = vadd.f32 %v3683_v19, %v3595_v14  ;;  %v3508_v58 = vpop.f32.mrf.mxu0  ;;  %v3597_v21 = vpop.f32.mrf.mxu1 }
 0x60c   :  { %v3509_v18 = vadd.f32 %v6000_v5, %v3508_v58 }
 0x60d   :  { %v3773_v29 = vadd.f32 %v3772_v46, %v3684_v25  ;;  %3547 = vmatmul.bf16.gmra.mxu0 %v6390_v51 }
 0x60e   :  { %3636 = vmatmul.bf16.gmra.mxu1 %v6391_v6  ;;  %v3598_v62 = vadd.f32 %v3597_v21, %v3509_v18 }
 0x60f   :  { %3833 = vst [vmem:[%s6171_s7 + $0x68] sm:$0xff] %v3773_v29  ;;  %3725 = vmatmul.bf16.gmra.mxu2 %v5847_v43  ;;  %3814 = vmatmul.bf16.gmra.mxu3 %v6007_v27 }
 0x612   :  { %v3686_v13 = vpop.f32.mrf.mxu2  ;;  %v3775_v63 = vpop.f32.mrf.mxu3 }
 0x613   :  { %v3687_v45 = vadd.f32 %v3686_v13, %v3598_v62  ;;  %v3510_v28 = vpop.f32.mrf.mxu0  ;;  %v3599_v11 = vpop.f32.mrf.mxu1 }
 0x614   :  { %v3511_v35 = vadd.f32 %v6000_v5, %v3510_v28 }
 0x615   :  { %v3776_v53 = vadd.f32 %v3775_v63, %v3687_v45 }
 0x616   :  { %v3600_v54 = vadd.f32 %v3599_v11, %v3511_v35 }
 0x617   :  { %3834 = vst [vmem:[%s6171_s7 + $0x70] sm:$0xff] %v3776_v53 }
 0x61a   :  { %v3688_v22 = vpop.f32.mrf.mxu2  ;;  %v3777_v57 = vpop.f32.mrf.mxu3 }
 0x61b   :  { %v3689_v49 = vadd.f32 %v3688_v22, %v3600_v54  ;;  %v3513_v43 = vpop.f32.mrf.mxu0  ;;  %v3602_v48 = vpop.f32.mrf.mxu1 }
 0x61c   :  { %v3514_v52 = vadd.f32 %v6000_v5, %v3513_v43 }
 0x61d   :  { %v3778_v27 = vadd.f32 %v3777_v57, %v3689_v49 }
 0x61e   :  { %v3603_v33 = vadd.f32 %v3602_v48, %v3514_v52 }
 0x61f   :  { %3835 = vst [vmem:[%s6171_s7 + $0x78] sm:$0xff] %v3778_v27 }
 0x622   :  { %v3691_v31 = vpop.f32.mrf.mxu2  ;;  %v3780_v42 = vpop.f32.mrf.mxu3 }
 0x623   :  { %v3692_v55 = vadd.f32 %v3691_v31, %v3603_v33  ;;  %v3515_v56 = vpop.f32.mrf.mxu0  ;;  %v3604_v59 = vpop.f32.mrf.mxu1 }
 0x624   :  { %v3516_v2 = vadd.f32 %v6000_v5, %v3515_v56 }
 0x625   :  { %v3781_v47 = vadd.f32 %v3780_v42, %v3692_v55 }
 0x626   :  { %v3605_v26 = vadd.f32 %v3604_v59, %v3516_v2 }
 0x627   :  { %3836 = vst [vmem:[%s6171_s7 + $0x80] sm:$0xff] %v3781_v47 }
 0x62a   :  { %v3693_v20 = vpop.f32.mrf.mxu2  ;;  %v3782_v4 = vpop.f32.mrf.mxu3 }
 0x62b   :  { %v3694_v39 = vadd.f32 %v3693_v20, %v3605_v26  ;;  %v3518_v34 = vpop.f32.mrf.mxu0  ;;  %v3607_v1 = vpop.f32.mrf.mxu1 }
 0x62c   :  { %v3519_v3 = vadd.f32 %v6000_v5, %v3518_v34 }
 0x62d   :  { %v3783_v16 = vadd.f32 %v3782_v4, %v3694_v39 }
 0x62e   :  { %v3608_v61 = vadd.f32 %v3607_v1, %v3519_v3 }
 0x62f   :  { %3837 = vst [vmem:[%s6171_s7 + $0x88] sm:$0xff] %v3783_v16 }
 0x632   :  { %v3696_v12 = vpop.f32.mrf.mxu2  ;;  %v3785_v36 = vpop.f32.mrf.mxu3 }
 0x633   :  { %v3697_v37 = vadd.f32 %v3696_v12, %v3608_v61  ;;  %v3520_v7 = vpop.f32.mrf.mxu0  ;;  %v3609_v23 = vpop.f32.mrf.mxu1 }
 0x634   :  { %v3521_v60 = vadd.f32 %v6000_v5, %v3520_v7 }
 0x635   :  { %v3786_v0 = vadd.f32 %v3785_v36, %v3697_v37 }
 0x636   :  { %v3610_v44 = vadd.f32 %v3609_v23, %v3521_v60 }
 0x637   :  { %3838 = vst [vmem:[%s6171_s7 + $0x90] sm:$0xff] %v3786_v0 }
 0x63a   :  { %v3698_v10 = vpop.f32.mrf.mxu2  ;;  %v3787_v15 = vpop.f32.mrf.mxu3 }
 0x63b   :  { %v3699_v24 = vadd.f32 %v3698_v10, %v3610_v44  ;;  %v3523_v38 = vpop.f32.mrf.mxu0  ;;  %v3612_v41 = vpop.f32.mrf.mxu1 }
 0x63c   :  { %v3524_v30 = vadd.f32 %v6000_v5, %v3523_v38 }
 0x63d   :  { %v3788_v8 = vadd.f32 %v3787_v15, %v3699_v24 }
 0x63e   :  { %v3613_v9 = vadd.f32 %v3612_v41, %v3524_v30 }
 0x63f   :  { %3839 = vst [vmem:[%s6171_s7 + $0x98] sm:$0xff] %v3788_v8 }
 0x642   :  { %v3701_v17 = vpop.f32.mrf.mxu2  ;;  %v3790_v32 = vpop.f32.mrf.mxu3 }
 0x643   :  { %v3702_v50 = vadd.f32 %v3701_v17, %v3613_v9  ;;  %v3525_v40 = vpop.f32.mrf.mxu0  ;;  %v3614_v14 = vpop.f32.mrf.mxu1 }
 0x644   :  { %v3526_v25 = vadd.f32 %v6000_v5, %v3525_v40 }
 0x645   :  { %v3791_v19 = vadd.f32 %v3790_v32, %v3702_v50 }
 0x646   :  { %v3615_v46 = vadd.f32 %v3614_v14, %v3526_v25 }
 0x647   :  { %3840 = vst [vmem:[%s6171_s7 + $0xa0] sm:$0xff] %v3791_v19 }
 0x64a   :  { %v3703_v58 = vpop.f32.mrf.mxu2  ;;  %v3792_v29 = vpop.f32.mrf.mxu3 }
 0x64b   :  { %v3704_v21 = vadd.f32 %v3703_v58, %v3615_v46  ;;  %v3528_v18 = vpop.f32.mrf.mxu0  ;;  %v3617_v51 = vpop.f32.mrf.mxu1 }
 0x64c   :  { %v3529_v62 = vadd.f32 %v6000_v5, %v3528_v18 }
 0x64d   :  { %v3793_v6 = vadd.f32 %v3792_v29, %v3704_v21 }
 0x64e   :  { %v3618_v13 = vadd.f32 %v3617_v51, %v3529_v62 }
 0x64f   :  { %3841 = vst [vmem:[%s6171_s7 + $0xa8] sm:$0xff] %v3793_v6 }
 0x652   :  { %v3706_v45 = vpop.f32.mrf.mxu2  ;;  %v3795_v28 = vpop.f32.mrf.mxu3 }
 0x653   :  { %v3707_v63 = vadd.f32 %v3706_v45, %v3618_v13  ;;  %v3530_v11 = vpop.f32.mrf.mxu0  ;;  %v3619_v53 = vpop.f32.mrf.mxu1 }
 0x654   :  { %v3531_v54 = vadd.f32 %v6000_v5, %v3530_v11 }
 0x655   :  { %v3796_v35 = vadd.f32 %v3795_v28, %v3707_v63 }
 0x656   :  { %v3620_v22 = vadd.f32 %v3619_v53, %v3531_v54 }
 0x657   :  { %3842 = vst [vmem:[%s6171_s7 + $0xb0] sm:$0xff] %v3796_v35 }
 0x65a   :  { %v3708_v49 = vpop.f32.mrf.mxu2  ;;  %v3797_v43 = vpop.f32.mrf.mxu3 }
 0x65b   :  { %v3709_v57 = vadd.f32 %v3708_v49, %v3620_v22  ;;  %v3533_v48 = vpop.f32.mrf.mxu0  ;;  %v3622_v27 = vpop.f32.mrf.mxu1 }
 0x65c   :  { %v3534_v33 = vadd.f32 %v6000_v5, %v3533_v48 }
 0x65d   :  { %v3798_v52 = vadd.f32 %v3797_v43, %v3709_v57 }
 0x65e   :  { %v3623_v31 = vadd.f32 %v3622_v27, %v3534_v33 }
 0x65f   :  { %3843 = vst [vmem:[%s6171_s7 + $0xb8] sm:$0xff] %v3798_v52 }
 0x662   :  { %v3711_v55 = vpop.f32.mrf.mxu2  ;;  %v3800_v56 = vpop.f32.mrf.mxu3 }
 0x663   :  { %v3712_v42 = vadd.f32 %v3711_v55, %v3623_v31  ;;  %v3535_v59 = vpop.f32.mrf.mxu0  ;;  %v3624_v47 = vpop.f32.mrf.mxu1 }
 0x664   :  { %v3536_v26 = vadd.f32 %v6000_v5, %v3535_v59 }
 0x665   :  { %v3801_v2 = vadd.f32 %v3800_v56, %v3712_v42 }
 0x666   :  { %v3625_v20 = vadd.f32 %v3624_v47, %v3536_v26 }
 0x667   :  { %3844 = vst [vmem:[%s6171_s7 + $0xc0] sm:$0xff] %v3801_v2 }
 0x66a   :  { %v3713_v39 = vpop.f32.mrf.mxu2  ;;  %v3802_v34 = vpop.f32.mrf.mxu3 }
 0x66b   :  { %v3714_v4 = vadd.f32 %v3713_v39, %v3625_v20  ;;  %v3538_v1 = vpop.f32.mrf.mxu0  ;;  %v3627_v16 = vpop.f32.mrf.mxu1 }
 0x66c   :  { %v3539_v61 = vadd.f32 %v6000_v5, %v3538_v1 }
 0x66d   :  { %v3803_v3 = vadd.f32 %v3802_v34, %v3714_v4 }
 0x66e   :  { %v3628_v12 = vadd.f32 %v3627_v16, %v3539_v61 }
 0x66f   :  { %3845 = vst [vmem:[%s6171_s7 + $0xc8] sm:$0xff] %v3803_v3 }
 0x672   :  { %v3716_v37 = vpop.f32.mrf.mxu2  ;;  %v3805_v7 = vpop.f32.mrf.mxu3 }
 0x673   :  { %v3717_v36 = vadd.f32 %v3716_v37, %v3628_v12  ;;  %v3540_v23 = vpop.f32.mrf.mxu0  ;;  %v3629_v0 = vpop.f32.mrf.mxu1 }
 0x674   :  { %v3541_v44 = vadd.f32 %v6000_v5, %v3540_v23 }
 0x675   :  { %v3806_v60 = vadd.f32 %v3805_v7, %v3717_v36 }
 0x676   :  { %v3630_v10 = vadd.f32 %v3629_v0, %v3541_v44 }
 0x677   :  { %3846 = vst [vmem:[%s6171_s7 + $0xd0] sm:$0xff] %v3806_v60 }
 0x67a   :  { %v3718_v24 = vpop.f32.mrf.mxu2  ;;  %v3807_v38 = vpop.f32.mrf.mxu3 }
 0x67b   :  { %v3719_v15 = vadd.f32 %v3718_v24, %v3630_v10  ;;  %v3543_v41 = vpop.f32.mrf.mxu0  ;;  %v3632_v8 = vpop.f32.mrf.mxu1 }
 0x67c   :  { %v3544_v9 = vadd.f32 %v6000_v5, %v3543_v41 }
 0x67d   :  { %v3808_v30 = vadd.f32 %v3807_v38, %v3719_v15 }
 0x67e   :  { %v3633_v17 = vadd.f32 %v3632_v8, %v3544_v9 }
 0x67f   :  { %3847 = vst [vmem:[%s6171_s7 + $0xd8] sm:$0xff] %v3808_v30 }
 0x682   :  { %v3721_v50 = vpop.f32.mrf.mxu2  ;;  %v3810_v40 = vpop.f32.mrf.mxu3 }
 0x683   :  { %v3722_v32 = vadd.f32 %v3721_v50, %v3633_v17  ;;  %v3545_v14 = vpop.f32.mrf.mxu0  ;;  %v3634_v19 = vpop.f32.mrf.mxu1 }
 0x684   :  { %v3546_v46 = vadd.f32 %v6000_v5, %v3545_v14 }
 0x685   :  { %v3811_v25 = vadd.f32 %v3810_v40, %v3722_v32 }
 0x686   :  { %v3635_v58 = vadd.f32 %v3634_v19, %v3546_v46 }
 0x687   :  { %3848 = vst [vmem:[%s6171_s7 + $0xe0] sm:$0xff] %v3811_v25 }
 0x68a   :  { %v3723_v21 = vpop.f32.mrf.mxu2  ;;  %v3812_v18 = vpop.f32.mrf.mxu3 }
 0x68b   :  { %v3724_v29 = vadd.f32 %v3723_v21, %v3635_v58  ;;  %v3548_v51 = vpop.f32.mrf.mxu0  ;;  %v3637_v13 = vpop.f32.mrf.mxu1 }
 0x68c   :  { %v3549_v62 = vadd.f32 %v6000_v5, %v3548_v51 }
 0x68d   :  { %v3813_v6 = vadd.f32 %v3812_v18, %v3724_v29 }
 0x68e   :  { %v3638_v45 = vadd.f32 %v3637_v13, %v3549_v62 }
 0x68f   :  { %3849 = vst [vmem:[%s6171_s7 + $0xe8] sm:$0xff] %v3813_v6 }
 0x692   :  { %v3726_v63 = vpop.f32.mrf.mxu2  ;;  %v3815_v11 = vpop.f32.mrf.mxu3 }
 0x693   :  { %v3727_v28 = vadd.f32 %v3726_v63, %v3638_v45  ;;  %v3550_v53 = vpop.f32.mrf.mxu0  ;;  %v3639_v22 = vpop.f32.mrf.mxu1 }
 0x694   :  { %v3551_v54 = vadd.f32 %v6000_v5, %v3550_v53 }
 0x695   :  { %v3816_v35 = vadd.f32 %v3815_v11, %v3727_v28 }
 0x696   :  { %v3640_v49 = vadd.f32 %v3639_v22, %v3551_v54 }
 0x697   :  { %3850 = vst [vmem:[%s6171_s7 + $0xf0] sm:$0xff] %v3816_v35 }
 0x69a   :  { %v3728_v57 = vpop.f32.mrf.mxu2  ;;  %v3817_v48 = vpop.f32.mrf.mxu3 }
 0x69b   :  { %v3729_v43 = vadd.f32 %v3728_v57, %v3640_v49 }
 0x69d   :  { %v3818_v27 = vadd.f32 %v3817_v48, %v3729_v43 }
 0x69f   :  { %3851 = vst [vmem:[%s6171_s7 + $0xf8] sm:$0xff] %v3818_v27 }
 0x6a0   :  { %3856 = vsyncpa [#allocation3], 1 }
 0x6a1   :  { %3857 = vsyncpa [#allocation5], 1 }

</bundles_post_ra>
